<compile_context>
chip_gen: v7x
topology: tpu7x:2x2x1
jax: 0.10.0
libtpu: 0.0.40
codegen_flags: <defaults>
</compile_context>

<pallas_src>
import functools

import jax
import jax.numpy as jnp
from jax.experimental import pallas as pl
from jax.experimental.pallas import tpu as pltpu


def _round_up(n, m):
    return (n + m - 1) // m * m


def _pick_strip(h):
    # Row-strip height: keeps acc + two tap operands comfortably inside vregs.
    for cand in (32, 16, 8):
        if h % cand == 0:
            return cand
    return h


def pixel_attention_kernel(xp_ref, pp_ref, wtab_ref, o_ref, *, H, Wo, K, TH):
    """One (batch, channel) plane per grid step.

    xp_ref, pp_ref : (1, 1, Hp, Wl)  reflect-padded (then lane zero-extended)
                     x / pattn1 plane; lane axis = width (lane-dense).
    wtab_ref       : (C, 2*K*K + 1)  SMEM scalar table, row c =
                     [x-path taps (K*K) | pattn1-path taps (K*K) | bias].
    o_ref          : (1, 1, H, Wo)   sigmoid(conv) output plane, Wo = lane-padded W.
    """
    c = pl.program_id(1)
    KK = K * K

    # Per-channel scalars read once from SMEM (scalar slots; VALU untouched).
    wx = [wtab_ref[c, t] for t in range(KK)]
    wp = [wtab_ref[c, KK + t] for t in range(KK)]
    bias = wtab_ref[c, 2 * KK]

    n_strips = H // TH
    for s in range(n_strips):                      # static: all slices below are static
        r0 = s * TH
        acc = jnp.zeros((TH, Wo), jnp.float32)
        for kh in range(K):
            for kw in range(K):
                t = kh * K + kw
                # Tap windows read straight from the refs (no big hoisted
                # slices); scalar weight broadcast, f32 accumulate.
                xw = xp_ref[0, 0, r0 + kh:r0 + kh + TH, kw:kw + Wo]
                pw = pp_ref[0, 0, r0 + kh:r0 + kh + TH, kw:kw + Wo]
                acc = acc + xw * wx[t] + pw * wp[t]
        o_ref[0, 0, r0:r0 + TH, :] = jax.nn.sigmoid(acc + bias).astype(o_ref.dtype)


def pixel_attention_forward(x, pattn1, w, b):
    """x, pattn1: (B, C, H, W) f32; w: (C, 2, K, K) (PyTorch Conv2d groups=C layout); b: (C,).

    Returns sigmoid(grouped KxK reflect-pad conv of the channel-interleaved pair),
    shape (B, C, H, W), matching PixelAttention.forward.  Requires H, W >= K//2 + 1
    (reflect-pad constraint, same as PyTorch).
    """
    B, C, H, W = x.shape
    K = w.shape[-1]
    P = (K - 1) // 2
    Hp = H + 2 * P

    # Lane-dense sizing: output width padded to a 128-lane multiple; input width
    # zero-extended (after the reflect pad) so every tap window [kw, kw+Wo) is in
    # range.  Columns >= W of the output are garbage and sliced off at the end
    # (a no-op when W is already a multiple of 128).
    Wo = _round_up(W, 128)
    Wl = _round_up(Wo + 2 * P, 128)

    def prep(a):  # reflect pad (PyTorch 'reflect' semantics) + lane zero-extension
        a = jnp.pad(a, ((0, 0), (0, 0), (P, P), (P, P)), mode="reflect")
        return jnp.pad(a, ((0, 0), (0, 0), (0, 0), (0, Wl - (W + 2 * P))))

    xp = prep(x)        # (B, C, Hp, Wl)
    pp = prep(pattn1)   # (B, C, Hp, Wl)

    KK = K * K
    # SMEM scalar table: w[c, 0] multiplies x_c, w[c, 1] multiplies pattn1_c
    # (exactly the cat + 'b c t h w -> b (c t) h w' interleave of the module).
    wtab = jnp.concatenate(
        [w[:, 0].reshape(C, KK), w[:, 1].reshape(C, KK), b.reshape(C, 1)],
        axis=1,
    ).astype(jnp.float32)                           # (C, 2*K*K + 1)

    TH = _pick_strip(H)
    kernel = functools.partial(pixel_attention_kernel, H=H, Wo=Wo, K=K, TH=TH)

    out = pl.pallas_call(
        kernel,
        out_shape=jax.ShapeDtypeStruct((B, C, H, Wo), jnp.float32),
        grid_spec=pltpu.PrefetchScalarGridSpec(
            num_scalar_prefetch=0,
            grid=(B, C),
            in_specs=[
                pl.BlockSpec((1, 1, Hp, Wl), lambda bb, cc: (bb, cc, 0, 0)),
                pl.BlockSpec((1, 1, Hp, Wl), lambda bb, cc: (bb, cc, 0, 0)),
                pl.BlockSpec(memory_space=pltpu.MemorySpace.SMEM),
            ],
            out_specs=pl.BlockSpec((1, 1, H, Wo), lambda bb, cc: (bb, cc, 0, 0)),
        ),
        compiler_params=pltpu.CompilerParams(
            dimension_semantics=("parallel", "parallel"),
            # Per-(b, c) blocks keep live VMEM to a few MB even at 256x256
            # images; 48 MiB is safe on v5e/v6e (128 MiB) and v7x (64 MiB).
            vmem_limit_bytes=48 * 1024 * 1024,
        ),
    )(xp, pp, wtab)

    return out[..., :W] if Wo != W else out


def pixel_attention_ref(x, pattn1, w, b):
    """Independent pure-JAX reference (lax grouped conv) for validation."""
    B, C, H, W = x.shape
    P = w.shape[-1] // 2
    # Interleave exactly like cat(dim=2) + 'b c t h w -> b (c t) h w'.
    x2 = jnp.stack([x, pattn1], axis=2).reshape(B, 2 * C, H, W)
    x2p = jnp.pad(x2, ((0, 0), (0, 0), (P, P), (P, P)), mode="reflect")
    y = jax.lax.conv_general_dilated(
        x2p, w, window_strides=(1, 1), padding="VALID",
        dimension_numbers=("NCHW", "OIHW", "NCHW"),
        feature_group_count=C, precision=jax.lax.Precision.HIGHEST)
    return jax.nn.sigmoid(y + b[None, :, None, None])


if __name__ == "__main__":
    key = jax.random.PRNGKey(0)
    k_x, k_p, k_w, k_b = jax.random.split(key, 4)

    B, C, H, W, K = 2, 4, 16, 16, 7

    x = jax.random.normal(k_x, (B, C, H, W), jnp.float32)
    pattn1 = jax.random.normal(k_p, (B, C, H, W), jnp.float32)
    # PyTorch Conv2d(2C, C, 7, groups=C) weight layout: (out=C, in/groups=2, 7, 7)
    w = 0.1 * jax.random.normal(k_w, (C, 2, K, K), jnp.float32)
    b = 0.1 * jax.random.normal(k_b, (C,), jnp.float32)

    fwd = jax.jit(pixel_attention_forward)
    y = fwd(x, pattn1, w, b)
    jax.block_until_ready(y)
    assert y.shape == (B, C, H, W)

    y_ref = pixel_attention_ref(x, pattn1, w, b)
    err = float(jnp.max(jnp.abs(y - y_ref)))
    assert err < 1e-4, f"max abs diff vs lax.conv reference: {err}"

    print("KERNEL_OK")
</pallas_src>

<mosaic_0001>
module attributes {stable_mosaic.version = 11 : i64} {
  func.func @pixel_attention_kernel(%arg0: i32, %arg1: i32, %arg2: memref<1x1x22x256xf32, #tpu.memory_space<vmem>>, %arg3: memref<1x1x22x256xf32, #tpu.memory_space<vmem>>, %arg4: memref<4x99xf32, #tpu.memory_space<smem>>, %arg5: memref<1x1x16x128xf32, #tpu.memory_space<vmem>>) attributes {dimension_semantics = [#tpu.dimension_semantics<parallel>, #tpu.dimension_semantics<parallel>], iteration_bounds = array<i64: 2, 4>, scalar_prefetch = 0 : i64, scratch_operands = 0 : i64, tpu.core_type = #tpu.core_type<tc>, window_params = [{transform_indices = @transform_0, window_bounds = array<i64: 1, 1, 22, 256>}, {transform_indices = @transform_1, window_bounds = array<i64: 1, 1, 22, 256>}, {transform_indices = @transform_2, window_bounds = array<i64: 4, 99>}, {transform_indices = @transform_3, window_bounds = array<i64: 1, 1, 16, 128>}]} {
    %0 = arith.index_cast %arg1 : i32 to index
    %c0 = arith.constant 0 : index
    %1 = memref.load %arg4[%0, %c0] : memref<4x99xf32, #tpu.memory_space<smem>>
    %2 = arith.index_cast %arg1 : i32 to index
    %c1 = arith.constant 1 : index
    %3 = memref.load %arg4[%2, %c1] : memref<4x99xf32, #tpu.memory_space<smem>>
    %4 = arith.index_cast %arg1 : i32 to index
    %c2 = arith.constant 2 : index
    %5 = memref.load %arg4[%4, %c2] : memref<4x99xf32, #tpu.memory_space<smem>>
    %6 = arith.index_cast %arg1 : i32 to index
    %c3 = arith.constant 3 : index
    %7 = memref.load %arg4[%6, %c3] : memref<4x99xf32, #tpu.memory_space<smem>>
    %8 = arith.index_cast %arg1 : i32 to index
    %c4 = arith.constant 4 : index
    %9 = memref.load %arg4[%8, %c4] : memref<4x99xf32, #tpu.memory_space<smem>>
    %10 = arith.index_cast %arg1 : i32 to index
    %c5 = arith.constant 5 : index
    %11 = memref.load %arg4[%10, %c5] : memref<4x99xf32, #tpu.memory_space<smem>>
    %12 = arith.index_cast %arg1 : i32 to index
    %c6 = arith.constant 6 : index
    %13 = memref.load %arg4[%12, %c6] : memref<4x99xf32, #tpu.memory_space<smem>>
    %14 = arith.index_cast %arg1 : i32 to index
    %c7 = arith.constant 7 : index
    %15 = memref.load %arg4[%14, %c7] : memref<4x99xf32, #tpu.memory_space<smem>>
    %16 = arith.index_cast %arg1 : i32 to index
    %c8 = arith.constant 8 : index
    %17 = memref.load %arg4[%16, %c8] : memref<4x99xf32, #tpu.memory_space<smem>>
    %18 = arith.index_cast %arg1 : i32 to index
    %c9 = arith.constant 9 : index
    %19 = memref.load %arg4[%18, %c9] : memref<4x99xf32, #tpu.memory_space<smem>>
    %20 = arith.index_cast %arg1 : i32 to index
    %c10 = arith.constant 10 : index
    %21 = memref.load %arg4[%20, %c10] : memref<4x99xf32, #tpu.memory_space<smem>>
    %22 = arith.index_cast %arg1 : i32 to index
    %c11 = arith.constant 11 : index
    %23 = memref.load %arg4[%22, %c11] : memref<4x99xf32, #tpu.memory_space<smem>>
    %24 = arith.index_cast %arg1 : i32 to index
    %c12 = arith.constant 12 : index
    %25 = memref.load %arg4[%24, %c12] : memref<4x99xf32, #tpu.memory_space<smem>>
    %26 = arith.index_cast %arg1 : i32 to index
    %c13 = arith.constant 13 : index
    %27 = memref.load %arg4[%26, %c13] : memref<4x99xf32, #tpu.memory_space<smem>>
    %28 = arith.index_cast %arg1 : i32 to index
    %c14 = arith.constant 14 : index
    %29 = memref.load %arg4[%28, %c14] : memref<4x99xf32, #tpu.memory_space<smem>>
    %30 = arith.index_cast %arg1 : i32 to index
    %c15 = arith.constant 15 : index
    %31 = memref.load %arg4[%30, %c15] : memref<4x99xf32, #tpu.memory_space<smem>>
    %32 = arith.index_cast %arg1 : i32 to index
    %c16 = arith.constant 16 : index
    %33 = memref.load %arg4[%32, %c16] : memref<4x99xf32, #tpu.memory_space<smem>>
    %34 = arith.index_cast %arg1 : i32 to index
    %c17 = arith.constant 17 : index
    %35 = memref.load %arg4[%34, %c17] : memref<4x99xf32, #tpu.memory_space<smem>>
    %36 = arith.index_cast %arg1 : i32 to index
    %c18 = arith.constant 18 : index
    %37 = memref.load %arg4[%36, %c18] : memref<4x99xf32, #tpu.memory_space<smem>>
    %38 = arith.index_cast %arg1 : i32 to index
    %c19 = arith.constant 19 : index
    %39 = memref.load %arg4[%38, %c19] : memref<4x99xf32, #tpu.memory_space<smem>>
    %40 = arith.index_cast %arg1 : i32 to index
    %c20 = arith.constant 20 : index
    %41 = memref.load %arg4[%40, %c20] : memref<4x99xf32, #tpu.memory_space<smem>>
    %42 = arith.index_cast %arg1 : i32 to index
    %c21 = arith.constant 21 : index
    %43 = memref.load %arg4[%42, %c21] : memref<4x99xf32, #tpu.memory_space<smem>>
    %44 = arith.index_cast %arg1 : i32 to index
    %c22 = arith.constant 22 : index
    %45 = memref.load %arg4[%44, %c22] : memref<4x99xf32, #tpu.memory_space<smem>>
    %46 = arith.index_cast %arg1 : i32 to index
    %c23 = arith.constant 23 : index
    %47 = memref.load %arg4[%46, %c23] : memref<4x99xf32, #tpu.memory_space<smem>>
    %48 = arith.index_cast %arg1 : i32 to index
    %c24 = arith.constant 24 : index
    %49 = memref.load %arg4[%48, %c24] : memref<4x99xf32, #tpu.memory_space<smem>>
    %50 = arith.index_cast %arg1 : i32 to index
    %c25 = arith.constant 25 : index
    %51 = memref.load %arg4[%50, %c25] : memref<4x99xf32, #tpu.memory_space<smem>>
    %52 = arith.index_cast %arg1 : i32 to index
    %c26 = arith.constant 26 : index
    %53 = memref.load %arg4[%52, %c26] : memref<4x99xf32, #tpu.memory_space<smem>>
    %54 = arith.index_cast %arg1 : i32 to index
    %c27 = arith.constant 27 : index
    %55 = memref.load %arg4[%54, %c27] : memref<4x99xf32, #tpu.memory_space<smem>>
    %56 = arith.index_cast %arg1 : i32 to index
    %c28 = arith.constant 28 : index
    %57 = memref.load %arg4[%56, %c28] : memref<4x99xf32, #tpu.memory_space<smem>>
    %58 = arith.index_cast %arg1 : i32 to index
    %c29 = arith.constant 29 : index
    %59 = memref.load %arg4[%58, %c29] : memref<4x99xf32, #tpu.memory_space<smem>>
    %60 = arith.index_cast %arg1 : i32 to index
    %c30 = arith.constant 30 : index
    %61 = memref.load %arg4[%60, %c30] : memref<4x99xf32, #tpu.memory_space<smem>>
    %62 = arith.index_cast %arg1 : i32 to index
    %c31 = arith.constant 31 : index
    %63 = memref.load %arg4[%62, %c31] : memref<4x99xf32, #tpu.memory_space<smem>>
    %64 = arith.index_cast %arg1 : i32 to index
    %c32 = arith.constant 32 : index
    %65 = memref.load %arg4[%64, %c32] : memref<4x99xf32, #tpu.memory_space<smem>>
    %66 = arith.index_cast %arg1 : i32 to index
    %c33 = arith.constant 33 : index
    %67 = memref.load %arg4[%66, %c33] : memref<4x99xf32, #tpu.memory_space<smem>>
    %68 = arith.index_cast %arg1 : i32 to index
    %c34 = arith.constant 34 : index
    %69 = memref.load %arg4[%68, %c34] : memref<4x99xf32, #tpu.memory_space<smem>>
    %70 = arith.index_cast %arg1 : i32 to index
    %c35 = arith.constant 35 : index
    %71 = memref.load %arg4[%70, %c35] : memref<4x99xf32, #tpu.memory_space<smem>>
    %72 = arith.index_cast %arg1 : i32 to index
    %c36 = arith.constant 36 : index
    %73 = memref.load %arg4[%72, %c36] : memref<4x99xf32, #tpu.memory_space<smem>>
    %74 = arith.index_cast %arg1 : i32 to index
    %c37 = arith.constant 37 : index
    %75 = memref.load %arg4[%74, %c37] : memref<4x99xf32, #tpu.memory_space<smem>>
    %76 = arith.index_cast %arg1 : i32 to index
    %c38 = arith.constant 38 : index
    %77 = memref.load %arg4[%76, %c38] : memref<4x99xf32, #tpu.memory_space<smem>>
    %78 = arith.index_cast %arg1 : i32 to index
    %c39 = arith.constant 39 : index
    %79 = memref.load %arg4[%78, %c39] : memref<4x99xf32, #tpu.memory_space<smem>>
    %80 = arith.index_cast %arg1 : i32 to index
    %c40 = arith.constant 40 : index
    %81 = memref.load %arg4[%80, %c40] : memref<4x99xf32, #tpu.memory_space<smem>>
    %82 = arith.index_cast %arg1 : i32 to index
    %c41 = arith.constant 41 : index
    %83 = memref.load %arg4[%82, %c41] : memref<4x99xf32, #tpu.memory_space<smem>>
    %84 = arith.index_cast %arg1 : i32 to index
    %c42 = arith.constant 42 : index
    %85 = memref.load %arg4[%84, %c42] : memref<4x99xf32, #tpu.memory_space<smem>>
    %86 = arith.index_cast %arg1 : i32 to index
    %c43 = arith.constant 43 : index
    %87 = memref.load %arg4[%86, %c43] : memref<4x99xf32, #tpu.memory_space<smem>>
    %88 = arith.index_cast %arg1 : i32 to index
    %c44 = arith.constant 44 : index
    %89 = memref.load %arg4[%88, %c44] : memref<4x99xf32, #tpu.memory_space<smem>>
    %90 = arith.index_cast %arg1 : i32 to index
    %c45 = arith.constant 45 : index
    %91 = memref.load %arg4[%90, %c45] : memref<4x99xf32, #tpu.memory_space<smem>>
    %92 = arith.index_cast %arg1 : i32 to index
    %c46 = arith.constant 46 : index
    %93 = memref.load %arg4[%92, %c46] : memref<4x99xf32, #tpu.memory_space<smem>>
    %94 = arith.index_cast %arg1 : i32 to index
    %c47 = arith.constant 47 : index
    %95 = memref.load %arg4[%94, %c47] : memref<4x99xf32, #tpu.memory_space<smem>>
    %96 = arith.index_cast %arg1 : i32 to index
    %c48 = arith.constant 48 : index
    %97 = memref.load %arg4[%96, %c48] : memref<4x99xf32, #tpu.memory_space<smem>>
    %98 = arith.index_cast %arg1 : i32 to index
    %c49 = arith.constant 49 : index
    %99 = memref.load %arg4[%98, %c49] : memref<4x99xf32, #tpu.memory_space<smem>>
    %100 = arith.index_cast %arg1 : i32 to index
    %c50 = arith.constant 50 : index
    %101 = memref.load %arg4[%100, %c50] : memref<4x99xf32, #tpu.memory_space<smem>>
    %102 = arith.index_cast %arg1 : i32 to index
    %c51 = arith.constant 51 : index
    %103 = memref.load %arg4[%102, %c51] : memref<4x99xf32, #tpu.memory_space<smem>>
    %104 = arith.index_cast %arg1 : i32 to index
    %c52 = arith.constant 52 : index
    %105 = memref.load %arg4[%104, %c52] : memref<4x99xf32, #tpu.memory_space<smem>>
    %106 = arith.index_cast %arg1 : i32 to index
    %c53 = arith.constant 53 : index
    %107 = memref.load %arg4[%106, %c53] : memref<4x99xf32, #tpu.memory_space<smem>>
    %108 = arith.index_cast %arg1 : i32 to index
    %c54 = arith.constant 54 : index
    %109 = memref.load %arg4[%108, %c54] : memref<4x99xf32, #tpu.memory_space<smem>>
    %110 = arith.index_cast %arg1 : i32 to index
    %c55 = arith.constant 55 : index
    %111 = memref.load %arg4[%110, %c55] : memref<4x99xf32, #tpu.memory_space<smem>>
    %112 = arith.index_cast %arg1 : i32 to index
    %c56 = arith.constant 56 : index
    %113 = memref.load %arg4[%112, %c56] : memref<4x99xf32, #tpu.memory_space<smem>>
    %114 = arith.index_cast %arg1 : i32 to index
    %c57 = arith.constant 57 : index
    %115 = memref.load %arg4[%114, %c57] : memref<4x99xf32, #tpu.memory_space<smem>>
    %116 = arith.index_cast %arg1 : i32 to index
    %c58 = arith.constant 58 : index
    %117 = memref.load %arg4[%116, %c58] : memref<4x99xf32, #tpu.memory_space<smem>>
    %118 = arith.index_cast %arg1 : i32 to index
    %c59 = arith.constant 59 : index
    %119 = memref.load %arg4[%118, %c59] : memref<4x99xf32, #tpu.memory_space<smem>>
    %120 = arith.index_cast %arg1 : i32 to index
    %c60 = arith.constant 60 : index
    %121 = memref.load %arg4[%120, %c60] : memref<4x99xf32, #tpu.memory_space<smem>>
    %122 = arith.index_cast %arg1 : i32 to index
    %c61 = arith.constant 61 : index
    %123 = memref.load %arg4[%122, %c61] : memref<4x99xf32, #tpu.memory_space<smem>>
    %124 = arith.index_cast %arg1 : i32 to index
    %c62 = arith.constant 62 : index
    %125 = memref.load %arg4[%124, %c62] : memref<4x99xf32, #tpu.memory_space<smem>>
    %126 = arith.index_cast %arg1 : i32 to index
    %c63 = arith.constant 63 : index
    %127 = memref.load %arg4[%126, %c63] : memref<4x99xf32, #tpu.memory_space<smem>>
    %128 = arith.index_cast %arg1 : i32 to index
    %c64 = arith.constant 64 : index
    %129 = memref.load %arg4[%128, %c64] : memref<4x99xf32, #tpu.memory_space<smem>>
    %130 = arith.index_cast %arg1 : i32 to index
    %c65 = arith.constant 65 : index
    %131 = memref.load %arg4[%130, %c65] : memref<4x99xf32, #tpu.memory_space<smem>>
    %132 = arith.index_cast %arg1 : i32 to index
    %c66 = arith.constant 66 : index
    %133 = memref.load %arg4[%132, %c66] : memref<4x99xf32, #tpu.memory_space<smem>>
    %134 = arith.index_cast %arg1 : i32 to index
    %c67 = arith.constant 67 : index
    %135 = memref.load %arg4[%134, %c67] : memref<4x99xf32, #tpu.memory_space<smem>>
    %136 = arith.index_cast %arg1 : i32 to index
    %c68 = arith.constant 68 : index
    %137 = memref.load %arg4[%136, %c68] : memref<4x99xf32, #tpu.memory_space<smem>>
    %138 = arith.index_cast %arg1 : i32 to index
    %c69 = arith.constant 69 : index
    %139 = memref.load %arg4[%138, %c69] : memref<4x99xf32, #tpu.memory_space<smem>>
    %140 = arith.index_cast %arg1 : i32 to index
    %c70 = arith.constant 70 : index
    %141 = memref.load %arg4[%140, %c70] : memref<4x99xf32, #tpu.memory_space<smem>>
    %142 = arith.index_cast %arg1 : i32 to index
    %c71 = arith.constant 71 : index
    %143 = memref.load %arg4[%142, %c71] : memref<4x99xf32, #tpu.memory_space<smem>>
    %144 = arith.index_cast %arg1 : i32 to index
    %c72 = arith.constant 72 : index
    %145 = memref.load %arg4[%144, %c72] : memref<4x99xf32, #tpu.memory_space<smem>>
    %146 = arith.index_cast %arg1 : i32 to index
    %c73 = arith.constant 73 : index
    %147 = memref.load %arg4[%146, %c73] : memref<4x99xf32, #tpu.memory_space<smem>>
    %148 = arith.index_cast %arg1 : i32 to index
    %c74 = arith.constant 74 : index
    %149 = memref.load %arg4[%148, %c74] : memref<4x99xf32, #tpu.memory_space<smem>>
    %150 = arith.index_cast %arg1 : i32 to index
    %c75 = arith.constant 75 : index
    %151 = memref.load %arg4[%150, %c75] : memref<4x99xf32, #tpu.memory_space<smem>>
    %152 = arith.index_cast %arg1 : i32 to index
    %c76 = arith.constant 76 : index
    %153 = memref.load %arg4[%152, %c76] : memref<4x99xf32, #tpu.memory_space<smem>>
    %154 = arith.index_cast %arg1 : i32 to index
    %c77 = arith.constant 77 : index
    %155 = memref.load %arg4[%154, %c77] : memref<4x99xf32, #tpu.memory_space<smem>>
    %156 = arith.index_cast %arg1 : i32 to index
    %c78 = arith.constant 78 : index
    %157 = memref.load %arg4[%156, %c78] : memref<4x99xf32, #tpu.memory_space<smem>>
    %158 = arith.index_cast %arg1 : i32 to index
    %c79 = arith.constant 79 : index
    %159 = memref.load %arg4[%158, %c79] : memref<4x99xf32, #tpu.memory_space<smem>>
    %160 = arith.index_cast %arg1 : i32 to index
    %c80 = arith.constant 80 : index
    %161 = memref.load %arg4[%160, %c80] : memref<4x99xf32, #tpu.memory_space<smem>>
    %162 = arith.index_cast %arg1 : i32 to index
    %c81 = arith.constant 81 : index
    %163 = memref.load %arg4[%162, %c81] : memref<4x99xf32, #tpu.memory_space<smem>>
    %164 = arith.index_cast %arg1 : i32 to index
    %c82 = arith.constant 82 : index
    %165 = memref.load %arg4[%164, %c82] : memref<4x99xf32, #tpu.memory_space<smem>>
    %166 = arith.index_cast %arg1 : i32 to index
    %c83 = arith.constant 83 : index
    %167 = memref.load %arg4[%166, %c83] : memref<4x99xf32, #tpu.memory_space<smem>>
    %168 = arith.index_cast %arg1 : i32 to index
    %c84 = arith.constant 84 : index
    %169 = memref.load %arg4[%168, %c84] : memref<4x99xf32, #tpu.memory_space<smem>>
    %170 = arith.index_cast %arg1 : i32 to index
    %c85 = arith.constant 85 : index
    %171 = memref.load %arg4[%170, %c85] : memref<4x99xf32, #tpu.memory_space<smem>>
    %172 = arith.index_cast %arg1 : i32 to index
    %c86 = arith.constant 86 : index
    %173 = memref.load %arg4[%172, %c86] : memref<4x99xf32, #tpu.memory_space<smem>>
    %174 = arith.index_cast %arg1 : i32 to index
    %c87 = arith.constant 87 : index
    %175 = memref.load %arg4[%174, %c87] : memref<4x99xf32, #tpu.memory_space<smem>>
    %176 = arith.index_cast %arg1 : i32 to index
    %c88 = arith.constant 88 : index
    %177 = memref.load %arg4[%176, %c88] : memref<4x99xf32, #tpu.memory_space<smem>>
    %178 = arith.index_cast %arg1 : i32 to index
    %c89 = arith.constant 89 : index
    %179 = memref.load %arg4[%178, %c89] : memref<4x99xf32, #tpu.memory_space<smem>>
    %180 = arith.index_cast %arg1 : i32 to index
    %c90 = arith.constant 90 : index
    %181 = memref.load %arg4[%180, %c90] : memref<4x99xf32, #tpu.memory_space<smem>>
    %182 = arith.index_cast %arg1 : i32 to index
    %c91 = arith.constant 91 : index
    %183 = memref.load %arg4[%182, %c91] : memref<4x99xf32, #tpu.memory_space<smem>>
    %184 = arith.index_cast %arg1 : i32 to index
    %c92 = arith.constant 92 : index
    %185 = memref.load %arg4[%184, %c92] : memref<4x99xf32, #tpu.memory_space<smem>>
    %186 = arith.index_cast %arg1 : i32 to index
    %c93 = arith.constant 93 : index
    %187 = memref.load %arg4[%186, %c93] : memref<4x99xf32, #tpu.memory_space<smem>>
    %188 = arith.index_cast %arg1 : i32 to index
    %c94 = arith.constant 94 : index
    %189 = memref.load %arg4[%188, %c94] : memref<4x99xf32, #tpu.memory_space<smem>>
    %190 = arith.index_cast %arg1 : i32 to index
    %c95 = arith.constant 95 : index
    %191 = memref.load %arg4[%190, %c95] : memref<4x99xf32, #tpu.memory_space<smem>>
    %192 = arith.index_cast %arg1 : i32 to index
    %c96 = arith.constant 96 : index
    %193 = memref.load %arg4[%192, %c96] : memref<4x99xf32, #tpu.memory_space<smem>>
    %194 = arith.index_cast %arg1 : i32 to index
    %c97 = arith.constant 97 : index
    %195 = memref.load %arg4[%194, %c97] : memref<4x99xf32, #tpu.memory_space<smem>>
    %196 = arith.index_cast %arg1 : i32 to index
    %c98 = arith.constant 98 : index
    %197 = memref.load %arg4[%196, %c98] : memref<4x99xf32, #tpu.memory_space<smem>>
    %cst = arith.constant 0.000000e+00 : f32
    %198 = vector.broadcast %cst : f32 to vector<16x128xf32>
    %c0_0 = arith.constant 0 : index
    %c0_1 = arith.constant 0 : index
    %c0_2 = arith.constant 0 : index
    %c0_3 = arith.constant 0 : index
    %199 = vector.load %arg2[%c0_0, %c0_1, %c0_2, %c0_3] : memref<1x1x22x256xf32, #tpu.memory_space<vmem>>, vector<1x1x16x128xf32>
    %200 = vector.shape_cast %199 : vector<1x1x16x128xf32> to vector<16x128xf32>
    %c0_4 = arith.constant 0 : index
    %c0_5 = arith.constant 0 : index
    %c0_6 = arith.constant 0 : index
    %c0_7 = arith.constant 0 : index
    %201 = vector.load %arg3[%c0_4, %c0_5, %c0_6, %c0_7] : memref<1x1x22x256xf32, #tpu.memory_space<vmem>>, vector<1x1x16x128xf32>
    %202 = vector.shape_cast %201 : vector<1x1x16x128xf32> to vector<16x128xf32>
    %203 = vector.broadcast %1 : f32 to vector<16x128xf32>
    %204 = arith.mulf %200, %203 : vector<16x128xf32>
    %205 = arith.addf %198, %204 : vector<16x128xf32>
    %206 = vector.broadcast %99 : f32 to vector<16x128xf32>
    %207 = arith.mulf %202, %206 : vector<16x128xf32>
    %208 = arith.addf %205, %207 : vector<16x128xf32>
    %c0_8 = arith.constant 0 : index
    %c0_9 = arith.constant 0 : index
    %c0_10 = arith.constant 0 : index
    %c1_11 = arith.constant 1 : index
    %209 = vector.load %arg2[%c0_8, %c0_9, %c0_10, %c1_11] : memref<1x1x22x256xf32, #tpu.memory_space<vmem>>, vector<1x1x16x128xf32>
    %210 = vector.shape_cast %209 : vector<1x1x16x128xf32> to vector<16x128xf32>
    %c0_12 = arith.constant 0 : index
    %c0_13 = arith.constant 0 : index
    %c0_14 = arith.constant 0 : index
    %c1_15 = arith.constant 1 : index
    %211 = vector.load %arg3[%c0_12, %c0_13, %c0_14, %c1_15] : memref<1x1x22x256xf32, #tpu.memory_space<vmem>>, vector<1x1x16x128xf32>
    %212 = vector.shape_cast %211 : vector<1x1x16x128xf32> to vector<16x128xf32>
    %213 = vector.broadcast %3 : f32 to vector<16x128xf32>
    %214 = arith.mulf %210, %213 : vector<16x128xf32>
    %215 = arith.addf %208, %214 : vector<16x128xf32>
    %216 = vector.broadcast %101 : f32 to vector<16x128xf32>
    %217 = arith.mulf %212, %216 : vector<16x128xf32>
    %218 = arith.addf %215, %217 : vector<16x128xf32>
    %c0_16 = arith.constant 0 : index
    %c0_17 = arith.constant 0 : index
    %c0_18 = arith.constant 0 : index
    %c2_19 = arith.constant 2 : index
    %219 = vector.load %arg2[%c0_16, %c0_17, %c0_18, %c2_19] : memref<1x1x22x256xf32, #tpu.memory_space<vmem>>, vector<1x1x16x128xf32>
    %220 = vector.shape_cast %219 : vector<1x1x16x128xf32> to vector<16x128xf32>
    %c0_20 = arith.constant 0 : index
    %c0_21 = arith.constant 0 : index
    %c0_22 = arith.constant 0 : index
    %c2_23 = arith.constant 2 : index
    %221 = vector.load %arg3[%c0_20, %c0_21, %c0_22, %c2_23] : memref<1x1x22x256xf32, #tpu.memory_space<vmem>>, vector<1x1x16x128xf32>
    %222 = vector.shape_cast %221 : vector<1x1x16x128xf32> to vector<16x128xf32>
    %223 = vector.broadcast %5 : f32 to vector<16x128xf32>
    %224 = arith.mulf %220, %223 : vector<16x128xf32>
    %225 = arith.addf %218, %224 : vector<16x128xf32>
    %226 = vector.broadcast %103 : f32 to vector<16x128xf32>
    %227 = arith.mulf %222, %226 : vector<16x128xf32>
    %228 = arith.addf %225, %227 : vector<16x128xf32>
    %c0_24 = arith.constant 0 : index
    %c0_25 = arith.constant 0 : index
    %c0_26 = arith.constant 0 : index
    %c3_27 = arith.constant 3 : index
    %229 = vector.load %arg2[%c0_24, %c0_25, %c0_26, %c3_27] : memref<1x1x22x256xf32, #tpu.memory_space<vmem>>, vector<1x1x16x128xf32>
    %230 = vector.shape_cast %229 : vector<1x1x16x128xf32> to vector<16x128xf32>
    %c0_28 = arith.constant 0 : index
    %c0_29 = arith.constant 0 : index
    %c0_30 = arith.constant 0 : index
    %c3_31 = arith.constant 3 : index
    %231 = vector.load %arg3[%c0_28, %c0_29, %c0_30, %c3_31] : memref<1x1x22x256xf32, #tpu.memory_space<vmem>>, vector<1x1x16x128xf32>
    %232 = vector.shape_cast %231 : vector<1x1x16x128xf32> to vector<16x128xf32>
    %233 = vector.broadcast %7 : f32 to vector<16x128xf32>
    %234 = arith.mulf %230, %233 : vector<16x128xf32>
    %235 = arith.addf %228, %234 : vector<16x128xf32>
    %236 = vector.broadcast %105 : f32 to vector<16x128xf32>
    %237 = arith.mulf %232, %236 : vector<16x128xf32>
    %238 = arith.addf %235, %237 : vector<16x128xf32>
    %c0_32 = arith.constant 0 : index
    %c0_33 = arith.constant 0 : index
    %c0_34 = arith.constant 0 : index
    %c4_35 = arith.constant 4 : index
    %239 = vector.load %arg2[%c0_32, %c0_33, %c0_34, %c4_35] : memref<1x1x22x256xf32, #tpu.memory_space<vmem>>, vector<1x1x16x128xf32>
    %240 = vector.shape_cast %239 : vector<1x1x16x128xf32> to vector<16x128xf32>
    %c0_36 = arith.constant 0 : index
    %c0_37 = arith.constant 0 : index
    %c0_38 = arith.constant 0 : index
    %c4_39 = arith.constant 4 : index
    %241 = vector.load %arg3[%c0_36, %c0_37, %c0_38, %c4_39] : memref<1x1x22x256xf32, #tpu.memory_space<vmem>>, vector<1x1x16x128xf32>
    %242 = vector.shape_cast %241 : vector<1x1x16x128xf32> to vector<16x128xf32>
    %243 = vector.broadcast %9 : f32 to vector<16x128xf32>
    %244 = arith.mulf %240, %243 : vector<16x128xf32>
    %245 = arith.addf %238, %244 : vector<16x128xf32>
    %246 = vector.broadcast %107 : f32 to vector<16x128xf32>
    %247 = arith.mulf %242, %246 : vector<16x128xf32>
    %248 = arith.addf %245, %247 : vector<16x128xf32>
    %c0_40 = arith.constant 0 : index
    %c0_41 = arith.constant 0 : index
    %c0_42 = arith.constant 0 : index
    %c5_43 = arith.constant 5 : index
    %249 = vector.load %arg2[%c0_40, %c0_41, %c0_42, %c5_43] : memref<1x1x22x256xf32, #tpu.memory_space<vmem>>, vector<1x1x16x128xf32>
    %250 = vector.shape_cast %249 : vector<1x1x16x128xf32> to vector<16x128xf32>
    %c0_44 = arith.constant 0 : index
    %c0_45 = arith.constant 0 : index
    %c0_46 = arith.constant 0 : index
    %c5_47 = arith.constant 5 : index
    %251 = vector.load %arg3[%c0_44, %c0_45, %c0_46, %c5_47] : memref<1x1x22x256xf32, #tpu.memory_space<vmem>>, vector<1x1x16x128xf32>
    %252 = vector.shape_cast %251 : vector<1x1x16x128xf32> to vector<16x128xf32>
    %253 = vector.broadcast %11 : f32 to vector<16x128xf32>
    %254 = arith.mulf %250, %253 : vector<16x128xf32>
    %255 = arith.addf %248, %254 : vector<16x128xf32>
    %256 = vector.broadcast %109 : f32 to vector<16x128xf32>
    %257 = arith.mulf %252, %256 : vector<16x128xf32>
    %258 = arith.addf %255, %257 : vector<16x128xf32>
    %c0_48 = arith.constant 0 : index
    %c0_49 = arith.constant 0 : index
    %c0_50 = arith.constant 0 : index
    %c6_51 = arith.constant 6 : index
    %259 = vector.load %arg2[%c0_48, %c0_49, %c0_50, %c6_51] : memref<1x1x22x256xf32, #tpu.memory_space<vmem>>, vector<1x1x16x128xf32>
    %260 = vector.shape_cast %259 : vector<1x1x16x128xf32> to vector<16x128xf32>
    %c0_52 = arith.constant 0 : index
    %c0_53 = arith.constant 0 : index
    %c0_54 = arith.constant 0 : index
    %c6_55 = arith.constant 6 : index
    %261 = vector.load %arg3[%c0_52, %c0_53, %c0_54, %c6_55] : memref<1x1x22x256xf32, #tpu.memory_space<vmem>>, vector<1x1x16x128xf32>
    %262 = vector.shape_cast %261 : vector<1x1x16x128xf32> to vector<16x128xf32>
    %263 = vector.broadcast %13 : f32 to vector<16x128xf32>
    %264 = arith.mulf %260, %263 : vector<16x128xf32>
    %265 = arith.addf %258, %264 : vector<16x128xf32>
    %266 = vector.broadcast %111 : f32 to vector<16x128xf32>
    %267 = arith.mulf %262, %266 : vector<16x128xf32>
    %268 = arith.addf %265, %267 : vector<16x128xf32>
    %c0_56 = arith.constant 0 : index
    %c0_57 = arith.constant 0 : index
    %c1_58 = arith.constant 1 : index
    %c0_59 = arith.constant 0 : index
    %269 = vector.load %arg2[%c0_56, %c0_57, %c1_58, %c0_59] : memref<1x1x22x256xf32, #tpu.memory_space<vmem>>, vector<1x1x16x128xf32>
    %270 = vector.shape_cast %269 : vector<1x1x16x128xf32> to vector<16x128xf32>
    %c0_60 = arith.constant 0 : index
    %c0_61 = arith.constant 0 : index
    %c1_62 = arith.constant 1 : index
    %c0_63 = arith.constant 0 : index
    %271 = vector.load %arg3[%c0_60, %c0_61, %c1_62, %c0_63] : memref<1x1x22x256xf32, #tpu.memory_space<vmem>>, vector<1x1x16x128xf32>
    %272 = vector.shape_cast %271 : vector<1x1x16x128xf32> to vector<16x128xf32>
    %273 = vector.broadcast %15 : f32 to vector<16x128xf32>
    %274 = arith.mulf %270, %273 : vector<16x128xf32>
    %275 = arith.addf %268, %274 : vector<16x128xf32>
    %276 = vector.broadcast %113 : f32 to vector<16x128xf32>
    %277 = arith.mulf %272, %276 : vector<16x128xf32>
    %278 = arith.addf %275, %277 : vector<16x128xf32>
    %c0_64 = arith.constant 0 : index
    %c0_65 = arith.constant 0 : index
    %c1_66 = arith.constant 1 : index
    %c1_67 = arith.constant 1 : index
    %279 = vector.load %arg2[%c0_64, %c0_65, %c1_66, %c1_67] : memref<1x1x22x256xf32, #tpu.memory_space<vmem>>, vector<1x1x16x128xf32>
    %280 = vector.shape_cast %279 : vector<1x1x16x128xf32> to vector<16x128xf32>
    %c0_68 = arith.constant 0 : index
    %c0_69 = arith.constant 0 : index
    %c1_70 = arith.constant 1 : index
    %c1_71 = arith.constant 1 : index
    %281 = vector.load %arg3[%c0_68, %c0_69, %c1_70, %c1_71] : memref<1x1x22x256xf32, #tpu.memory_space<vmem>>, vector<1x1x16x128xf32>
    %282 = vector.shape_cast %281 : vector<1x1x16x128xf32> to vector<16x128xf32>
    %283 = vector.broadcast %17 : f32 to vector<16x128xf32>
    %284 = arith.mulf %280, %283 : vector<16x128xf32>
    %285 = arith.addf %278, %284 : vector<16x128xf32>
    %286 = vector.broadcast %115 : f32 to vector<16x128xf32>
    %287 = arith.mulf %282, %286 : vector<16x128xf32>
    %288 = arith.addf %285, %287 : vector<16x128xf32>
    %c0_72 = arith.constant 0 : index
    %c0_73 = arith.constant 0 : index
    %c1_74 = arith.constant 1 : index
    %c2_75 = arith.constant 2 : index
    %289 = vector.load %arg2[%c0_72, %c0_73, %c1_74, %c2_75] : memref<1x1x22x256xf32, #tpu.memory_space<vmem>>, vector<1x1x16x128xf32>
    %290 = vector.shape_cast %289 : vector<1x1x16x128xf32> to vector<16x128xf32>
    %c0_76 = arith.constant 0 : index
    %c0_77 = arith.constant 0 : index
    %c1_78 = arith.constant 1 : index
    %c2_79 = arith.constant 2 : index
    %291 = vector.load %arg3[%c0_76, %c0_77, %c1_78, %c2_79] : memref<1x1x22x256xf32, #tpu.memory_space<vmem>>, vector<1x1x16x128xf32>
    %292 = vector.shape_cast %291 : vector<1x1x16x128xf32> to vector<16x128xf32>
    %293 = vector.broadcast %19 : f32 to vector<16x128xf32>
    %294 = arith.mulf %290, %293 : vector<16x128xf32>
    %295 = arith.addf %288, %294 : vector<16x128xf32>
    %296 = vector.broadcast %117 : f32 to vector<16x128xf32>
    %297 = arith.mulf %292, %296 : vector<16x128xf32>
    %298 = arith.addf %295, %297 : vector<16x128xf32>
    %c0_80 = arith.constant 0 : index
    %c0_81 = arith.constant 0 : index
    %c1_82 = arith.constant 1 : index
    %c3_83 = arith.constant 3 : index
    %299 = vector.load %arg2[%c0_80, %c0_81, %c1_82, %c3_83] : memref<1x1x22x256xf32, #tpu.memory_space<vmem>>, vector<1x1x16x128xf32>
    %300 = vector.shape_cast %299 : vector<1x1x16x128xf32> to vector<16x128xf32>
    %c0_84 = arith.constant 0 : index
    %c0_85 = arith.constant 0 : index
    %c1_86 = arith.constant 1 : index
    %c3_87 = arith.constant 3 : index
    %301 = vector.load %arg3[%c0_84, %c0_85, %c1_86, %c3_87] : memref<1x1x22x256xf32, #tpu.memory_space<vmem>>, vector<1x1x16x128xf32>
    %302 = vector.shape_cast %301 : vector<1x1x16x128xf32> to vector<16x128xf32>
    %303 = vector.broadcast %21 : f32 to vector<16x128xf32>
    %304 = arith.mulf %300, %303 : vector<16x128xf32>
    %305 = arith.addf %298, %304 : vector<16x128xf32>
    %306 = vector.broadcast %119 : f32 to vector<16x128xf32>
    %307 = arith.mulf %302, %306 : vector<16x128xf32>
    %308 = arith.addf %305, %307 : vector<16x128xf32>
    %c0_88 = arith.constant 0 : index
    %c0_89 = arith.constant 0 : index
    %c1_90 = arith.constant 1 : index
    %c4_91 = arith.constant 4 : index
    %309 = vector.load %arg2[%c0_88, %c0_89, %c1_90, %c4_91] : memref<1x1x22x256xf32, #tpu.memory_space<vmem>>, vector<1x1x16x128xf32>
    %310 = vector.shape_cast %309 : vector<1x1x16x128xf32> to vector<16x128xf32>
    %c0_92 = arith.constant 0 : index
    %c0_93 = arith.constant 0 : index
    %c1_94 = arith.constant 1 : index
    %c4_95 = arith.constant 4 : index
    %311 = vector.load %arg3[%c0_92, %c0_93, %c1_94, %c4_95] : memref<1x1x22x256xf32, #tpu.memory_space<vmem>>, vector<1x1x16x128xf32>
    %312 = vector.shape_cast %311 : vector<1x1x16x128xf32> to vector<16x128xf32>
    %313 = vector.broadcast %23 : f32 to vector<16x128xf32>
    %314 = arith.mulf %310, %313 : vector<16x128xf32>
    %315 = arith.addf %308, %314 : vector<16x128xf32>
    %316 = vector.broadcast %121 : f32 to vector<16x128xf32>
    %317 = arith.mulf %312, %316 : vector<16x128xf32>
    %318 = arith.addf %315, %317 : vector<16x128xf32>
    %c0_96 = arith.constant 0 : index
    %c0_97 = arith.constant 0 : index
    %c1_98 = arith.constant 1 : index
    %c5_99 = arith.constant 5 : index
    %319 = vector.load %arg2[%c0_96, %c0_97, %c1_98, %c5_99] : memref<1x1x22x256xf32, #tpu.memory_space<vmem>>, vector<1x1x16x128xf32>
    %320 = vector.shape_cast %319 : vector<1x1x16x128xf32> to vector<16x128xf32>
    %c0_100 = arith.constant 0 : index
    %c0_101 = arith.constant 0 : index
    %c1_102 = arith.constant 1 : index
    %c5_103 = arith.constant 5 : index
    %321 = vector.load %arg3[%c0_100, %c0_101, %c1_102, %c5_103] : memref<1x1x22x256xf32, #tpu.memory_space<vmem>>, vector<1x1x16x128xf32>
    %322 = vector.shape_cast %321 : vector<1x1x16x128xf32> to vector<16x128xf32>
    %323 = vector.broadcast %25 : f32 to vector<16x128xf32>
    %324 = arith.mulf %320, %323 : vector<16x128xf32>
    %325 = arith.addf %318, %324 : vector<16x128xf32>
    %326 = vector.broadcast %123 : f32 to vector<16x128xf32>
    %327 = arith.mulf %322, %326 : vector<16x128xf32>
    %328 = arith.addf %325, %327 : vector<16x128xf32>
    %c0_104 = arith.constant 0 : index
    %c0_105 = arith.constant 0 : index
    %c1_106 = arith.constant 1 : index
    %c6_107 = arith.constant 6 : index
    %329 = vector.load %arg2[%c0_104, %c0_105, %c1_106, %c6_107] : memref<1x1x22x256xf32, #tpu.memory_space<vmem>>, vector<1x1x16x128xf32>
    %330 = vector.shape_cast %329 : vector<1x1x16x128xf32> to vector<16x128xf32>
    %c0_108 = arith.constant 0 : index
    %c0_109 = arith.constant 0 : index
    %c1_110 = arith.constant 1 : index
    %c6_111 = arith.constant 6 : index
    %331 = vector.load %arg3[%c0_108, %c0_109, %c1_110, %c6_111] : memref<1x1x22x256xf32, #tpu.memory_space<vmem>>, vector<1x1x16x128xf32>
    %332 = vector.shape_cast %331 : vector<1x1x16x128xf32> to vector<16x128xf32>
    %333 = vector.broadcast %27 : f32 to vector<16x128xf32>
    %334 = arith.mulf %330, %333 : vector<16x128xf32>
    %335 = arith.addf %328, %334 : vector<16x128xf32>
    %336 = vector.broadcast %125 : f32 to vector<16x128xf32>
    %337 = arith.mulf %332, %336 : vector<16x128xf32>
    %338 = arith.addf %335, %337 : vector<16x128xf32>
    %c0_112 = arith.constant 0 : index
    %c0_113 = arith.constant 0 : index
    %c2_114 = arith.constant 2 : index
    %c0_115 = arith.constant 0 : index
    %339 = vector.load %arg2[%c0_112, %c0_113, %c2_114, %c0_115] : memref<1x1x22x256xf32, #tpu.memory_space<vmem>>, vector<1x1x16x128xf32>
    %340 = vector.shape_cast %339 : vector<1x1x16x128xf32> to vector<16x128xf32>
    %c0_116 = arith.constant 0 : index
    %c0_117 = arith.constant 0 : index
    %c2_118 = arith.constant 2 : index
    %c0_119 = arith.constant 0 : index
    %341 = vector.load %arg3[%c0_116, %c0_117, %c2_118, %c0_119] : memref<1x1x22x256xf32, #tpu.memory_space<vmem>>, vector<1x1x16x128xf32>
    %342 = vector.shape_cast %341 : vector<1x1x16x128xf32> to vector<16x128xf32>
    %343 = vector.broadcast %29 : f32 to vector<16x128xf32>
    %344 = arith.mulf %340, %343 : vector<16x128xf32>
    %345 = arith.addf %338, %344 : vector<16x128xf32>
    %346 = vector.broadcast %127 : f32 to vector<16x128xf32>
    %347 = arith.mulf %342, %346 : vector<16x128xf32>
    %348 = arith.addf %345, %347 : vector<16x128xf32>
    %c0_120 = arith.constant 0 : index
    %c0_121 = arith.constant 0 : index
    %c2_122 = arith.constant 2 : index
    %c1_123 = arith.constant 1 : index
    %349 = vector.load %arg2[%c0_120, %c0_121, %c2_122, %c1_123] : memref<1x1x22x256xf32, #tpu.memory_space<vmem>>, vector<1x1x16x128xf32>
    %350 = vector.shape_cast %349 : vector<1x1x16x128xf32> to vector<16x128xf32>
    %c0_124 = arith.constant 0 : index
    %c0_125 = arith.constant 0 : index
    %c2_126 = arith.constant 2 : index
    %c1_127 = arith.constant 1 : index
    %351 = vector.load %arg3[%c0_124, %c0_125, %c2_126, %c1_127] : memref<1x1x22x256xf32, #tpu.memory_space<vmem>>, vector<1x1x16x128xf32>
    %352 = vector.shape_cast %351 : vector<1x1x16x128xf32> to vector<16x128xf32>
    %353 = vector.broadcast %31 : f32 to vector<16x128xf32>
    %354 = arith.mulf %350, %353 : vector<16x128xf32>
    %355 = arith.addf %348, %354 : vector<16x128xf32>
    %356 = vector.broadcast %129 : f32 to vector<16x128xf32>
    %357 = arith.mulf %352, %356 : vector<16x128xf32>
    %358 = arith.addf %355, %357 : vector<16x128xf32>
    %c0_128 = arith.constant 0 : index
    %c0_129 = arith.constant 0 : index
    %c2_130 = arith.constant 2 : index
    %c2_131 = arith.constant 2 : index
    %359 = vector.load %arg2[%c0_128, %c0_129, %c2_130, %c2_131] : memref<1x1x22x256xf32, #tpu.memory_space<vmem>>, vector<1x1x16x128xf32>
    %360 = vector.shape_cast %359 : vector<1x1x16x128xf32> to vector<16x128xf32>
    %c0_132 = arith.constant 0 : index
    %c0_133 = arith.constant 0 : index
    %c2_134 = arith.constant 2 : index
    %c2_135 = arith.constant 2 : index
    %361 = vector.load %arg3[%c0_132, %c0_133, %c2_134, %c2_135] : memref<1x1x22x256xf32, #tpu.memory_space<vmem>>, vector<1x1x16x128xf32>
    %362 = vector.shape_cast %361 : vector<1x1x16x128xf32> to vector<16x128xf32>
    %363 = vector.broadcast %33 : f32 to vector<16x128xf32>
    %364 = arith.mulf %360, %363 : vector<16x128xf32>
    %365 = arith.addf %358, %364 : vector<16x128xf32>
    %366 = vector.broadcast %131 : f32 to vector<16x128xf32>
    %367 = arith.mulf %362, %366 : vector<16x128xf32>
    %368 = arith.addf %365, %367 : vector<16x128xf32>
    %c0_136 = arith.constant 0 : index
    %c0_137 = arith.constant 0 : index
    %c2_138 = arith.constant 2 : index
    %c3_139 = arith.constant 3 : index
    %369 = vector.load %arg2[%c0_136, %c0_137, %c2_138, %c3_139] : memref<1x1x22x256xf32, #tpu.memory_space<vmem>>, vector<1x1x16x128xf32>
    %370 = vector.shape_cast %369 : vector<1x1x16x128xf32> to vector<16x128xf32>
    %c0_140 = arith.constant 0 : index
    %c0_141 = arith.constant 0 : index
    %c2_142 = arith.constant 2 : index
    %c3_143 = arith.constant 3 : index
    %371 = vector.load %arg3[%c0_140, %c0_141, %c2_142, %c3_143] : memref<1x1x22x256xf32, #tpu.memory_space<vmem>>, vector<1x1x16x128xf32>
    %372 = vector.shape_cast %371 : vector<1x1x16x128xf32> to vector<16x128xf32>
    %373 = vector.broadcast %35 : f32 to vector<16x128xf32>
    %374 = arith.mulf %370, %373 : vector<16x128xf32>
    %375 = arith.addf %368, %374 : vector<16x128xf32>
    %376 = vector.broadcast %133 : f32 to vector<16x128xf32>
    %377 = arith.mulf %372, %376 : vector<16x128xf32>
    %378 = arith.addf %375, %377 : vector<16x128xf32>
    %c0_144 = arith.constant 0 : index
    %c0_145 = arith.constant 0 : index
    %c2_146 = arith.constant 2 : index
    %c4_147 = arith.constant 4 : index
    %379 = vector.load %arg2[%c0_144, %c0_145, %c2_146, %c4_147] : memref<1x1x22x256xf32, #tpu.memory_space<vmem>>, vector<1x1x16x128xf32>
    %380 = vector.shape_cast %379 : vector<1x1x16x128xf32> to vector<16x128xf32>
    %c0_148 = arith.constant 0 : index
    %c0_149 = arith.constant 0 : index
    %c2_150 = arith.constant 2 : index
    %c4_151 = arith.constant 4 : index
    %381 = vector.load %arg3[%c0_148, %c0_149, %c2_150, %c4_151] : memref<1x1x22x256xf32, #tpu.memory_space<vmem>>, vector<1x1x16x128xf32>
    %382 = vector.shape_cast %381 : vector<1x1x16x128xf32> to vector<16x128xf32>
    %383 = vector.broadcast %37 : f32 to vector<16x128xf32>
    %384 = arith.mulf %380, %383 : vector<16x128xf32>
    %385 = arith.addf %378, %384 : vector<16x128xf32>
    %386 = vector.broadcast %135 : f32 to vector<16x128xf32>
    %387 = arith.mulf %382, %386 : vector<16x128xf32>
    %388 = arith.addf %385, %387 : vector<16x128xf32>
    %c0_152 = arith.constant 0 : index
    %c0_153 = arith.constant 0 : index
    %c2_154 = arith.constant 2 : index
    %c5_155 = arith.constant 5 : index
    %389 = vector.load %arg2[%c0_152, %c0_153, %c2_154, %c5_155] : memref<1x1x22x256xf32, #tpu.memory_space<vmem>>, vector<1x1x16x128xf32>
    %390 = vector.shape_cast %389 : vector<1x1x16x128xf32> to vector<16x128xf32>
    %c0_156 = arith.constant 0 : index
    %c0_157 = arith.constant 0 : index
    %c2_158 = arith.constant 2 : index
    %c5_159 = arith.constant 5 : index
    %391 = vector.load %arg3[%c0_156, %c0_157, %c2_158, %c5_159] : memref<1x1x22x256xf32, #tpu.memory_space<vmem>>, vector<1x1x16x128xf32>
    %392 = vector.shape_cast %391 : vector<1x1x16x128xf32> to vector<16x128xf32>
    %393 = vector.broadcast %39 : f32 to vector<16x128xf32>
    %394 = arith.mulf %390, %393 : vector<16x128xf32>
    %395 = arith.addf %388, %394 : vector<16x128xf32>
    %396 = vector.broadcast %137 : f32 to vector<16x128xf32>
    %397 = arith.mulf %392, %396 : vector<16x128xf32>
    %398 = arith.addf %395, %397 : vector<16x128xf32>
    %c0_160 = arith.constant 0 : index
    %c0_161 = arith.constant 0 : index
    %c2_162 = arith.constant 2 : index
    %c6_163 = arith.constant 6 : index
    %399 = vector.load %arg2[%c0_160, %c0_161, %c2_162, %c6_163] : memref<1x1x22x256xf32, #tpu.memory_space<vmem>>, vector<1x1x16x128xf32>
    %400 = vector.shape_cast %399 : vector<1x1x16x128xf32> to vector<16x128xf32>
    %c0_164 = arith.constant 0 : index
    %c0_165 = arith.constant 0 : index
    %c2_166 = arith.constant 2 : index
    %c6_167 = arith.constant 6 : index
    %401 = vector.load %arg3[%c0_164, %c0_165, %c2_166, %c6_167] : memref<1x1x22x256xf32, #tpu.memory_space<vmem>>, vector<1x1x16x128xf32>
    %402 = vector.shape_cast %401 : vector<1x1x16x128xf32> to vector<16x128xf32>
    %403 = vector.broadcast %41 : f32 to vector<16x128xf32>
    %404 = arith.mulf %400, %403 : vector<16x128xf32>
    %405 = arith.addf %398, %404 : vector<16x128xf32>
    %406 = vector.broadcast %139 : f32 to vector<16x128xf32>
    %407 = arith.mulf %402, %406 : vector<16x128xf32>
    %408 = arith.addf %405, %407 : vector<16x128xf32>
    %c0_168 = arith.constant 0 : index
    %c0_169 = arith.constant 0 : index
    %c3_170 = arith.constant 3 : index
    %c0_171 = arith.constant 0 : index
    %409 = vector.load %arg2[%c0_168, %c0_169, %c3_170, %c0_171] : memref<1x1x22x256xf32, #tpu.memory_space<vmem>>, vector<1x1x16x128xf32>
    %410 = vector.shape_cast %409 : vector<1x1x16x128xf32> to vector<16x128xf32>
    %c0_172 = arith.constant 0 : index
    %c0_173 = arith.constant 0 : index
    %c3_174 = arith.constant 3 : index
    %c0_175 = arith.constant 0 : index
    %411 = vector.load %arg3[%c0_172, %c0_173, %c3_174, %c0_175] : memref<1x1x22x256xf32, #tpu.memory_space<vmem>>, vector<1x1x16x128xf32>
    %412 = vector.shape_cast %411 : vector<1x1x16x128xf32> to vector<16x128xf32>
    %413 = vector.broadcast %43 : f32 to vector<16x128xf32>
    %414 = arith.mulf %410, %413 : vector<16x128xf32>
    %415 = arith.addf %408, %414 : vector<16x128xf32>
    %416 = vector.broadcast %141 : f32 to vector<16x128xf32>
    %417 = arith.mulf %412, %416 : vector<16x128xf32>
    %418 = arith.addf %415, %417 : vector<16x128xf32>
    %c0_176 = arith.constant 0 : index
    %c0_177 = arith.constant 0 : index
    %c3_178 = arith.constant 3 : index
    %c1_179 = arith.constant 1 : index
    %419 = vector.load %arg2[%c0_176, %c0_177, %c3_178, %c1_179] : memref<1x1x22x256xf32, #tpu.memory_space<vmem>>, vector<1x1x16x128xf32>
    %420 = vector.shape_cast %419 : vector<1x1x16x128xf32> to vector<16x128xf32>
    %c0_180 = arith.constant 0 : index
    %c0_181 = arith.constant 0 : index
    %c3_182 = arith.constant 3 : index
    %c1_183 = arith.constant 1 : index
    %421 = vector.load %arg3[%c0_180, %c0_181, %c3_182, %c1_183] : memref<1x1x22x256xf32, #tpu.memory_space<vmem>>, vector<1x1x16x128xf32>
    %422 = vector.shape_cast %421 : vector<1x1x16x128xf32> to vector<16x128xf32>
    %423 = vector.broadcast %45 : f32 to vector<16x128xf32>
    %424 = arith.mulf %420, %423 : vector<16x128xf32>
    %425 = arith.addf %418, %424 : vector<16x128xf32>
    %426 = vector.broadcast %143 : f32 to vector<16x128xf32>
    %427 = arith.mulf %422, %426 : vector<16x128xf32>
    %428 = arith.addf %425, %427 : vector<16x128xf32>
    %c0_184 = arith.constant 0 : index
    %c0_185 = arith.constant 0 : index
    %c3_186 = arith.constant 3 : index
    %c2_187 = arith.constant 2 : index
    %429 = vector.load %arg2[%c0_184, %c0_185, %c3_186, %c2_187] : memref<1x1x22x256xf32, #tpu.memory_space<vmem>>, vector<1x1x16x128xf32>
    %430 = vector.shape_cast %429 : vector<1x1x16x128xf32> to vector<16x128xf32>
    %c0_188 = arith.constant 0 : index
    %c0_189 = arith.constant 0 : index
    %c3_190 = arith.constant 3 : index
    %c2_191 = arith.constant 2 : index
    %431 = vector.load %arg3[%c0_188, %c0_189, %c3_190, %c2_191] : memref<1x1x22x256xf32, #tpu.memory_space<vmem>>, vector<1x1x16x128xf32>
    %432 = vector.shape_cast %431 : vector<1x1x16x128xf32> to vector<16x128xf32>
    %433 = vector.broadcast %47 : f32 to vector<16x128xf32>
    %434 = arith.mulf %430, %433 : vector<16x128xf32>
    %435 = arith.addf %428, %434 : vector<16x128xf32>
    %436 = vector.broadcast %145 : f32 to vector<16x128xf32>
    %437 = arith.mulf %432, %436 : vector<16x128xf32>
    %438 = arith.addf %435, %437 : vector<16x128xf32>
    %c0_192 = arith.constant 0 : index
    %c0_193 = arith.constant 0 : index
    %c3_194 = arith.constant 3 : index
    %c3_195 = arith.constant 3 : index
    %439 = vector.load %arg2[%c0_192, %c0_193, %c3_194, %c3_195] : memref<1x1x22x256xf32, #tpu.memory_space<vmem>>, vector<1x1x16x128xf32>
    %440 = vector.shape_cast %439 : vector<1x1x16x128xf32> to vector<16x128xf32>
    %c0_196 = arith.constant 0 : index
    %c0_197 = arith.constant 0 : index
    %c3_198 = arith.constant 3 : index
    %c3_199 = arith.constant 3 : index
    %441 = vector.load %arg3[%c0_196, %c0_197, %c3_198, %c3_199] : memref<1x1x22x256xf32, #tpu.memory_space<vmem>>, vector<1x1x16x128xf32>
    %442 = vector.shape_cast %441 : vector<1x1x16x128xf32> to vector<16x128xf32>
    %443 = vector.broadcast %49 : f32 to vector<16x128xf32>
    %444 = arith.mulf %440, %443 : vector<16x128xf32>
    %445 = arith.addf %438, %444 : vector<16x128xf32>
    %446 = vector.broadcast %147 : f32 to vector<16x128xf32>
    %447 = arith.mulf %442, %446 : vector<16x128xf32>
    %448 = arith.addf %445, %447 : vector<16x128xf32>
    %c0_200 = arith.constant 0 : index
    %c0_201 = arith.constant 0 : index
    %c3_202 = arith.constant 3 : index
    %c4_203 = arith.constant 4 : index
    %449 = vector.load %arg2[%c0_200, %c0_201, %c3_202, %c4_203] : memref<1x1x22x256xf32, #tpu.memory_space<vmem>>, vector<1x1x16x128xf32>
    %450 = vector.shape_cast %449 : vector<1x1x16x128xf32> to vector<16x128xf32>
    %c0_204 = arith.constant 0 : index
    %c0_205 = arith.constant 0 : index
    %c3_206 = arith.constant 3 : index
    %c4_207 = arith.constant 4 : index
    %451 = vector.load %arg3[%c0_204, %c0_205, %c3_206, %c4_207] : memref<1x1x22x256xf32, #tpu.memory_space<vmem>>, vector<1x1x16x128xf32>
    %452 = vector.shape_cast %451 : vector<1x1x16x128xf32> to vector<16x128xf32>
    %453 = vector.broadcast %51 : f32 to vector<16x128xf32>
    %454 = arith.mulf %450, %453 : vector<16x128xf32>
    %455 = arith.addf %448, %454 : vector<16x128xf32>
    %456 = vector.broadcast %149 : f32 to vector<16x128xf32>
    %457 = arith.mulf %452, %456 : vector<16x128xf32>
    %458 = arith.addf %455, %457 : vector<16x128xf32>
    %c0_208 = arith.constant 0 : index
    %c0_209 = arith.constant 0 : index
    %c3_210 = arith.constant 3 : index
    %c5_211 = arith.constant 5 : index
    %459 = vector.load %arg2[%c0_208, %c0_209, %c3_210, %c5_211] : memref<1x1x22x256xf32, #tpu.memory_space<vmem>>, vector<1x1x16x128xf32>
    %460 = vector.shape_cast %459 : vector<1x1x16x128xf32> to vector<16x128xf32>
    %c0_212 = arith.constant 0 : index
    %c0_213 = arith.constant 0 : index
    %c3_214 = arith.constant 3 : index
    %c5_215 = arith.constant 5 : index
    %461 = vector.load %arg3[%c0_212, %c0_213, %c3_214, %c5_215] : memref<1x1x22x256xf32, #tpu.memory_space<vmem>>, vector<1x1x16x128xf32>
    %462 = vector.shape_cast %461 : vector<1x1x16x128xf32> to vector<16x128xf32>
    %463 = vector.broadcast %53 : f32 to vector<16x128xf32>
    %464 = arith.mulf %460, %463 : vector<16x128xf32>
    %465 = arith.addf %458, %464 : vector<16x128xf32>
    %466 = vector.broadcast %151 : f32 to vector<16x128xf32>
    %467 = arith.mulf %462, %466 : vector<16x128xf32>
    %468 = arith.addf %465, %467 : vector<16x128xf32>
    %c0_216 = arith.constant 0 : index
    %c0_217 = arith.constant 0 : index
    %c3_218 = arith.constant 3 : index
    %c6_219 = arith.constant 6 : index
    %469 = vector.load %arg2[%c0_216, %c0_217, %c3_218, %c6_219] : memref<1x1x22x256xf32, #tpu.memory_space<vmem>>, vector<1x1x16x128xf32>
    %470 = vector.shape_cast %469 : vector<1x1x16x128xf32> to vector<16x128xf32>
    %c0_220 = arith.constant 0 : index
    %c0_221 = arith.constant 0 : index
    %c3_222 = arith.constant 3 : index
    %c6_223 = arith.constant 6 : index
    %471 = vector.load %arg3[%c0_220, %c0_221, %c3_222, %c6_223] : memref<1x1x22x256xf32, #tpu.memory_space<vmem>>, vector<1x1x16x128xf32>
    %472 = vector.shape_cast %471 : vector<1x1x16x128xf32> to vector<16x128xf32>
    %473 = vector.broadcast %55 : f32 to vector<16x128xf32>
    %474 = arith.mulf %470, %473 : vector<16x128xf32>
    %475 = arith.addf %468, %474 : vector<16x128xf32>
    %476 = vector.broadcast %153 : f32 to vector<16x128xf32>
    %477 = arith.mulf %472, %476 : vector<16x128xf32>
    %478 = arith.addf %475, %477 : vector<16x128xf32>
    %c0_224 = arith.constant 0 : index
    %c0_225 = arith.constant 0 : index
    %c4_226 = arith.constant 4 : index
    %c0_227 = arith.constant 0 : index
    %479 = vector.load %arg2[%c0_224, %c0_225, %c4_226, %c0_227] : memref<1x1x22x256xf32, #tpu.memory_space<vmem>>, vector<1x1x16x128xf32>
    %480 = vector.shape_cast %479 : vector<1x1x16x128xf32> to vector<16x128xf32>
    %c0_228 = arith.constant 0 : index
    %c0_229 = arith.constant 0 : index
    %c4_230 = arith.constant 4 : index
    %c0_231 = arith.constant 0 : index
    %481 = vector.load %arg3[%c0_228, %c0_229, %c4_230, %c0_231] : memref<1x1x22x256xf32, #tpu.memory_space<vmem>>, vector<1x1x16x128xf32>
    %482 = vector.shape_cast %481 : vector<1x1x16x128xf32> to vector<16x128xf32>
    %483 = vector.broadcast %57 : f32 to vector<16x128xf32>
    %484 = arith.mulf %480, %483 : vector<16x128xf32>
    %485 = arith.addf %478, %484 : vector<16x128xf32>
    %486 = vector.broadcast %155 : f32 to vector<16x128xf32>
    %487 = arith.mulf %482, %486 : vector<16x128xf32>
    %488 = arith.addf %485, %487 : vector<16x128xf32>
    %c0_232 = arith.constant 0 : index
    %c0_233 = arith.constant 0 : index
    %c4_234 = arith.constant 4 : index
    %c1_235 = arith.constant 1 : index
    %489 = vector.load %arg2[%c0_232, %c0_233, %c4_234, %c1_235] : memref<1x1x22x256xf32, #tpu.memory_space<vmem>>, vector<1x1x16x128xf32>
    %490 = vector.shape_cast %489 : vector<1x1x16x128xf32> to vector<16x128xf32>
    %c0_236 = arith.constant 0 : index
    %c0_237 = arith.constant 0 : index
    %c4_238 = arith.constant 4 : index
    %c1_239 = arith.constant 1 : index
    %491 = vector.load %arg3[%c0_236, %c0_237, %c4_238, %c1_239] : memref<1x1x22x256xf32, #tpu.memory_space<vmem>>, vector<1x1x16x128xf32>
    %492 = vector.shape_cast %491 : vector<1x1x16x128xf32> to vector<16x128xf32>
    %493 = vector.broadcast %59 : f32 to vector<16x128xf32>
    %494 = arith.mulf %490, %493 : vector<16x128xf32>
    %495 = arith.addf %488, %494 : vector<16x128xf32>
    %496 = vector.broadcast %157 : f32 to vector<16x128xf32>
    %497 = arith.mulf %492, %496 : vector<16x128xf32>
    %498 = arith.addf %495, %497 : vector<16x128xf32>
    %c0_240 = arith.constant 0 : index
    %c0_241 = arith.constant 0 : index
    %c4_242 = arith.constant 4 : index
    %c2_243 = arith.constant 2 : index
    %499 = vector.load %arg2[%c0_240, %c0_241, %c4_242, %c2_243] : memref<1x1x22x256xf32, #tpu.memory_space<vmem>>, vector<1x1x16x128xf32>
    %500 = vector.shape_cast %499 : vector<1x1x16x128xf32> to vector<16x128xf32>
    %c0_244 = arith.constant 0 : index
    %c0_245 = arith.constant 0 : index
    %c4_246 = arith.constant 4 : index
    %c2_247 = arith.constant 2 : index
    %501 = vector.load %arg3[%c0_244, %c0_245, %c4_246, %c2_247] : memref<1x1x22x256xf32, #tpu.memory_space<vmem>>, vector<1x1x16x128xf32>
    %502 = vector.shape_cast %501 : vector<1x1x16x128xf32> to vector<16x128xf32>
    %503 = vector.broadcast %61 : f32 to vector<16x128xf32>
    %504 = arith.mulf %500, %503 : vector<16x128xf32>
    %505 = arith.addf %498, %504 : vector<16x128xf32>
    %506 = vector.broadcast %159 : f32 to vector<16x128xf32>
    %507 = arith.mulf %502, %506 : vector<16x128xf32>
    %508 = arith.addf %505, %507 : vector<16x128xf32>
    %c0_248 = arith.constant 0 : index
    %c0_249 = arith.constant 0 : index
    %c4_250 = arith.constant 4 : index
    %c3_251 = arith.constant 3 : index
    %509 = vector.load %arg2[%c0_248, %c0_249, %c4_250, %c3_251] : memref<1x1x22x256xf32, #tpu.memory_space<vmem>>, vector<1x1x16x128xf32>
    %510 = vector.shape_cast %509 : vector<1x1x16x128xf32> to vector<16x128xf32>
    %c0_252 = arith.constant 0 : index
    %c0_253 = arith.constant 0 : index
    %c4_254 = arith.constant 4 : index
    %c3_255 = arith.constant 3 : index
    %511 = vector.load %arg3[%c0_252, %c0_253, %c4_254, %c3_255] : memref<1x1x22x256xf32, #tpu.memory_space<vmem>>, vector<1x1x16x128xf32>
    %512 = vector.shape_cast %511 : vector<1x1x16x128xf32> to vector<16x128xf32>
    %513 = vector.broadcast %63 : f32 to vector<16x128xf32>
    %514 = arith.mulf %510, %513 : vector<16x128xf32>
    %515 = arith.addf %508, %514 : vector<16x128xf32>
    %516 = vector.broadcast %161 : f32 to vector<16x128xf32>
    %517 = arith.mulf %512, %516 : vector<16x128xf32>
    %518 = arith.addf %515, %517 : vector<16x128xf32>
    %c0_256 = arith.constant 0 : index
    %c0_257 = arith.constant 0 : index
    %c4_258 = arith.constant 4 : index
    %c4_259 = arith.constant 4 : index
    %519 = vector.load %arg2[%c0_256, %c0_257, %c4_258, %c4_259] : memref<1x1x22x256xf32, #tpu.memory_space<vmem>>, vector<1x1x16x128xf32>
    %520 = vector.shape_cast %519 : vector<1x1x16x128xf32> to vector<16x128xf32>
    %c0_260 = arith.constant 0 : index
    %c0_261 = arith.constant 0 : index
    %c4_262 = arith.constant 4 : index
    %c4_263 = arith.constant 4 : index
    %521 = vector.load %arg3[%c0_260, %c0_261, %c4_262, %c4_263] : memref<1x1x22x256xf32, #tpu.memory_space<vmem>>, vector<1x1x16x128xf32>
    %522 = vector.shape_cast %521 : vector<1x1x16x128xf32> to vector<16x128xf32>
    %523 = vector.broadcast %65 : f32 to vector<16x128xf32>
    %524 = arith.mulf %520, %523 : vector<16x128xf32>
    %525 = arith.addf %518, %524 : vector<16x128xf32>
    %526 = vector.broadcast %163 : f32 to vector<16x128xf32>
    %527 = arith.mulf %522, %526 : vector<16x128xf32>
    %528 = arith.addf %525, %527 : vector<16x128xf32>
    %c0_264 = arith.constant 0 : index
    %c0_265 = arith.constant 0 : index
    %c4_266 = arith.constant 4 : index
    %c5_267 = arith.constant 5 : index
    %529 = vector.load %arg2[%c0_264, %c0_265, %c4_266, %c5_267] : memref<1x1x22x256xf32, #tpu.memory_space<vmem>>, vector<1x1x16x128xf32>
    %530 = vector.shape_cast %529 : vector<1x1x16x128xf32> to vector<16x128xf32>
    %c0_268 = arith.constant 0 : index
    %c0_269 = arith.constant 0 : index
    %c4_270 = arith.constant 4 : index
    %c5_271 = arith.constant 5 : index
    %531 = vector.load %arg3[%c0_268, %c0_269, %c4_270, %c5_271] : memref<1x1x22x256xf32, #tpu.memory_space<vmem>>, vector<1x1x16x128xf32>
    %532 = vector.shape_cast %531 : vector<1x1x16x128xf32> to vector<16x128xf32>
    %533 = vector.broadcast %67 : f32 to vector<16x128xf32>
    %534 = arith.mulf %530, %533 : vector<16x128xf32>
    %535 = arith.addf %528, %534 : vector<16x128xf32>
    %536 = vector.broadcast %165 : f32 to vector<16x128xf32>
    %537 = arith.mulf %532, %536 : vector<16x128xf32>
    %538 = arith.addf %535, %537 : vector<16x128xf32>
    %c0_272 = arith.constant 0 : index
    %c0_273 = arith.constant 0 : index
    %c4_274 = arith.constant 4 : index
    %c6_275 = arith.constant 6 : index
    %539 = vector.load %arg2[%c0_272, %c0_273, %c4_274, %c6_275] : memref<1x1x22x256xf32, #tpu.memory_space<vmem>>, vector<1x1x16x128xf32>
    %540 = vector.shape_cast %539 : vector<1x1x16x128xf32> to vector<16x128xf32>
    %c0_276 = arith.constant 0 : index
    %c0_277 = arith.constant 0 : index
    %c4_278 = arith.constant 4 : index
    %c6_279 = arith.constant 6 : index
    %541 = vector.load %arg3[%c0_276, %c0_277, %c4_278, %c6_279] : memref<1x1x22x256xf32, #tpu.memory_space<vmem>>, vector<1x1x16x128xf32>
    %542 = vector.shape_cast %541 : vector<1x1x16x128xf32> to vector<16x128xf32>
    %543 = vector.broadcast %69 : f32 to vector<16x128xf32>
    %544 = arith.mulf %540, %543 : vector<16x128xf32>
    %545 = arith.addf %538, %544 : vector<16x128xf32>
    %546 = vector.broadcast %167 : f32 to vector<16x128xf32>
    %547 = arith.mulf %542, %546 : vector<16x128xf32>
    %548 = arith.addf %545, %547 : vector<16x128xf32>
    %c0_280 = arith.constant 0 : index
    %c0_281 = arith.constant 0 : index
    %c5_282 = arith.constant 5 : index
    %c0_283 = arith.constant 0 : index
    %549 = vector.load %arg2[%c0_280, %c0_281, %c5_282, %c0_283] : memref<1x1x22x256xf32, #tpu.memory_space<vmem>>, vector<1x1x16x128xf32>
    %550 = vector.shape_cast %549 : vector<1x1x16x128xf32> to vector<16x128xf32>
    %c0_284 = arith.constant 0 : index
    %c0_285 = arith.constant 0 : index
    %c5_286 = arith.constant 5 : index
    %c0_287 = arith.constant 0 : index
    %551 = vector.load %arg3[%c0_284, %c0_285, %c5_286, %c0_287] : memref<1x1x22x256xf32, #tpu.memory_space<vmem>>, vector<1x1x16x128xf32>
    %552 = vector.shape_cast %551 : vector<1x1x16x128xf32> to vector<16x128xf32>
    %553 = vector.broadcast %71 : f32 to vector<16x128xf32>
    %554 = arith.mulf %550, %553 : vector<16x128xf32>
    %555 = arith.addf %548, %554 : vector<16x128xf32>
    %556 = vector.broadcast %169 : f32 to vector<16x128xf32>
    %557 = arith.mulf %552, %556 : vector<16x128xf32>
    %558 = arith.addf %555, %557 : vector<16x128xf32>
    %c0_288 = arith.constant 0 : index
    %c0_289 = arith.constant 0 : index
    %c5_290 = arith.constant 5 : index
    %c1_291 = arith.constant 1 : index
    %559 = vector.load %arg2[%c0_288, %c0_289, %c5_290, %c1_291] : memref<1x1x22x256xf32, #tpu.memory_space<vmem>>, vector<1x1x16x128xf32>
    %560 = vector.shape_cast %559 : vector<1x1x16x128xf32> to vector<16x128xf32>
    %c0_292 = arith.constant 0 : index
    %c0_293 = arith.constant 0 : index
    %c5_294 = arith.constant 5 : index
    %c1_295 = arith.constant 1 : index
    %561 = vector.load %arg3[%c0_292, %c0_293, %c5_294, %c1_295] : memref<1x1x22x256xf32, #tpu.memory_space<vmem>>, vector<1x1x16x128xf32>
    %562 = vector.shape_cast %561 : vector<1x1x16x128xf32> to vector<16x128xf32>
    %563 = vector.broadcast %73 : f32 to vector<16x128xf32>
    %564 = arith.mulf %560, %563 : vector<16x128xf32>
    %565 = arith.addf %558, %564 : vector<16x128xf32>
    %566 = vector.broadcast %171 : f32 to vector<16x128xf32>
    %567 = arith.mulf %562, %566 : vector<16x128xf32>
    %568 = arith.addf %565, %567 : vector<16x128xf32>
    %c0_296 = arith.constant 0 : index
    %c0_297 = arith.constant 0 : index
    %c5_298 = arith.constant 5 : index
    %c2_299 = arith.constant 2 : index
    %569 = vector.load %arg2[%c0_296, %c0_297, %c5_298, %c2_299] : memref<1x1x22x256xf32, #tpu.memory_space<vmem>>, vector<1x1x16x128xf32>
    %570 = vector.shape_cast %569 : vector<1x1x16x128xf32> to vector<16x128xf32>
    %c0_300 = arith.constant 0 : index
    %c0_301 = arith.constant 0 : index
    %c5_302 = arith.constant 5 : index
    %c2_303 = arith.constant 2 : index
    %571 = vector.load %arg3[%c0_300, %c0_301, %c5_302, %c2_303] : memref<1x1x22x256xf32, #tpu.memory_space<vmem>>, vector<1x1x16x128xf32>
    %572 = vector.shape_cast %571 : vector<1x1x16x128xf32> to vector<16x128xf32>
    %573 = vector.broadcast %75 : f32 to vector<16x128xf32>
    %574 = arith.mulf %570, %573 : vector<16x128xf32>
    %575 = arith.addf %568, %574 : vector<16x128xf32>
    %576 = vector.broadcast %173 : f32 to vector<16x128xf32>
    %577 = arith.mulf %572, %576 : vector<16x128xf32>
    %578 = arith.addf %575, %577 : vector<16x128xf32>
    %c0_304 = arith.constant 0 : index
    %c0_305 = arith.constant 0 : index
    %c5_306 = arith.constant 5 : index
    %c3_307 = arith.constant 3 : index
    %579 = vector.load %arg2[%c0_304, %c0_305, %c5_306, %c3_307] : memref<1x1x22x256xf32, #tpu.memory_space<vmem>>, vector<1x1x16x128xf32>
    %580 = vector.shape_cast %579 : vector<1x1x16x128xf32> to vector<16x128xf32>
    %c0_308 = arith.constant 0 : index
    %c0_309 = arith.constant 0 : index
    %c5_310 = arith.constant 5 : index
    %c3_311 = arith.constant 3 : index
    %581 = vector.load %arg3[%c0_308, %c0_309, %c5_310, %c3_311] : memref<1x1x22x256xf32, #tpu.memory_space<vmem>>, vector<1x1x16x128xf32>
    %582 = vector.shape_cast %581 : vector<1x1x16x128xf32> to vector<16x128xf32>
    %583 = vector.broadcast %77 : f32 to vector<16x128xf32>
    %584 = arith.mulf %580, %583 : vector<16x128xf32>
    %585 = arith.addf %578, %584 : vector<16x128xf32>
    %586 = vector.broadcast %175 : f32 to vector<16x128xf32>
    %587 = arith.mulf %582, %586 : vector<16x128xf32>
    %588 = arith.addf %585, %587 : vector<16x128xf32>
    %c0_312 = arith.constant 0 : index
    %c0_313 = arith.constant 0 : index
    %c5_314 = arith.constant 5 : index
    %c4_315 = arith.constant 4 : index
    %589 = vector.load %arg2[%c0_312, %c0_313, %c5_314, %c4_315] : memref<1x1x22x256xf32, #tpu.memory_space<vmem>>, vector<1x1x16x128xf32>
    %590 = vector.shape_cast %589 : vector<1x1x16x128xf32> to vector<16x128xf32>
    %c0_316 = arith.constant 0 : index
    %c0_317 = arith.constant 0 : index
    %c5_318 = arith.constant 5 : index
    %c4_319 = arith.constant 4 : index
    %591 = vector.load %arg3[%c0_316, %c0_317, %c5_318, %c4_319] : memref<1x1x22x256xf32, #tpu.memory_space<vmem>>, vector<1x1x16x128xf32>
    %592 = vector.shape_cast %591 : vector<1x1x16x128xf32> to vector<16x128xf32>
    %593 = vector.broadcast %79 : f32 to vector<16x128xf32>
    %594 = arith.mulf %590, %593 : vector<16x128xf32>
    %595 = arith.addf %588, %594 : vector<16x128xf32>
    %596 = vector.broadcast %177 : f32 to vector<16x128xf32>
    %597 = arith.mulf %592, %596 : vector<16x128xf32>
    %598 = arith.addf %595, %597 : vector<16x128xf32>
    %c0_320 = arith.constant 0 : index
    %c0_321 = arith.constant 0 : index
    %c5_322 = arith.constant 5 : index
    %c5_323 = arith.constant 5 : index
    %599 = vector.load %arg2[%c0_320, %c0_321, %c5_322, %c5_323] : memref<1x1x22x256xf32, #tpu.memory_space<vmem>>, vector<1x1x16x128xf32>
    %600 = vector.shape_cast %599 : vector<1x1x16x128xf32> to vector<16x128xf32>
    %c0_324 = arith.constant 0 : index
    %c0_325 = arith.constant 0 : index
    %c5_326 = arith.constant 5 : index
    %c5_327 = arith.constant 5 : index
    %601 = vector.load %arg3[%c0_324, %c0_325, %c5_326, %c5_327] : memref<1x1x22x256xf32, #tpu.memory_space<vmem>>, vector<1x1x16x128xf32>
    %602 = vector.shape_cast %601 : vector<1x1x16x128xf32> to vector<16x128xf32>
    %603 = vector.broadcast %81 : f32 to vector<16x128xf32>
    %604 = arith.mulf %600, %603 : vector<16x128xf32>
    %605 = arith.addf %598, %604 : vector<16x128xf32>
    %606 = vector.broadcast %179 : f32 to vector<16x128xf32>
    %607 = arith.mulf %602, %606 : vector<16x128xf32>
    %608 = arith.addf %605, %607 : vector<16x128xf32>
    %c0_328 = arith.constant 0 : index
    %c0_329 = arith.constant 0 : index
    %c5_330 = arith.constant 5 : index
    %c6_331 = arith.constant 6 : index
    %609 = vector.load %arg2[%c0_328, %c0_329, %c5_330, %c6_331] : memref<1x1x22x256xf32, #tpu.memory_space<vmem>>, vector<1x1x16x128xf32>
    %610 = vector.shape_cast %609 : vector<1x1x16x128xf32> to vector<16x128xf32>
    %c0_332 = arith.constant 0 : index
    %c0_333 = arith.constant 0 : index
    %c5_334 = arith.constant 5 : index
    %c6_335 = arith.constant 6 : index
    %611 = vector.load %arg3[%c0_332, %c0_333, %c5_334, %c6_335] : memref<1x1x22x256xf32, #tpu.memory_space<vmem>>, vector<1x1x16x128xf32>
    %612 = vector.shape_cast %611 : vector<1x1x16x128xf32> to vector<16x128xf32>
    %613 = vector.broadcast %83 : f32 to vector<16x128xf32>
    %614 = arith.mulf %610, %613 : vector<16x128xf32>
    %615 = arith.addf %608, %614 : vector<16x128xf32>
    %616 = vector.broadcast %181 : f32 to vector<16x128xf32>
    %617 = arith.mulf %612, %616 : vector<16x128xf32>
    %618 = arith.addf %615, %617 : vector<16x128xf32>
    %c0_336 = arith.constant 0 : index
    %c0_337 = arith.constant 0 : index
    %c6_338 = arith.constant 6 : index
    %c0_339 = arith.constant 0 : index
    %619 = vector.load %arg2[%c0_336, %c0_337, %c6_338, %c0_339] : memref<1x1x22x256xf32, #tpu.memory_space<vmem>>, vector<1x1x16x128xf32>
    %620 = vector.shape_cast %619 : vector<1x1x16x128xf32> to vector<16x128xf32>
    %c0_340 = arith.constant 0 : index
    %c0_341 = arith.constant 0 : index
    %c6_342 = arith.constant 6 : index
    %c0_343 = arith.constant 0 : index
    %621 = vector.load %arg3[%c0_340, %c0_341, %c6_342, %c0_343] : memref<1x1x22x256xf32, #tpu.memory_space<vmem>>, vector<1x1x16x128xf32>
    %622 = vector.shape_cast %621 : vector<1x1x16x128xf32> to vector<16x128xf32>
    %623 = vector.broadcast %85 : f32 to vector<16x128xf32>
    %624 = arith.mulf %620, %623 : vector<16x128xf32>
    %625 = arith.addf %618, %624 : vector<16x128xf32>
    %626 = vector.broadcast %183 : f32 to vector<16x128xf32>
    %627 = arith.mulf %622, %626 : vector<16x128xf32>
    %628 = arith.addf %625, %627 : vector<16x128xf32>
    %c0_344 = arith.constant 0 : index
    %c0_345 = arith.constant 0 : index
    %c6_346 = arith.constant 6 : index
    %c1_347 = arith.constant 1 : index
    %629 = vector.load %arg2[%c0_344, %c0_345, %c6_346, %c1_347] : memref<1x1x22x256xf32, #tpu.memory_space<vmem>>, vector<1x1x16x128xf32>
    %630 = vector.shape_cast %629 : vector<1x1x16x128xf32> to vector<16x128xf32>
    %c0_348 = arith.constant 0 : index
    %c0_349 = arith.constant 0 : index
    %c6_350 = arith.constant 6 : index
    %c1_351 = arith.constant 1 : index
    %631 = vector.load %arg3[%c0_348, %c0_349, %c6_350, %c1_351] : memref<1x1x22x256xf32, #tpu.memory_space<vmem>>, vector<1x1x16x128xf32>
    %632 = vector.shape_cast %631 : vector<1x1x16x128xf32> to vector<16x128xf32>
    %633 = vector.broadcast %87 : f32 to vector<16x128xf32>
    %634 = arith.mulf %630, %633 : vector<16x128xf32>
    %635 = arith.addf %628, %634 : vector<16x128xf32>
    %636 = vector.broadcast %185 : f32 to vector<16x128xf32>
    %637 = arith.mulf %632, %636 : vector<16x128xf32>
    %638 = arith.addf %635, %637 : vector<16x128xf32>
    %c0_352 = arith.constant 0 : index
    %c0_353 = arith.constant 0 : index
    %c6_354 = arith.constant 6 : index
    %c2_355 = arith.constant 2 : index
    %639 = vector.load %arg2[%c0_352, %c0_353, %c6_354, %c2_355] : memref<1x1x22x256xf32, #tpu.memory_space<vmem>>, vector<1x1x16x128xf32>
    %640 = vector.shape_cast %639 : vector<1x1x16x128xf32> to vector<16x128xf32>
    %c0_356 = arith.constant 0 : index
    %c0_357 = arith.constant 0 : index
    %c6_358 = arith.constant 6 : index
    %c2_359 = arith.constant 2 : index
    %641 = vector.load %arg3[%c0_356, %c0_357, %c6_358, %c2_359] : memref<1x1x22x256xf32, #tpu.memory_space<vmem>>, vector<1x1x16x128xf32>
    %642 = vector.shape_cast %641 : vector<1x1x16x128xf32> to vector<16x128xf32>
    %643 = vector.broadcast %89 : f32 to vector<16x128xf32>
    %644 = arith.mulf %640, %643 : vector<16x128xf32>
    %645 = arith.addf %638, %644 : vector<16x128xf32>
    %646 = vector.broadcast %187 : f32 to vector<16x128xf32>
    %647 = arith.mulf %642, %646 : vector<16x128xf32>
    %648 = arith.addf %645, %647 : vector<16x128xf32>
    %c0_360 = arith.constant 0 : index
    %c0_361 = arith.constant 0 : index
    %c6_362 = arith.constant 6 : index
    %c3_363 = arith.constant 3 : index
    %649 = vector.load %arg2[%c0_360, %c0_361, %c6_362, %c3_363] : memref<1x1x22x256xf32, #tpu.memory_space<vmem>>, vector<1x1x16x128xf32>
    %650 = vector.shape_cast %649 : vector<1x1x16x128xf32> to vector<16x128xf32>
    %c0_364 = arith.constant 0 : index
    %c0_365 = arith.constant 0 : index
    %c6_366 = arith.constant 6 : index
    %c3_367 = arith.constant 3 : index
    %651 = vector.load %arg3[%c0_364, %c0_365, %c6_366, %c3_367] : memref<1x1x22x256xf32, #tpu.memory_space<vmem>>, vector<1x1x16x128xf32>
    %652 = vector.shape_cast %651 : vector<1x1x16x128xf32> to vector<16x128xf32>
    %653 = vector.broadcast %91 : f32 to vector<16x128xf32>
    %654 = arith.mulf %650, %653 : vector<16x128xf32>
    %655 = arith.addf %648, %654 : vector<16x128xf32>
    %656 = vector.broadcast %189 : f32 to vector<16x128xf32>
    %657 = arith.mulf %652, %656 : vector<16x128xf32>
    %658 = arith.addf %655, %657 : vector<16x128xf32>
    %c0_368 = arith.constant 0 : index
    %c0_369 = arith.constant 0 : index
    %c6_370 = arith.constant 6 : index
    %c4_371 = arith.constant 4 : index
    %659 = vector.load %arg2[%c0_368, %c0_369, %c6_370, %c4_371] : memref<1x1x22x256xf32, #tpu.memory_space<vmem>>, vector<1x1x16x128xf32>
    %660 = vector.shape_cast %659 : vector<1x1x16x128xf32> to vector<16x128xf32>
    %c0_372 = arith.constant 0 : index
    %c0_373 = arith.constant 0 : index
    %c6_374 = arith.constant 6 : index
    %c4_375 = arith.constant 4 : index
    %661 = vector.load %arg3[%c0_372, %c0_373, %c6_374, %c4_375] : memref<1x1x22x256xf32, #tpu.memory_space<vmem>>, vector<1x1x16x128xf32>
    %662 = vector.shape_cast %661 : vector<1x1x16x128xf32> to vector<16x128xf32>
    %663 = vector.broadcast %93 : f32 to vector<16x128xf32>
    %664 = arith.mulf %660, %663 : vector<16x128xf32>
    %665 = arith.addf %658, %664 : vector<16x128xf32>
    %666 = vector.broadcast %191 : f32 to vector<16x128xf32>
    %667 = arith.mulf %662, %666 : vector<16x128xf32>
    %668 = arith.addf %665, %667 : vector<16x128xf32>
    %c0_376 = arith.constant 0 : index
    %c0_377 = arith.constant 0 : index
    %c6_378 = arith.constant 6 : index
    %c5_379 = arith.constant 5 : index
    %669 = vector.load %arg2[%c0_376, %c0_377, %c6_378, %c5_379] : memref<1x1x22x256xf32, #tpu.memory_space<vmem>>, vector<1x1x16x128xf32>
    %670 = vector.shape_cast %669 : vector<1x1x16x128xf32> to vector<16x128xf32>
    %c0_380 = arith.constant 0 : index
    %c0_381 = arith.constant 0 : index
    %c6_382 = arith.constant 6 : index
    %c5_383 = arith.constant 5 : index
    %671 = vector.load %arg3[%c0_380, %c0_381, %c6_382, %c5_383] : memref<1x1x22x256xf32, #tpu.memory_space<vmem>>, vector<1x1x16x128xf32>
    %672 = vector.shape_cast %671 : vector<1x1x16x128xf32> to vector<16x128xf32>
    %673 = vector.broadcast %95 : f32 to vector<16x128xf32>
    %674 = arith.mulf %670, %673 : vector<16x128xf32>
    %675 = arith.addf %668, %674 : vector<16x128xf32>
    %676 = vector.broadcast %193 : f32 to vector<16x128xf32>
    %677 = arith.mulf %672, %676 : vector<16x128xf32>
    %678 = arith.addf %675, %677 : vector<16x128xf32>
    %c0_384 = arith.constant 0 : index
    %c0_385 = arith.constant 0 : index
    %c6_386 = arith.constant 6 : index
    %c6_387 = arith.constant 6 : index
    %679 = vector.load %arg2[%c0_384, %c0_385, %c6_386, %c6_387] : memref<1x1x22x256xf32, #tpu.memory_space<vmem>>, vector<1x1x16x128xf32>
    %680 = vector.shape_cast %679 : vector<1x1x16x128xf32> to vector<16x128xf32>
    %c0_388 = arith.constant 0 : index
    %c0_389 = arith.constant 0 : index
    %c6_390 = arith.constant 6 : index
    %c6_391 = arith.constant 6 : index
    %681 = vector.load %arg3[%c0_388, %c0_389, %c6_390, %c6_391] : memref<1x1x22x256xf32, #tpu.memory_space<vmem>>, vector<1x1x16x128xf32>
    %682 = vector.shape_cast %681 : vector<1x1x16x128xf32> to vector<16x128xf32>
    %683 = vector.broadcast %97 : f32 to vector<16x128xf32>
    %684 = arith.mulf %680, %683 : vector<16x128xf32>
    %685 = arith.addf %678, %684 : vector<16x128xf32>
    %686 = vector.broadcast %195 : f32 to vector<16x128xf32>
    %687 = arith.mulf %682, %686 : vector<16x128xf32>
    %688 = arith.addf %685, %687 : vector<16x128xf32>
    %689 = vector.broadcast %197 : f32 to vector<16x128xf32>
    %690 = arith.addf %688, %689 : vector<16x128xf32>
    %691 = arith.negf %690 : vector<16x128xf32>
    %692 = math.exp %691 : vector<16x128xf32>
    %cst_392 = arith.constant 1.000000e+00 : f32
    %693 = vector.broadcast %cst_392 : f32 to vector<16x128xf32>
    %694 = arith.addf %693, %692 : vector<16x128xf32>
    %695 = arith.divf %693, %694 : vector<16x128xf32>
    %c0_393 = arith.constant 0 : index
    %c0_394 = arith.constant 0 : index
    %c0_395 = arith.constant 0 : index
    %c0_396 = arith.constant 0 : index
    %696 = vector.load %arg5[%c0_393, %c0_394, %c0_395, %c0_396] : memref<1x1x16x128xf32, #tpu.memory_space<vmem>>, vector<1x1x16x128xf32>
    %697 = vector.shape_cast %696 : vector<1x1x16x128xf32> to vector<16x128xf32>
    %698 = vector.shape_cast %695 : vector<16x128xf32> to vector<1x1x16x128xf32>
    tpu.vector_store %arg5[%c0_393, %c0_394, %c0_395, %c0_396], %698 {strides = array<i32>} : memref<1x1x16x128xf32, #tpu.memory_space<vmem>>, vector<1x1x16x128xf32>,
    return
  }
  func.func @transform_0(%arg0: i32, %arg1: i32) -> (i32, i32, i32, i32) {
    %c0_i32 = arith.constant 0 : i32
    %c0_i32_0 = arith.constant 0 : i32
    %c0_i32_1 = arith.constant 0 : i32
    return %arg0, %arg1, %c0_i32, %c0_i32_0 : i32, i32, i32, i32
  }
  func.func @transform_1(%arg0: i32, %arg1: i32) -> (i32, i32, i32, i32) {
    %c0_i32 = arith.constant 0 : i32
    %c0_i32_0 = arith.constant 0 : i32
    %c0_i32_1 = arith.constant 0 : i32
    return %arg0, %arg1, %c0_i32, %c0_i32_0 : i32, i32, i32, i32
  }
  func.func @transform_2(%arg0: i32, %arg1: i32) -> (i32, i32) {
    %c0_i32 = arith.constant 0 : i32
    %c0_i32_0 = arith.constant 0 : i32
    %c0_i32_1 = arith.constant 0 : i32
    return %c0_i32, %c0_i32_0 : i32, i32
  }
  func.func @transform_3(%arg0: i32, %arg1: i32) -> (i32, i32, i32, i32) {
    %c0_i32 = arith.constant 0 : i32
    %c0_i32_0 = arith.constant 0 : i32
    %c0_i32_1 = arith.constant 0 : i32
    return %arg0, %arg1, %c0_i32, %c0_i32_0 : i32, i32, i32, i32
  }
}

</mosaic_0001>

<bundles_post_ra>
// kernel: squeeze.2
= control target key start
LH: loop header
LB: loop body
LE: loop exit
PB: predicated region body
PF: predicated region fallthrough
CT: control target
= control target key end

     0   :  { %s59_s8 = smov 42   ;;  %s60_s11 = smov 28   ;;  %vm3_vm0 = vcmask 56320   ;;  %vm9_vm1 = vcmask 400720   ;;  %vm15_vm2 = vcmask 343320   ;;  %vm21_vm3 = vcmask 285920   ;;  %s99_s0 = inlined_call_operand.vmem [shape: f32[4,7,7], index: 0, kind: input, shape index: {}]   ;;  %s100_s1 = inlined_call_operand.vmem [shape: f32[4,49], index: 1, kind: output, shape index: {}]  }
   0x1   :  { %v47_v0 = vld [vmem:[%s99_s0 + $0x6] ss:$8 sm:$0xf]   ;;  %v49_v1 = vld [vmem:[%s99_s0 + $0x4] ss:$8 sm:$0xf]  }
   0x2   :  { %7 = vrot.lane.b32.xlu0 %v47_v0, %s59_s8  ;;  %19 = vrot.lane.b32.xlu1 %v49_v1, %s60_s11  ;;  %v48_v2 = vld [vmem:[%s99_s0 + $0x5] ss:$8 sm:$0xf]   ;;  %v50_v3 = vld [vmem:[%s99_s0 + $0x3] ss:$8 sm:$0xf]  }
   0x3   :  { %v2_v4 = vld [vmem:[%s99_s0] ss:$8 sm:$0xf]   ;;  %s61_s18 = smov 35   ;;  %s62_s19 = smov 21   ;;  %vm27_vm4 = vcmask 228520  }
   0x4   :  { %4 = vst.msk [vmem:[#allocation0] sm:$0xf] %vm3_vm0, %v2_v4   ;;  %v51_v5 = vld [vmem:[%s99_s0 + $0x2] ss:$8 sm:$0xf]   ;;  %s64_s24 = smov 7  }
   0x5   :  { %v52_v6 = vld [vmem:[%s99_s0 + $0x1] ss:$8 sm:$0xf]   ;;  %s63_s0 = smov 14   ;;  %vm33_vm5 = vcmask 171120   ;;  %vm39_vm6 = vcmask 113720  }
   0x6   :  { %13 = vrot.lane.b32.xlu0 %v48_v2, %s61_s18  ;;  %25 = vrot.lane.b32.xlu1 %v50_v3, %s62_s19 }
   0xa   :  { %31 = vrot.lane.b32.xlu0 %v51_v5, %s63_s0  ;;  %37 = vrot.lane.b32.xlu1 %v52_v6, %s64_s24 }
  0x74   :  { %v8_v7 = vpop.permute.xlu0 %7   ;;  %v20_v8 = vpop.permute.xlu1 %19  }
  0x75   :  { %10 = vst.msk [vmem:[#allocation0] sm:$0xf] %vm9_vm1, %v8_v7  }
  0x78   :  { %v14_v9 = vpop.permute.xlu0 %13   ;;  %v26_v10 = vpop.permute.xlu1 %25  }
  0x79   :  { %16 = vst.msk [vmem:[#allocation0] sm:$0xf] %vm15_vm2, %v14_v9  }
  0x7a   :  { %22 = vst.msk [vmem:[#allocation0] sm:$0xf] %vm21_vm3, %v20_v8  }
  0x7b   :  { %28 = vst.msk [vmem:[#allocation0] sm:$0xf] %vm27_vm4, %v26_v10  }
  0x7c   :  { %v32_v11 = vpop.permute.xlu0 %31   ;;  %v38_v12 = vpop.permute.xlu1 %37  }
  0x7d   :  { %34 = vst.msk [vmem:[#allocation0] sm:$0xf] %vm33_vm5, %v32_v11  }
  0x7e   :  { %40 = vst.msk [vmem:[#allocation0] sm:$0xf] %vm39_vm6, %v38_v12  }
  0x85   :  { %v44_v13 = vld [vmem:[#allocation0] sm:$0xf] }
  0x86   :  { %46 = vst [vmem:[%s100_s1] sm:$0xf] %v44_v13 }

// kernel: pixel_attention_forward.1
= control target key start
LH: loop header
LB: loop body
LE: loop exit
PB: predicated region body
PF: predicated region fallthrough
CT: control target
= control target key end

     0   :  { %s6992_s0 = inlined_call_operand.vmem [shape: f32[2,4,22,256], index: 0, kind: input, shape index: {}]   ;;  %s6993_s1 = inlined_call_operand.vmem [shape: f32[2,4,22,256], index: 1, kind: input, shape index: {}]   ;;  %s6994_s2 = inlined_call_operand.vmem [shape: f32[4,99], index: 2, kind: input, shape index: {}]   ;;  %s6995_s3 = inlined_call_operand.hbm [shape: f32[2,4,16,128], index: 3, kind: output, shape index: {}]  }
   0x1   :  { %7002 = sst [smem:[#allocation86_spill]] %s6992_s0 }
   0x2   :  { %7003 = sst [smem:[#allocation87_spill]] %s6993_s1 }
   0x3   :  { %7004 = sst [smem:[#allocation88_spill]] %s6994_s2 }
   0x4   :  { %8 = vsyncpa [#allocation4], 0 }
   0x5   :  { %9 = vsyncpa [#allocation3], 0 }
   0x6   :  { %11 = vsyncpa [#allocation3 + $0x1], 0  ;;  %s4100_s12 = smov 0   ;;  %s4102_s13 = smov 0  }
   0x7   :  { %s4104_s14 = smov 0   ;;  %s4106_s15 = smov 0  }
   0x8   :  { %s4108_s16 = smov 0   ;;  %s4110_s17 = smov 0  }
   0x9   :  { %s4112_s18 = smov 0   ;;  %s4114_s19 = smov 0  }
   0xa LB: > { %s3804_s20 = sadd.s32 4294967295, %s4068_s19   ;;  %s3805_s21 = sadd.s32 4294967294, %s4068_s19   ;;  %s4068_s19 = sphi %s4114_s19, %s17_s19   ;;  %s4064_s18 = sphi %s4112_s18, %s7267_s18   ;;  %s4060_s17 = sphi %s4110_s17, %s7266_s17   ;;  %s4056_s16 = sphi %s4108_s16, %s7265_s16   ;;  %s4052_s15 = sphi %s4106_s15, %s7264_s15   ;;  %s4048_s14 = sphi %s4104_s14, %s7263_s14   ;;  %s4044_s13 = sphi %s4102_s13, %s7262_s13   ;;  %s4040_s12 = sphi %s4100_s12, %s7261_s12  }
   0xb   : > { %s26_s22 = sadd.s32 1, %s4060_s17  ;;  %s29_s23 = sadd.s32 1, %s4064_s18 }
   0xc   : > { %p27_p0 = scmp.ge.s32.totalorder %s26_s22, 4  ;;  %s115_s24 = sadd.s32 1, %s4048_s14 }
   0xd   : > { %p125_p1 = scmp.ne.s32.totalorder %s4048_s14, %s4044_s13  ;;  %p126_p2 = scmp.eq.s32.totalorder %s3804_s20, 7 }
   0xe   : > { %s7269_s22 = smov (%p27_p0, %s26_s22), 0  ;;  %s7271_s23 = smov (!%p27_p0, %s29_s23), %s4064_s18 }
   0xf   : > { %s111_s25 = ssub.s32 %s4060_s17, %s7269_s22  ;;  %p4152_p3 = por %p126_p2, %p125_p1 }
  0x10   : > { %p31_p4 = scmp.ge.s32.totalorder %s7271_s23, 2  ;;  %p131_p5 = scmp.ne.s32.totalorder %s4044_s13, %s4040_s12 }
  0x11   : > { %p132_p6 = scmp.eq.s32.totalorder %s3805_s21, 7  ;;  %p3806_p7 = scmp.ge.s32.totalorder %s4068_s19, 1 }
  0x12   : > { %s7273_s23 = smov (%p31_p4, %s7271_s23), 0  ;;  %p139_p9 = scmp.lt.s32.totalorder %s4068_s19, 9 }
  0x13   : > { %p4161_p8 = por %p132_p6, %p131_p5  ;;  %s110_s28 = ssub.s32 %s4064_s18, %s7273_s23 }
  0x14   : > { %s112_s29 = sor.u32 %s111_s25, %s110_s28  ;;  %p4168_p10 = pnand %p3806_p7, %p139_p9 }
  0x15   : > { %s7006_s27 = scalar_select %p4161_p8, 1, 0 }
  0x16   : > { %p113_p11 = scmp.eq.s32.totalorder %s112_s29, 0  ;;  %p4172_p12 = scmp.eq.s32.totalorder %s3804_s20, 0 }
  0x17   : > { %p3831_p13 = pneg %p4168_p10  ;;  %s7009_s2 = sld [smem:[#allocation88_spill]] }
  0x18   : > { %s4182_s8 = scalar_select %p113_p11, %s4048_s14, %s115_s24  }
  0x19   : > { %p3832_p0 = pnand %p4172_p12, %p3831_p13 }
  0x1b   : > { %p3957_p2 = pneg %p3832_p0 }
  0x1d   : > { %s152_s7 = sshll.u32 %s7009_s2, 4  ;;  %s153_s7 = int_to_ptr.vmem [resolvable:$true] %s152_s7 }
  0x1e   : > { %s3955_s9 = scalar_lea.vmem %s153_s7, 64  ;;  %p3963_p6 = scmp.lt.s32.totalorder %s153_s7, %s153_s7 }
  0x1f   : > { %p3956_p1 = scmp.ne.s32.totalorder %s153_s7, %s3955_s9  ;;  %p3964_p7 = scmp.lt.s32.totalorder %s3955_s9, %s3955_s9 }
  0x21   : > { %p3958_p4 = pnand %p3957_p2, %p3956_p1  ;;  %p3965_p9 = por %p3964_p7, %p3963_p6 }
  0x23   : > { %p3959_p5 = pneg %p3958_p4 }
  0x25   : > { %p3966_p8 = pnand %p3965_p9, %p3959_p5 }
  0x27   : > { %3969 = shalt.err (!%p3966_p8)
}
  0x28   : > { %s4070_s10 = smov [#allocation2]   ;;  %189 = sbr.rel (%p4168_p10) target bundleno = 893 (0x37d), region = 32 }
  0x29   : > { %3834 = dma.vmem_to_smem (!%p3832_p0), %s153_s7, 64, %s4070_s10, [#allocation4]  }
  0x2f   : > { %4031 = dma.done.wait (%p4172_p12), [#allocation4], 64  }
  0x30   : > { %4033 = vsyncadd (%p4172_p12), [#allocation4], 4294967232 }
  0x31   : > { %195 = sfence }
  0x32   : > { %p227_p11 = scmp.lt.s32.totalorder %s4056_s16, 1  ;;  %p229_p13 = scmp.lt.s32.totalorder %s4052_s15, 3  ;;  %vm754_vm0 = vcmask 1046528   ;;  %vm478_vm1 = vcmask 1039360   ;;  %vm525_vm2 = vcmask 1031168   ;;  %vm1239_vm3 = vcmask 1045504  }
  0x33   : > { %s4195_s11 = sshll.u32 %s4052_s15, 7  ;;  %s7010_s0 = sld [smem:[#allocation86_spill]]  ;;  %vm572_vm4 = vcmask 1022976   ;;  %vm619_vm5 = vcmask 1014784   ;;  %vm666_vm6 = vcmask 1006592   ;;  %vm713_vm7 = vcmask 998400  }
  0x34   : > { %s228_s20 = scalar_select %p227_p11, %s4056_s16, 1  ;;  %vm1724_vm8 = vcmask 1044480   ;;  %vm2209_vm9 = vcmask 1043456   ;;  %vm2694_vm10 = vcmask 1042432   ;;  %vm3179_vm11 = vcmask 1041408  }
  0x35   : > { %s230_s21 = scalar_select %p229_p13, %s4052_s15, 3 }
  0x36   : > { %s3824_s24 = smul.u32 24, %s228_s20  ;;  %s247_s25 = sadd.s32 1, %s4195_s11 }
  0x37   : > { %s3823_s28 = smul.u32 6, %s230_s21  ;;  %s248_s29 = sld [smem:[#allocation2 + %s247_s25]] }
  0x38   : > { %s345_s30 = sadd.s32 50, %s4195_s11  ;;  %s7011_s1 = sld [smem:[#allocation87_spill]] }
  0x39   : > { %s233_s4 = sadd.s32 %s3824_s24, %s3823_s28  ;;  %s346_s5 = sld [smem:[#allocation2 + %s345_s30]] }
  0x3a   : > { %s3812_s6 = sshll.u32 %s233_s4, 3  ;;  %s249_s25 = sadd.s32 2, %s4195_s11 }
  0x3b   : > { %s4204_s10 = scalar_lea.vmem %s7010_s0, %s3812_s6  ;;  %s6998_s28 = smov 127  }
  0x3c   : > { %v4207_v0 = vld [vmem:[%s4204_s10 + $0x10] sm:$0xff]  ;;  %v4210_v1 = vld [vmem:[%s4204_s10] sm:$0xff]  ;;  %v4213_v3 = vld [vmem:[%s4204_s10 + $0x18] sm:$0xff]  ;;  %s347_s30 = sadd.s32 51, %s4195_s11  ;;  %s343_s9 = sadd.s32 49, %s4195_s11 }
  0x3d   : > { %v461_v2 = vstv %s248_s29  ;;  %v4216_v4 = vld [vmem:[%s4204_s10 + $0x8] sm:$0xff]  ;;  %s250_s29 = sld [smem:[#allocation2 + %s249_s25]]  ;;  %s349_s25 = sadd.s32 52, %s4195_s11  ;;  %v4330_v56 = vld [vmem:[%s4204_s10] sm:$0xfe] }
  0x3e   : > { %v464_v5 = vmul.f32 %v461_v2, %v4207_v0  ;;  %v462_v6 = vmul.f32 %v461_v2, %v4210_v1  ;;  %s4223_s24 = scalar_lea.vmem %s7011_s1, %s3812_s6  ;;  %v465_v7 = vmul.f32 %v461_v2, %v4213_v3  ;;  %v463_v8 = vmul.f32 %v461_v2, %v4216_v4  ;;  %s348_s4 = sld [smem:[#allocation2 + %s347_s30]]  ;;  %v4324_v52 = vld [vmem:[%s4204_s10 + $0x8] sm:$0xfe]  ;;  %v4344_v2 = vld [vmem:[%s4204_s10 + $0x28] sm:$0x1] }
  0x3f   : > { %v4231_v9 = vld [vmem:[%s4223_s24 + $0x8] sm:$0xff]  ;;  %v485_v10 = vstv %s346_s5  ;;  %v4234_v11 = vld [vmem:[%s4223_s24] sm:$0xff]  ;;  %v4241_v14 = vld [vmem:[%s4223_s24 + $0x10] sm:$0xff]  ;;  %s251_s5 = sadd.s32 3, %s4195_s11  ;;  %s6996_s6 = smov 126  }
  0x40   : > { %474 = vrot.lane.b32.xlu1 %v464_v5, %s6998_s28  ;;  %470 = vrot.lane.b32.xlu0 %v462_v6, %s6998_s28  ;;  %v487_v12 = vmul.f32 %v485_v10, %v4231_v9  ;;  %v486_v13 = vmul.f32 %v485_v10, %v4234_v11  ;;  %v4244_v15 = vld [vmem:[%s4223_s24 + $0x18] sm:$0xff]  ;;  %v488_v17 = vmul.f32 %v485_v10, %v4241_v14  ;;  %s252_s7 = sld [smem:[#allocation2 + %s251_s5]]  ;;  %s253_s30 = sadd.s32 4, %s4195_s11 }
  0x41   : > { %v489_v16 = vmul.f32 %v485_v10, %v4244_v15  ;;  %s4266_s20 = sld [smem:[#allocation2 + %s4195_s11]]  ;;  %s271_s0 = sadd.s32 13, %s4195_s11 }
  0x42   : > { %s4268_s21 = sld [smem:[#allocation2 + %s343_s9]]  ;;  %s269_s9 = sadd.s32 12, %s4195_s11 }
  0x43   : > { %v508_v18 = vstv %s250_s29  ;;  %s350_s29 = sld [smem:[#allocation2 + %s349_s25]] }
  0x44   : > { %476 = vrot.lane.b32.xlu1 %v465_v7, %s6998_s28  ;;  %472 = vrot.lane.b32.xlu0 %v463_v8, %s6998_s28  ;;  %v510_v19 = vmul.f32 %v508_v18, %v4216_v4  ;;  %v509_v20 = vmul.f32 %v508_v18, %v4210_v1  ;;  %v512_v21 = vmul.f32 %v508_v18, %v4213_v3  ;;  %v532_v23 = vstv %s348_s4  ;;  %s4073_s4 = smov 125   ;;  %s254_s5 = sld [smem:[#allocation2 + %s253_s30]]  ;;  %v4351_v7 = vld [vmem:[%s4204_s10 + $0x20] sm:$0x1] }
  0x45   : > { %v511_v22 = vmul.f32 %v508_v18, %v4207_v0  ;;  %v534_v24 = vmul.f32 %v532_v23, %v4231_v9  ;;  %v533_v25 = vmul.f32 %v532_v23, %v4234_v11  ;;  %v536_v26 = vmul.f32 %v532_v23, %v4244_v15 }
  0x46   : > { %v535_v27 = vmul.f32 %v532_v23, %v4241_v14  ;;  %v555_v28 = vstv %s252_s7  ;;  %s351_s7 = sadd.s32 53, %s4195_s11 }
  0x47   : > { %v557_v29 = vmul.f32 %v555_v28, %v4216_v4  ;;  %v556_v30 = vmul.f32 %v555_v28, %v4210_v1  ;;  %v7000_v31 = vstv %s4266_s20  ;;  %v559_v35 = vmul.f32 %v555_v28, %v4213_v3  ;;  %s352_s25 = sld [smem:[#allocation2 + %s351_s7]]  ;;  %s353_s7 = sadd.s32 54, %s4195_s11 }
  0x48   : > { %496 = vrot.lane.b32.xlu1 %v487_v12, %s6998_s28  ;;  %494 = vrot.lane.b32.xlu0 %v486_v13, %s6998_s28  ;;  %v7001_v32 = vstv %s4268_s21  ;;  %v448_v34 = vmul.f32 %v7000_v31, %v4210_v1  ;;  %v558_v36 = vmul.f32 %v555_v28, %v4207_v0  ;;  %s4312_s1 = sld [smem:[#allocation2 + %s353_s7]]  ;;  %s355_s7 = sadd.s32 55, %s4195_s11 }
  0x49   : > { %v453_v33 = vmul.f32 %v7001_v32, %v4234_v11  ;;  %v579_v38 = vstv %s350_s29  ;;  %s270_s29 = sld [smem:[#allocation2 + %s269_s9]] }
  0x4a   : > { %v581_v39 = vmul.f32 %v579_v38, %v4231_v9  ;;  %v580_v40 = vmul.f32 %v579_v38, %v4234_v11  ;;  %v583_v41 = vmul.f32 %v579_v38, %v4244_v15  ;;  %v582_v42 = vmul.f32 %v579_v38, %v4241_v14 }
  0x4b   : > { %v4292_v37 = vadd.f32 %v453_v33, %v448_v34  ;;  %v602_v43 = vstv %s254_s5  ;;  %s4074_s5 = smov 124  }
  0x4c   : > { %500 = vrot.lane.b32.xlu1 %v489_v16, %s6998_s28  ;;  %498 = vrot.lane.b32.xlu0 %v488_v17, %s6998_s28  ;;  %v604_v44 = vmul.f32 %v602_v43, %v4216_v4  ;;  %v603_v45 = vmul.f32 %v602_v43, %v4210_v1  ;;  %s367_s28 = sadd.s32 61, %s4195_s11  ;;  %v606_v47 = vmul.f32 %v602_v43, %v4213_v3  ;;  %v4357_v16 = vld [vmem:[%s4223_s24 + $0x8] sm:$0xfe] }
  0x4d   : > { %v626_v46 = vstv %s352_s25  ;;  %s4314_s2 = sld [smem:[#allocation2 + %s367_s28]]  ;;  %v605_v48 = vmul.f32 %v602_v43, %v4207_v0  ;;  %s4075_s28 = smov 123  }
  0x4e   : > { %v628_v50 = vmul.f32 %v626_v46, %v4231_v9  ;;  %v627_v53 = vmul.f32 %v626_v46, %v4234_v11  ;;  %v630_v54 = vmul.f32 %v626_v46, %v4244_v15  ;;  %v629_v55 = vmul.f32 %v626_v46, %v4241_v14  ;;  %s259_s25 = sadd.s32 7, %s4195_s11 }
  0x4f   : > { %v1080_v49 = vstv %s270_s29  ;;  %v4354_v13 = vstv %s4312_s1  ;;  %s260_s29 = sld [smem:[#allocation2 + %s259_s25]]  ;;  %s359_s25 = sadd.s32 57, %s4195_s11 }
  0x50   : > { %519 = vrot.lane.b32.xlu1 %v510_v19, %s6996_s6  ;;  %517 = vrot.lane.b32.xlu0 %v509_v20, %s6996_s6  ;;  %v1082_v57 = vmul.f32 %v1080_v49, %v4324_v52  ;;  %v1084_v58 = vmul.f32 %v1080_v49, %v4213_v3  ;;  %v1081_v59 = vmul.f32 %v1080_v49, %v4330_v56  ;;  %v4365_v20 = vld [vmem:[%s4223_s24] sm:$0xfe] }
  0x51   : > { %v1083_v60 = vmul.f32 %v1080_v49, %v4207_v0  ;;  %v1086_v17 = vmul.f32 %v1080_v49, %v4344_v2  ;;  %v1085_v18 = vmul.f32 %v1080_v49, %v4351_v7 }
  0x52   : > { %v1096_v5 = vrot.slane %v1082_v57, 1  ;;  %v1097_v8 = vrot.slane %v1084_v58, 1  ;;  %v1093_v10 = vrot.slane %v1081_v59, 1 }
  0x53   : > { %v1094_v12 = vrot.slane %v1083_v60, 1  ;;  %v1117_v19 = vstv %s4314_s2  ;;  %v1099_v28 = vrot.slane %v1085_v18, 1  ;;  %s257_s2 = sadd.s32 6, %s4195_s11  ;;  %v674_v60 = vmul.f32 %v4354_v13, %v4234_v11 }
  0x54   : > { %523 = vrot.lane.b32.xlu1 %v512_v21, %s6996_s6  ;;  %521 = vrot.lane.b32.xlu0 %v511_v22, %s6996_s6  ;;  %v4368_v21 = vsel %vm754_vm0, %v1096_v5, %v1097_v8  ;;  %v1119_v23 = vmul.f32 %v1117_v19, %v4357_v16  ;;  %v1120_v34 = vmul.f32 %v1117_v19, %v4241_v14  ;;  %s4422_s9 = sld [smem:[#allocation2 + %s257_s2]] }
  0x55   : > { %v4371_v22 = vsel %vm754_vm0, %v1093_v10, %v1094_v12 }
  0x56   : > { %v1133_v33 = vrot.slane %v1119_v23, 1 }
  0x58   : > { %543 = vrot.lane.b32.xlu1 %v534_v24, %s6996_s6  ;;  %541 = vrot.lane.b32.xlu0 %v533_v25, %s6996_s6  ;;  %v4378_v25 = vld [vmem:[%s4223_s24 + $0x28] sm:$0x1] }
  0x5c   : > { %547 = vrot.lane.b32.xlu1 %v536_v26, %s6996_s6  ;;  %545 = vrot.lane.b32.xlu0 %v535_v27, %s6996_s6  ;;  %s255_s6 = sadd.s32 5, %s4195_s11  ;;  %v4381_v26 = vld [vmem:[%s4223_s24 + $0x20] sm:$0x1]  ;;  %v1101_v27 = vrot.slane %v1086_v17, 1 }
  0x5d   : > { %s256_s30 = sld [smem:[#allocation2 + %s255_s6]] }
  0x5e   : > { %s4320_s6 = sld [smem:[#allocation2 + %s271_s0]]  ;;  %s369_s0 = sadd.s32 62, %s4195_s11  ;;  %v4389_v38 = vsel %vm754_vm0, %v1097_v8, %v1101_v27 }
  0x5f   : > { %s4375_s1 = sld [smem:[#allocation2 + %s369_s0]]  ;;  %s261_s0 = sadd.s32 8, %s4195_s11 }
  0x60   : > { %566 = vrot.lane.b32.xlu1 %v557_v29, %s4073_s4  ;;  %564 = vrot.lane.b32.xlu0 %v556_v30, %s4073_s4  ;;  %v1121_v29 = vmul.f32 %v1117_v19, %v4244_v15  ;;  %v1118_v30 = vmul.f32 %v1117_v19, %v4365_v20  ;;  %s262_s2 = sld [smem:[#allocation2 + %s261_s0]]  ;;  %s7013_s0 = smov 127  }
  0x63   : > { %v649_v51 = vstv %s256_s30  ;;  %s357_s30 = sadd.s32 56, %s4195_s11 }
  0x64   : > { %570 = vrot.lane.b32.xlu1 %v559_v35, %s4073_s4  ;;  %568 = vrot.lane.b32.xlu0 %v558_v36, %s4073_s4  ;;  %v651_v61 = vmul.f32 %v649_v51, %v4216_v4  ;;  %v650_v62 = vmul.f32 %v649_v51, %v4210_v1  ;;  %v4341_v63 = vmul.f32 %v649_v51, %v4213_v3  ;;  %v1154_v24 = vstv %s4320_s6  ;;  %s358_s6 = sld [smem:[#allocation2 + %s357_s30]]  ;;  %s263_s30 = sadd.s32 9, %s4195_s11 }
  0x65   : > { %v4348_v6 = vmul.f32 %v649_v51, %v4207_v0  ;;  %v1123_v35 = vmul.f32 %v1117_v19, %v4378_v25  ;;  %v1122_v36 = vmul.f32 %v1117_v19, %v4381_v26  ;;  %v1157_v49 = vmul.f32 %v1154_v24, %v4207_v0 }
  0x66   : > { %v1160_v5 = vmul.f32 %v1154_v24, %v4344_v2  ;;  %v1159_v8 = vmul.f32 %v1154_v24, %v4351_v7  ;;  %v1191_v10 = vstv %s4375_s1  ;;  %s356_s1 = sld [smem:[#allocation2 + %s355_s7]] }
  0x67   : > { %v1138_v43 = vrot.slane %v1123_v35, 1  ;;  %v1168_v59 = vrot.slane %v1157_v49, 1  ;;  %v1192_v23 = vmul.f32 %v1191_v10, %v4365_v20  ;;  %s264_s7 = sld [smem:[#allocation2 + %s263_s30]]  ;;  %s7014_s30 = smov 126  }
  0x68   : > { %590 = vrot.lane.b32.xlu1 %v581_v39, %s4073_s4  ;;  %588 = vrot.lane.b32.xlu0 %v580_v40, %s4073_s4  ;;  %v4392_v39 = vsel %vm754_vm0, %v1094_v12, %v1099_v28  ;;  %v1134_v40 = vrot.slane %v1121_v29, 1  ;;  %v1175_v18 = vrot.slane %v1160_v5, 1  ;;  %v1173_v19 = vrot.slane %v1159_v8, 1 }
  0x69   : > { %v1197_v29 = vmul.f32 %v1191_v10, %v4378_v25  ;;  %v1204_v35 = vrot.slane %v1192_v23, 1  ;;  %v784_v23 = vstv %s262_s2  ;;  %s265_s2 = sadd.s32 10, %s4195_s11 }
  0x6a   : > { %v4398_v46 = vsel %vm754_vm0, %v1133_v33, %v1134_v40  ;;  %v4408_v51 = vsel %vm754_vm0, %v1134_v40, %v1138_v43 }
  0x6c   : > { %594 = vrot.lane.b32.xlu1 %v583_v41, %s4073_s4  ;;  %592 = vrot.lane.b32.xlu0 %v582_v42, %s4073_s4  ;;  %v1130_v41 = vrot.slane %v1118_v30, 1  ;;  %v1131_v42 = vrot.slane %v1120_v34, 1  ;;  %v1196_v30 = vmul.f32 %v1191_v10, %v4381_v26  ;;  %v4446_v34 = vsel %vm754_vm0, %v1168_v59, %v1173_v19 }
  0x70   : > { %613 = vrot.lane.b32.xlu1 %v604_v44, %s4074_s5  ;;  %611 = vrot.lane.b32.xlu0 %v603_v45, %s4074_s5  ;;  %v1136_v44 = vrot.slane %v1122_v36, 1  ;;  %v1156_v45 = vmul.f32 %v1154_v24, %v4324_v52 }
  0x74   : > { %617 = vrot.lane.b32.xlu1 %v606_v47, %s4074_s5  ;;  %615 = vrot.lane.b32.xlu0 %v605_v48, %s4074_s5  ;;  %v1158_v47 = vmul.f32 %v1154_v24, %v4213_v3  ;;  %v1155_v48 = vmul.f32 %v1154_v24, %v4330_v56  ;;  %v1194_v24 = vmul.f32 %v1191_v10, %v4241_v14 }
  0x76   : > { %v1171_v57 = vrot.slane %v1158_v47, 1  ;;  %v1167_v58 = vrot.slane %v1155_v48, 1  ;;  %v1205_v36 = vrot.slane %v1194_v24, 1  ;;  %v696_v47 = vstv %s4422_s9  ;;  %s4076_s9 = smov 122  }
  0x77   : > { %v747_v48 = vstv %s260_s29  ;;  %v698_v49 = vmul.f32 %v696_v47, %v4216_v4  ;;  %v720_v4 = vstv %s356_s1  ;;  %s360_s29 = sld [smem:[#allocation2 + %s359_s25]] }
  0x78   : > { %637 = vrot.lane.b32.xlu1 %v628_v50, %s4074_s5  ;;  %635 = vrot.lane.b32.xlu0 %v627_v53, %s4074_s5  ;;  %v4405_v50 = vsel %vm754_vm0, %v1130_v41, %v1131_v42  ;;  %v4411_v53 = vsel %vm754_vm0, %v1131_v42, %v1136_v44  ;;  %v4428_v17 = vsel %vm754_vm0, %v1167_v58, %v1168_v59  ;;  %v1212_v41 = vrot.slane %v1197_v29, 1  ;;  %s266_s25 = sld [smem:[#allocation2 + %s265_s2]]  ;;  %s365_s2 = sadd.s32 60, %s4195_s11 }
  0x79   : > { %v4443_v33 = vsel %vm754_vm0, %v1171_v57, %v1175_v18  ;;  %v1210_v42 = vrot.slane %v1196_v30, 1  ;;  %v677_v44 = vmul.f32 %v4354_v13, %v4244_v15  ;;  %v764_v59 = vstv %s358_s6  ;;  %s361_s6 = sadd.s32 58, %s4195_s11 }
  0x7a   : > { %v765_v5 = vmul.f32 %v764_v59, %v4365_v20  ;;  %v766_v8 = vmul.f32 %v764_v59, %v4241_v14  ;;  %v721_v30 = vmul.f32 %v720_v4, %v4234_v11  ;;  %v723_v11 = vmul.f32 %v720_v4, %v4241_v14  ;;  %s362_s1 = sld [smem:[#allocation2 + %s361_s6]]  ;;  %s267_s6 = sadd.s32 11, %s4195_s11 }
  0x7b   : > { %v4460_v43 = vsel %vm754_vm0, %v1205_v36, %v1210_v42  ;;  %v785_v42 = vmul.f32 %v784_v23, %v4330_v56 }
  0x7c   : > { %641 = vrot.lane.b32.xlu1 %v630_v54, %s4074_s5  ;;  %639 = vrot.lane.b32.xlu0 %v629_v55, %s4074_s5  ;;  %v1170_v54 = vrot.slane %v1156_v45, 1  ;;  %v675_v55 = vmul.f32 %v4354_v13, %v4231_v9  ;;  %v676_v45 = vmul.f32 %v4354_v13, %v4241_v14  ;;  %v700_v13 = vmul.f32 %v696_v47, %v4213_v3 }
  0x7d   : > { %v771_v18 = vrot.slane %v765_v5, 1  ;;  %v772_v19 = vrot.slane %v766_v8, 1 }
  0x7e   : > { %v4425_v12 = vsel %vm754_vm0, %v1170_v54, %v1171_v57  ;;  %v697_v54 = vmul.f32 %v696_v47, %v4210_v1  ;;  %v749_v57 = vmul.f32 %v747_v48, %v4207_v0  ;;  %v699_v1 = vmul.f32 %v696_v47, %v4207_v0 }
  0x7f   : > { %v4489_v29 = vsel %vm754_vm0, %v771_v18, %v772_v19  ;;  %v790_v47 = vmul.f32 %v784_v23, %v4344_v2 }
  0x80   : > { %660 = vrot.lane.b32.xlu1 %v651_v61, %s4075_s28  ;;  %658 = vrot.lane.b32.xlu0 %v650_v62, %s4075_s28  ;;  %v1193_v61 = vmul.f32 %v1191_v10, %v4357_v16  ;;  %v1195_v62 = vmul.f32 %v1191_v10, %v4244_v15  ;;  %v750_v10 = vmul.f32 %v747_v48, %v4351_v7 }
  0x82   : > { %v1207_v27 = vrot.slane %v1193_v61, 1  ;;  %v1208_v28 = vrot.slane %v1195_v62, 1  ;;  %v767_v61 = vmul.f32 %v764_v59, %v4381_v26  ;;  %v758_v24 = vrot.slane %v750_v10, 1 }
  0x83   : > { %v805_v59 = vrot.slane %v790_v47, 1 }
  0x84   : > { %664 = vrot.lane.b32.xlu1 %v4341_v63, %s4075_s28  ;;  %662 = vrot.lane.b32.xlu0 %v4348_v6, %s4075_s28  ;;  %v4450_v40 = vsel %vm754_vm0, %v1207_v27, %v1208_v28  ;;  %v4453_v63 = vsel %vm754_vm0, %v1204_v35, %v1205_v36  ;;  %v4457_v6 = vsel %vm754_vm0, %v1208_v28, %v1212_v41  ;;  %v774_v27 = vrot.slane %v767_v61, 1 }
  0x85   : > { %v722_v28 = vmul.f32 %v720_v4, %v4231_v9  ;;  %v786_v41 = vmul.f32 %v784_v23, %v4324_v52  ;;  %v788_v9 = vmul.f32 %v784_v23, %v4213_v3  ;;  %v858_v61 = vstv %s264_s7 }
  0x86   : > { %v4499_v36 = vsel %vm754_vm0, %v772_v19, %v774_v27 }
  0x87   : > { %7012 = vst [vmem:[#allocation8_spill] sm:$0xff] %v4499_v36 }
  0x88   : > { %684 = vrot.lane.b32.xlu1 %v675_v55, %s4075_s28  ;;  %682 = vrot.lane.b32.xlu0 %v674_v60, %s4075_s28  ;;  %v748_v55 = vmul.f32 %v747_v48, %v4330_v56  ;;  %v756_v60 = vrot.slane %v749_v57, 1  ;;  %v789_v48 = vmul.f32 %v784_v23, %v4351_v7  ;;  %v797_v57 = vrot.slane %v785_v42, 1 }
  0x8a   : > { %v755_v58 = vrot.slane %v748_v55, 1  ;;  %v4496_v35 = vsel %vm754_vm0, %v756_v60, %v758_v24  ;;  %v801_v55 = vrot.slane %v788_v9, 1 }
  0x8c   : > { %688 = vrot.lane.b32.xlu1 %v677_v44, %s4075_s28  ;;  %686 = vrot.lane.b32.xlu0 %v676_v45, %s4075_s28  ;;  %v4485_v62 = vsel %vm754_vm0, %v755_v58, %v756_v60  ;;  %v787_v44 = vmul.f32 %v784_v23, %v4207_v0  ;;  %v724_v45 = vmul.f32 %v720_v4, %v4244_v15 }
  0x8d   : > { %v806_v18 = vsel %vm754_vm0, %v801_v55, %v805_v59  ;;  %v863_v59 = vmul.f32 %v858_v61, %v4351_v7 }
  0x8e   : > { %v798_v58 = vrot.slane %v787_v44, 1  ;;  %v860_v44 = vmul.f32 %v858_v61, %v4324_v52 }
  0x90   : > { %707 = vrot.lane.b32.xlu1 %v698_v49, %s4076_s9  ;;  %705 = vrot.lane.b32.xlu0 %v697_v54, %s4076_s9  ;;  %v821_v49 = vstv %s360_s29  ;;  %v800_v54 = vrot.slane %v786_v41, 1  ;;  %s363_s29 = sadd.s32 59, %s4195_s11 }
  0x91   : > { %v823_v60 = vmul.f32 %v821_v49, %v4357_v16  ;;  %v825_v5 = vmul.f32 %v821_v49, %v4244_v15  ;;  %v822_v4 = vmul.f32 %v821_v49, %v4365_v20  ;;  %v824_v10 = vmul.f32 %v821_v49, %v4241_v14  ;;  %s364_s7 = sld [smem:[#allocation2 + %s363_s29]]  ;;  %s275_s29 = sadd.s32 15, %s4195_s11 }
  0x92   : > { %v802_v8 = vsel %vm754_vm0, %v800_v54, %v801_v55  ;;  %v827_v24 = vmul.f32 %v821_v49, %v4378_v25  ;;  %v826_v41 = vmul.f32 %v821_v49, %v4381_v26  ;;  %v861_v54 = vmul.f32 %v858_v61, %v4207_v0 }
  0x93   : > { %v837_v19 = vrot.slane %v823_v60, 1  ;;  %v838_v23 = vrot.slane %v825_v5, 1  ;;  %v864_v49 = vmul.f32 %v858_v61, %v4344_v2 }
  0x94   : > { %711 = vrot.lane.b32.xlu1 %v700_v13, %s4076_s9  ;;  %709 = vrot.lane.b32.xlu0 %v699_v1, %s4076_s9  ;;  %v803_v13 = vrot.slane %v789_v48, 1  ;;  %v799_v1 = vsel %vm754_vm0, %v797_v57, %v798_v58  ;;  %v842_v42 = vrot.slane %v827_v24, 1  ;;  %v840_v47 = vrot.slane %v826_v41, 1 }
  0x95   : > { %v839_v9 = vsel %vm754_vm0, %v837_v19, %v838_v23  ;;  %v859_v48 = vmul.f32 %v858_v61, %v4330_v56  ;;  %v874_v57 = vrot.slane %v860_v44, 1  ;;  %v872_v5 = vrot.slane %v861_v54, 1 }
  0x96   : > { %v804_v27 = vsel %vm754_vm0, %v798_v58, %v803_v13  ;;  %v843_v55 = vsel %vm754_vm0, %v838_v23, %v842_v42 }
  0x97   : > { %v871_v60 = vrot.slane %v859_v48, 1 }
  0x98   : > { %731 = vrot.lane.b32.xlu1 %v722_v28, %s4076_s9  ;;  %729 = vrot.lane.b32.xlu0 %v721_v30, %s4076_s9  ;;  %v834_v28 = vrot.slane %v822_v4, 1  ;;  %v835_v30 = vrot.slane %v824_v10, 1  ;;  %v877_v10 = vrot.slane %v863_v59, 1 }
  0x99   : > { %v873_v19 = vsel %vm754_vm0, %v871_v60, %v872_v5 }
  0x9a   : > { %v841_v13 = vsel %vm754_vm0, %v835_v30, %v840_v47 }
  0x9c   : > { %735 = vrot.lane.b32.xlu1 %v724_v45, %s4076_s9  ;;  %733 = vrot.lane.b32.xlu0 %v723_v11, %s4076_s9  ;;  %v862_v45 = vmul.f32 %v858_v61, %v4213_v3  ;;  %v836_v11 = vsel %vm754_vm0, %v834_v28, %v835_v30  ;;  %v878_v28 = vsel %vm754_vm0, %v872_v5, %v877_v10 }
  0x9e   : > { %v875_v58 = vrot.slane %v862_v45, 1 }
  0xa0   : > { %809 = vrot.lane.b32.xlu1 %v802_v8, %s7013_s0  ;;  %807 = vrot.lane.b32.xlu0 %v799_v1, %s7013_s0  ;;  %v895_v8 = vstv %s362_s1  ;;  %v879_v1 = vrot.slane %v864_v49, 1  ;;  %v876_v4 = vsel %vm754_vm0, %v874_v57, %v875_v58  ;;  %s268_s1 = sld [smem:[#allocation2 + %s267_s6]]  ;;  %s373_s6 = sadd.s32 64, %s4195_s11 }
  0xa1   : > { %v899_v61 = vmul.f32 %v895_v8, %v4244_v15  ;;  %v896_v23 = vmul.f32 %v895_v8, %v4365_v20  ;;  %v898_v24 = vmul.f32 %v895_v8, %v4241_v14  ;;  %v901_v41 = vmul.f32 %v895_v8, %v4378_v25 }
  0xa3   : > { %v912_v42 = vrot.slane %v899_v61, 1  ;;  %v908_v44 = vrot.slane %v896_v23, 1  ;;  %v909_v45 = vrot.slane %v898_v24, 1  ;;  %v916_v49 = vrot.slane %v901_v41, 1 }
  0xa4   : > { %813 = vrot.lane.b32.xlu1 %v806_v18, %s7013_s0  ;;  %811 = vrot.lane.b32.xlu0 %v804_v27, %s7013_s0  ;;  %v897_v18 = vmul.f32 %v895_v8, %v4357_v16  ;;  %v880_v27 = vsel %vm754_vm0, %v875_v58, %v879_v1 }
  0xa5   : > { %v910_v59 = vsel %vm754_vm0, %v908_v44, %v909_v45 }
  0xa6   : > { %v911_v30 = vrot.slane %v897_v18, 1 }
  0xa8   : > { %846 = vrot.lane.b32.xlu1 %v839_v9, %s7013_s0  ;;  %844 = vrot.lane.b32.xlu0 %v836_v11, %s7013_s0  ;;  %v932_v9 = vstv %s266_s25  ;;  %v900_v11 = vmul.f32 %v895_v8, %v4381_v26  ;;  %v913_v58 = vsel %vm754_vm0, %v911_v30, %v912_v42  ;;  %s366_s25 = sld [smem:[#allocation2 + %s365_s2]]  ;;  %s375_s2 = sadd.s32 65, %s4195_s11 }
  0xa9   : > { %v934_v54 = vmul.f32 %v932_v9, %v4324_v52  ;;  %v933_v57 = vmul.f32 %v932_v9, %v4330_v56  ;;  %v935_v60 = vmul.f32 %v932_v9, %v4207_v0  ;;  %v938_v24 = vmul.f32 %v932_v9, %v4344_v2 }
  0xab   : > { %v948_v1 = vrot.slane %v934_v54, 1  ;;  %v945_v18 = vrot.slane %v933_v57, 1  ;;  %v946_v23 = vrot.slane %v935_v60, 1  ;;  %v953_v54 = vrot.slane %v938_v24, 1 }
  0xac   : > { %850 = vrot.lane.b32.xlu1 %v843_v55, %s7013_s0  ;;  %848 = vrot.lane.b32.xlu0 %v841_v13, %s7013_s0  ;;  %v936_v55 = vmul.f32 %v932_v9, %v4213_v3  ;;  %v914_v13 = vrot.slane %v900_v11, 1 }
  0xae   : > { %v949_v10 = vrot.slane %v936_v55, 1  ;;  %v915_v61 = vsel %vm754_vm0, %v909_v45, %v914_v13 }
  0xb0   : > { %883 = vrot.lane.b32.xlu1 %v876_v4, %s7014_s30  ;;  %881 = vrot.lane.b32.xlu0 %v873_v19, %s7014_s30  ;;  %v917_v4 = vsel %vm754_vm0, %v912_v42, %v916_v49  ;;  %v969_v19 = vstv %s364_s7  ;;  %v950_v11 = vsel %vm754_vm0, %v948_v1, %v949_v10  ;;  %s276_s7 = sld [smem:[#allocation2 + %s275_s29]]  ;;  %s279_s29 = sadd.s32 17, %s4195_s11 }
  0xb1   : > { %v971_v41 = vmul.f32 %v969_v19, %v4357_v16  ;;  %v973_v42 = vmul.f32 %v969_v19, %v4244_v15  ;;  %v970_v44 = vmul.f32 %v969_v19, %v4365_v20  ;;  %v972_v45 = vmul.f32 %v969_v19, %v4241_v14 }
  0xb2   : > { %v4556_v47 = vpop.permute.xlu1 %474  ;;  %v4558_v48 = vpop.permute.xlu0 %470  ;;  %v974_v1 = vmul.f32 %v969_v19, %v4381_v26 }
  0xb3   : > { %v986_v13 = vrot.slane %v973_v42, 1  ;;  %v982_v60 = vrot.slane %v970_v44, 1 }
  0xb4   : > { %887 = vrot.lane.b32.xlu1 %v880_v27, %s7014_s30  ;;  %885 = vrot.lane.b32.xlu0 %v878_v28, %s7014_s30  ;;  %v937_v27 = vmul.f32 %v932_v9, %v4351_v7  ;;  %v947_v9 = vsel %vm754_vm0, %v945_v18, %v946_v23  ;;  %v954_v18 = vsel %vm754_vm0, %v949_v10, %v953_v54 }
  0xb6   : > { %v4568_v5 = vpop.permute.xlu1 %476  ;;  %v4570_v8 = vpop.permute.xlu0 %472  ;;  %v951_v49 = vrot.slane %v937_v27, 1 }
  0xb8   : > { %920 = vrot.lane.b32.xlu1 %v913_v58, %s7014_s30  ;;  %918 = vrot.lane.b32.xlu0 %v910_v59, %s7014_s30  ;;  %v985_v58 = vrot.slane %v971_v41, 1  ;;  %v975_v59 = vmul.f32 %v969_v19, %v4378_v25  ;;  %v1006_v41 = vstv %s268_s1  ;;  %v988_v19 = vrot.slane %v974_v1, 1  ;;  %s4712_s1 = sld [smem:[#allocation2 + %s373_s6]]  ;;  %s377_s6 = sadd.s32 66, %s4195_s11 }
  0xb9   : > { %v1010_v10 = vmul.f32 %v1006_v41, %v4213_v3 }
  0xba   : > { %v4579_v28 = vpop.permute.xlu1 %496  ;;  %v4581_v30 = vpop.permute.xlu0 %494  ;;  %v990_v31 = vrot.slane %v975_v59, 1  ;;  %v987_v42 = vsel %vm754_vm0, %v985_v58, %v986_v13  ;;  %v1011_v59 = vmul.f32 %v1006_v41, %v4351_v7 }
  0xbb   : > { %v1023_v1 = vrot.slane %v1010_v10, 1 }
  0xbc   : > { %924 = vrot.lane.b32.xlu1 %v917_v4, %s7014_s30  ;;  %922 = vrot.lane.b32.xlu0 %v915_v61, %s7014_s30  ;;  %v983_v4 = vrot.slane %v972_v45, 1  ;;  %v952_v61 = vsel %vm754_vm0, %v946_v23, %v951_v49  ;;  %v1008_v45 = vmul.f32 %v1006_v41, %v4324_v52  ;;  %v1007_v23 = vmul.f32 %v1006_v41, %v4330_v56 }
  0xbd   : > { %v991_v49 = vsel %vm754_vm0, %v986_v13, %v990_v31  ;;  %v1012_v52 = vmul.f32 %v1006_v41, %v4344_v2  ;;  %v1025_v13 = vrot.slane %v1011_v59, 1 }
  0xbe   : > { %v4592_v55 = vpop.permute.xlu1 %500  ;;  %v4594_v57 = vpop.permute.xlu0 %498  ;;  %v984_v44 = vsel %vm754_vm0, %v982_v60, %v983_v4  ;;  %v989_v58 = vsel %vm754_vm0, %v983_v4, %v988_v19  ;;  %v1043_v60 = vstv %s366_s25  ;;  %v1022_v56 = vrot.slane %v1008_v45, 1  ;;  %s4832_s25 = sld [smem:[#allocation2 + %s375_s2]]  ;;  %s379_s2 = sadd.s32 67, %s4195_s11 }
  0xbf   : > { %v1027_v31 = vrot.slane %v1012_v52, 1  ;;  %v1045_v4 = vmul.f32 %v1043_v60, %v4357_v16  ;;  %v1047_v2 = vmul.f32 %v1043_v60, %v4244_v15  ;;  %v1048_v52 = vmul.f32 %v1043_v60, %v4381_v26 }
  0xc0   : > { %957 = vrot.lane.b32.xlu1 %v950_v11, %s4073_s4  ;;  %955 = vrot.lane.b32.xlu0 %v947_v9, %s4073_s4  ;;  %v1009_v11 = vmul.f32 %v1006_v41, %v4207_v0  ;;  %v1024_v7 = vsel %vm754_vm0, %v1022_v56, %v1023_v1 }
  0xc1   : > { %v1028_v16 = vsel %vm754_vm0, %v1023_v1, %v1027_v31  ;;  %v1062_v31 = vrot.slane %v1048_v52, 1 }
  0xc2   : > { %v4602_v24 = vpop.permute.xlu1 %519  ;;  %v4604_v27 = vpop.permute.xlu0 %517 }
  0xc4   : > { %961 = vrot.lane.b32.xlu1 %v954_v18, %s4073_s4  ;;  %959 = vrot.lane.b32.xlu0 %v952_v61, %s4073_s4  ;;  %v1019_v18 = vrot.slane %v1007_v23, 1  ;;  %v1020_v61 = vrot.slane %v1009_v11, 1  ;;  %v1059_v23 = vrot.slane %v1045_v4, 1  ;;  %v1060_v11 = vrot.slane %v1047_v2, 1 }
  0xc6   : > { %v4614_v9 = vpop.permute.xlu1 %523  ;;  %v4616_v54 = vpop.permute.xlu0 %521  ;;  %v1021_v41 = vsel %vm754_vm0, %v1019_v18, %v1020_v61  ;;  %v1026_v10 = vsel %vm754_vm0, %v1020_v61, %v1025_v13  ;;  %v1061_v1 = vsel %vm754_vm0, %v1059_v23, %v1060_v11  ;;  %v4710_v23 = vld [vmem:[%s4204_s10] sm:$0xfc] }
  0xc8   : > { %994 = vrot.lane.b32.xlu1 %v987_v42, %s4073_s4  ;;  %992 = vrot.lane.b32.xlu0 %v984_v44, %s4073_s4  ;;  %v1044_v42 = vmul.f32 %v1043_v60, %v4365_v20  ;;  %v1046_v44 = vmul.f32 %v1043_v60, %v4241_v14  ;;  %v1049_v20 = vmul.f32 %v1043_v60, %v4378_v25 }
  0xca   : > { %v4624_v32 = vpop.permute.xlu1 %543  ;;  %v4626_v36 = vpop.permute.xlu0 %541  ;;  %v1064_v61 = vrot.slane %v1049_v20, 1 }
  0xcc   : > { %998 = vrot.lane.b32.xlu1 %v991_v49, %s4073_s4  ;;  %996 = vrot.lane.b32.xlu0 %v989_v58, %s4073_s4  ;;  %v1056_v49 = vrot.slane %v1044_v42, 1  ;;  %v1057_v58 = vrot.slane %v1046_v44, 1  ;;  %v1065_v26 = vsel %vm754_vm0, %v1060_v11, %v1064_v61  ;;  %v7015_v11 = vstv %s4268_s21 }
  0xce   : > { %v4636_v19 = vpop.permute.xlu1 %547  ;;  %v4638_v45 = vpop.permute.xlu0 %545  ;;  %v1058_v18 = vsel %vm754_vm0, %v1056_v49, %v1057_v58  ;;  %v1063_v60 = vsel %vm754_vm0, %v1057_v58, %v1062_v31  ;;  %v454_v49 = vmul.f32 %v7015_v11, %v4241_v14  ;;  %v7016_v58 = vstv %s4266_s20  ;;  %s277_s20 = sadd.s32 16, %s4195_s11 }
  0xcf   : > { %v449_v20 = vmul.f32 %v7016_v58, %v4207_v0  ;;  %v1306_v11 = vstv %s4712_s1  ;;  %s4780_s21 = sld [smem:[#allocation2 + %s277_s20]]  ;;  %s281_s20 = sadd.s32 18, %s4195_s11 }
  0xd0   : > { %1031 = vrot.lane.b32.xlu1 %v1024_v7, %s4074_s5  ;;  %1029 = vrot.lane.b32.xlu0 %v1021_v41, %s4074_s5  ;;  %s378_s1 = sld [smem:[#allocation2 + %s377_s6]]  ;;  %s381_s6 = sadd.s32 68, %s4195_s11 }
  0xd1   : > { %v456_v31 = vadd.f32 %v454_v49, %v449_v20  ;;  %v4778_v20 = vld [vmem:[%s4223_s24] sm:$0xfc] }
  0xd2   : > { %v4646_v59 = vpop.permute.xlu1 %566  ;;  %v4648_v56 = vpop.permute.xlu0 %564 }
  0xd4   : > { %1035 = vrot.lane.b32.xlu1 %v1028_v16, %s4074_s5  ;;  %1033 = vrot.lane.b32.xlu0 %v1026_v10, %s4074_s5 }
  0xd6   : > { %v4654_v13 = vpop.permute.xlu1 %570  ;;  %v4656_v25 = vpop.permute.xlu0 %568 }
  0xd8   : > { %1068 = vrot.lane.b32.xlu1 %v1061_v1, %s4074_s5  ;;  %1066 = vrot.lane.b32.xlu0 %v1058_v18, %s4074_s5  ;;  %v4740_v18 = vld [vmem:[%s4204_s10 + $0x28] sm:$0x3] }
  0xda   : > { %v4662_v4 = vpop.permute.xlu1 %590  ;;  %v4664_v2 = vpop.permute.xlu0 %588 }
  0xdc   : > { %1072 = vrot.lane.b32.xlu1 %v1065_v26, %s4074_s5  ;;  %1070 = vrot.lane.b32.xlu0 %v1063_v60, %s4074_s5 }
  0xde   : > { %v4668_v7 = vpop.permute.xlu1 %594  ;;  %v4670_v41 = vpop.permute.xlu0 %592 }
  0xe0   : > { %1105 = vrot.lane.b32.xlu1 %v4368_v21, %s4075_s28  ;;  %1103 = vrot.lane.b32.xlu0 %v4371_v22, %s4075_s28 }
  0xe2   : > { %v4676_v42 = vpop.permute.xlu1 %613  ;;  %v4678_v44 = vpop.permute.xlu0 %611 }
  0xe4   : > { %1109 = vrot.lane.b32.xlu1 %v4389_v38, %s4075_s28  ;;  %1107 = vrot.lane.b32.xlu0 %v4392_v39, %s4075_s28  ;;  %v4703_v38 = vld [vmem:[%s4204_s10 + $0x8] sm:$0xfc]  ;;  %v1269_v39 = vstv %s276_s7  ;;  %s4883_s7 = sld [smem:[#allocation2 + %s279_s29]]  ;;  %s283_s29 = sadd.s32 19, %s4195_s11 }
  0xe5   : > { %v1270_v52 = vmul.f32 %v1269_v39, %v4710_v23 }
  0xe6   : > { %v4685_v16 = vpop.permute.xlu1 %617  ;;  %v4687_v21 = vpop.permute.xlu0 %615 }
  0xe8   : > { %1142 = vrot.lane.b32.xlu1 %v4398_v46, %s4075_s28  ;;  %1140 = vrot.lane.b32.xlu0 %v4405_v50, %s4075_s28 }
  0xea   : > { %v4693_v22 = vpop.permute.xlu1 %637  ;;  %v4695_v10 = vpop.permute.xlu0 %635 }
  0xec   : > { %1146 = vrot.lane.b32.xlu1 %v4408_v51, %s4075_s28  ;;  %1144 = vrot.lane.b32.xlu0 %v4411_v53, %s4075_s28  ;;  %v1271_v51 = vmul.f32 %v1269_v39, %v4703_v38  ;;  %v4720_v53 = vmul.f32 %v1269_v39, %v4213_v3  ;;  %v479_v3 = vsel %vm478_vm1, %v4558_v48, %v4570_v8  ;;  %v1282_v8 = vrot.slane %v1270_v52, 2 }
  0xed   : > { %v502_v48 = vsel %vm478_vm1, %v4581_v30, %v4579_v28  ;;  %v483_v26 = vadd.f32 %v479_v3, %v4292_v37  ;;  %v480_v28 = vsel %vm478_vm1, %v4556_v47, %v4568_v5  ;;  %v526_v37 = vsel %vm525_vm2, %v4604_v27, %v4602_v24 }
  0xee   : > { %v4705_v46 = vpop.permute.xlu1 %641  ;;  %v4707_v50 = vpop.permute.xlu0 %639  ;;  %v1285_v14 = vrot.slane %v1271_v51, 2  ;;  %v1286_v61 = vrot.slane %v4720_v53, 2  ;;  %v1275_v51 = vmul.f32 %v1269_v39, %v4740_v18  ;;  %v4762_v53 = vld [vmem:[%s4223_s24 + $0x8] sm:$0xfc]  ;;  %v503_v47 = vsel %vm478_vm1, %v4594_v57, %v4592_v55  ;;  %v4801_v57 = vld [vmem:[%s4223_s24 + $0x28] sm:$0x3] }
  0xef   : > { %v506_v49 = vadd.f32 %v502_v48, %v483_v26  ;;  %v549_v5 = vsel %vm525_vm2, %v4626_v36, %v4624_v32  ;;  %v484_v24 = vadd.f32 %v480_v28, %v456_v31  ;;  %v527_v55 = vsel %vm525_vm2, %v4616_v54, %v4614_v9  ;;  %v4811_v9 = vld [vmem:[%s4223_s24 + $0x10] sm:$0xff] }
  0xf0   : > { %1179 = vrot.lane.b32.xlu1 %v4425_v12, %s4076_s9  ;;  %1177 = vrot.lane.b32.xlu0 %v4428_v17, %s4076_s9  ;;  %v4734_v17 = vmul.f32 %v1269_v39, %v4207_v0  ;;  %v4748_v0 = vld [vmem:[%s4204_s10 + $0x20] sm:$0x3]  ;;  %v1287_v58 = vsel %vm1239_vm3, %v1285_v14, %v1286_v61  ;;  %v1290_v3 = vrot.slane %v1275_v51, 2  ;;  %v573_v32 = vsel %vm572_vm4, %v4648_v56, %v4646_v59 }
  0xf1   : > { %v1274_v30 = vmul.f32 %v1269_v39, %v4748_v0  ;;  %v530_v27 = vadd.f32 %v526_v37, %v506_v49  ;;  %v4804_v14 = vld [vmem:[%s4223_s24 + $0x20] sm:$0x3]  ;;  %v507_v31 = vadd.f32 %v503_v47, %v484_v24  ;;  %v1309_v54 = vmul.f32 %v4811_v9, %v1306_v11 }
  0xf2   : > { %v4729_v1 = vpop.permute.xlu1 %660  ;;  %v4731_v12 = vpop.permute.xlu0 %658  ;;  %v550_v59 = vsel %vm525_vm2, %v4638_v45, %v4636_v19  ;;  %v596_v56 = vsel %vm572_vm4, %v4664_v2, %v4662_v4  ;;  %v1312_v37 = vmul.f32 %v1306_v11, %v4801_v57  ;;  %v574_v19 = vsel %vm572_vm4, %v4656_v25, %v4654_v13 }
  0xf3   : > { %v1288_v36 = vrot.slane %v1274_v30, 2  ;;  %v553_v48 = vadd.f32 %v549_v5, %v530_v27  ;;  %v1311_v30 = vmul.f32 %v1306_v11, %v4804_v14  ;;  %v620_v45 = vsel %vm619_vm5, %v4678_v44, %v4676_v42 }
  0xf4   : > { %1183 = vrot.lane.b32.xlu1 %v4443_v33, %s4076_s9  ;;  %1181 = vrot.lane.b32.xlu0 %v4446_v34, %s4076_s9  ;;  %v1283_v34 = vrot.slane %v4734_v17, 2  ;;  %v1291_v4 = vsel %vm1239_vm3, %v1286_v61, %v1290_v3  ;;  %v1343_v5 = vstv %s4780_s21  ;;  %v597_v13 = vsel %vm572_vm4, %v4670_v41, %v4668_v7  ;;  %s282_s21 = sld [smem:[#allocation2 + %s281_s20]]  ;;  %s285_s20 = sadd.s32 20, %s4195_s11 }
  0xf5   : > { %v577_v51 = vadd.f32 %v573_v32, %v553_v48  ;;  %v643_v25 = vsel %vm619_vm5, %v4695_v10, %v4693_v22  ;;  %v1320_v44 = vrot.slane %v1309_v54, 2  ;;  %v1325_v24 = vrot.slane %v1311_v30, 2  ;;  %v4852_v22 = vld [vmem:[%s4204_s10 + $0x18] sm:$0xff] }
  0xf6   : > { %v4755_v33 = vpop.permute.xlu1 %664  ;;  %v4757_v60 = vpop.permute.xlu0 %662  ;;  %v1284_v17 = vsel %vm1239_vm3, %v1282_v8, %v1283_v34  ;;  %v1289_v2 = vsel %vm1239_vm3, %v1283_v34, %v1288_v36  ;;  %v621_v27 = vsel %vm619_vm5, %v4687_v21, %v4685_v16  ;;  %v667_v7 = vsel %vm666_vm6, %v4731_v12, %v4729_v1 }
  0xf7   : > { %v600_v47 = vadd.f32 %v596_v56, %v577_v51  ;;  %v1345_v41 = vmul.f32 %v1343_v5, %v4703_v38  ;;  %v4855_v10 = vmul.f32 %v4852_v22, %v1343_v5  ;;  %v1344_v16 = vmul.f32 %v1343_v5, %v4710_v23 }
  0xf8   : > { %1216 = vrot.lane.b32.xlu1 %v4450_v40, %s4076_s9  ;;  %1214 = vrot.lane.b32.xlu0 %v4453_v63, %s4076_s9  ;;  %v1308_v40 = vmul.f32 %v1306_v11, %v4762_v53  ;;  %v4790_v63 = vmul.f32 %v1306_v11, %v4244_v15  ;;  %v1307_v15 = vmul.f32 %v1306_v11, %v4778_v20 }
  0xf9   : > { %v624_v34 = vadd.f32 %v620_v45, %v600_v47  ;;  %v644_v21 = vsel %vm619_vm5, %v4707_v50, %v4705_v46  ;;  %v668_v46 = vsel %vm666_vm6, %v4757_v60, %v4755_v33  ;;  %v1349_v30 = vmul.f32 %v1343_v5, %v4740_v18 }
  0xfa   : > { %v685_v39 = vpop.permute.xlu1 %684  ;;  %v683_v52 = vpop.permute.xlu0 %682  ;;  %v1322_v8 = vrot.slane %v1308_v40, 2  ;;  %v1323_v26 = vrot.slane %v4790_v63, 2  ;;  %v1319_v11 = vrot.slane %v1307_v15, 2  ;;  %v1327_v63 = vrot.slane %v1312_v37, 2 }
  0xfb   : > { %v647_v3 = vadd.f32 %v643_v25, %v624_v34  ;;  %v690_v1 = vsel %vm666_vm6, %v683_v52, %v685_v39  ;;  %v1359_v39 = vrot.slane %v1345_v41, 2  ;;  %v1380_v52 = vstv %s4832_s25  ;;  %s380_s25 = sld [smem:[#allocation2 + %s379_s2]]  ;;  %s383_s2 = sadd.s32 69, %s4195_s11 }
  0xfc   : > { %1220 = vrot.lane.b32.xlu1 %v4457_v6, %s4076_s9  ;;  %1218 = vrot.lane.b32.xlu0 %v4460_v43, %s4076_s9  ;;  %v531_v6 = vadd.f32 %v527_v55, %v507_v31  ;;  %v1324_v42 = vsel %vm1239_vm3, %v1322_v8, %v1323_v26  ;;  %v1321_v12 = vsel %vm1239_vm3, %v1319_v11, %v1320_v44  ;;  %v4866_v55 = vld [vmem:[%s4204_s10 + $0x10] sm:$0xff]  ;;  %v4889_v11 = vld [vmem:[%s4223_s24 + $0x18] sm:$0xff] }
  0xfd   : > { %v1346_v32 = vmul.f32 %v4866_v55, %v1343_v5  ;;  %v671_v15 = vadd.f32 %v667_v7, %v647_v3  ;;  %v1328_v54 = vsel %vm1239_vm3, %v1323_v26, %v1327_v63  ;;  %v1360_v26 = vrot.slane %v4855_v10, 2 }
  0xfe   : > { %v689_v43 = vpop.permute.xlu1 %688  ;;  %v687_v28 = vpop.permute.xlu0 %686  ;;  %v554_v49 = vadd.f32 %v550_v59, %v531_v6  ;;  %v1326_v59 = vsel %vm1239_vm3, %v1320_v44, %v1325_v24  ;;  %v1356_v6 = vrot.slane %v1344_v16, 2  ;;  %v1348_v33 = vmul.f32 %v1343_v5, %v4748_v0 }
  0xff   : > { %v694_v8 = vadd.f32 %v690_v1, %v671_v15  ;;  %v691_v51 = vsel %vm666_vm6, %v687_v28, %v689_v43  ;;  %v1357_v37 = vrot.slane %v1346_v32, 2  ;;  %v1384_v43 = vmul.f32 %v4889_v11, %v1380_v52 }
 0x100   : > { %1294 = vrot.lane.b32.xlu1 %v1287_v58, %s7013_s0  ;;  %1292 = vrot.lane.b32.xlu0 %v1284_v17, %s7013_s0  ;;  %v578_v61 = vadd.f32 %v574_v19, %v554_v49  ;;  %v1381_v28 = vmul.f32 %v1380_v52, %v4778_v20  ;;  %v1383_v25 = vmul.f32 %v4811_v9, %v1380_v52  ;;  %v1362_v34 = vrot.slane %v1348_v33, 2 }
 0x101   : > { %v1358_v44 = vsel %vm1239_vm3, %v1356_v6, %v1357_v37  ;;  %v1397_v41 = vrot.slane %v1384_v43, 2  ;;  %v1386_v10 = vmul.f32 %v1380_v52, %v4801_v57  ;;  %v1417_v32 = vstv %s4883_s7  ;;  %s284_s7 = sld [smem:[#allocation2 + %s283_s29]]  ;;  %s289_s29 = sadd.s32 22, %s4195_s11 }
 0x102   : > { %v708_v40 = vpop.permute.xlu1 %707  ;;  %v706_v58 = vpop.permute.xlu0 %705  ;;  %v601_v17 = vadd.f32 %v597_v13, %v578_v61  ;;  %v1364_v61 = vrot.slane %v1349_v30, 2  ;;  %v1393_v16 = vrot.slane %v1381_v28, 2  ;;  %v1363_v1 = vsel %vm1239_vm3, %v1357_v37, %v1362_v34 }
 0x103   : > { %v714_v50 = vsel %vm713_vm7, %v706_v58, %v708_v40  ;;  %v1423_v30 = vmul.f32 %v1417_v32, %v4740_v18  ;;  %v1422_v33 = vmul.f32 %v1417_v32, %v4748_v0 }
 0x104   : > { %1298 = vrot.lane.b32.xlu1 %v1291_v4, %s7013_s0  ;;  %1296 = vrot.lane.b32.xlu0 %v1289_v2, %s7013_s0  ;;  %v625_v36 = vadd.f32 %v621_v27, %v601_v17  ;;  %v718_v19 = vadd.f32 %v714_v50, %v694_v8  ;;  %v1382_v2 = vmul.f32 %v1380_v52, %v4762_v53 }
 0x105   : > { %v1421_v50 = vmul.f32 %v4852_v22, %v1417_v32  ;;  %v1438_v43 = vrot.slane %v1423_v30, 2  ;;  %v1436_v28 = vrot.slane %v1422_v33, 2  ;;  %v1528_v33 = vstv %s380_s25  ;;  %s384_s25 = sld [smem:[#allocation2 + %s383_s2]]  ;;  %s389_s2 = sadd.s32 72, %s4195_s11 }
 0x106   : > { %v712_v31 = vpop.permute.xlu1 %711  ;;  %v710_v48 = vpop.permute.xlu0 %709  ;;  %v648_v56 = vadd.f32 %v644_v21, %v625_v36  ;;  %v1396_v7 = vrot.slane %v1382_v2, 2  ;;  %v1365_v21 = vsel %vm1239_vm3, %v1360_v26, %v1364_v61 }
 0x107   : > { %v715_v49 = vsel %vm713_vm7, %v710_v48, %v712_v31  ;;  %v1401_v48 = vrot.slane %v1386_v10, 2  ;;  %v1434_v37 = vrot.slane %v1421_v50, 2 }
 0x108   : > { %1331 = vrot.lane.b32.xlu1 %v1324_v42, %s7013_s0  ;;  %1329 = vrot.lane.b32.xlu0 %v1321_v12, %s7013_s0  ;;  %v672_v60 = vadd.f32 %v668_v46, %v648_v56  ;;  %v1361_v42 = vsel %vm1239_vm3, %v1359_v39, %v1360_v26  ;;  %v1385_v12 = vmul.f32 %v1380_v52, %v4804_v14 }
 0x109   : > { %v1398_v31 = vsel %vm1239_vm3, %v1396_v7, %v1397_v41  ;;  %v1419_v46 = vmul.f32 %v1417_v32, %v4703_v38  ;;  %v1418_v52 = vmul.f32 %v1417_v32, %v4710_v23  ;;  %v1420_v56 = vmul.f32 %v4866_v55, %v1417_v32 }
 0x10a   : > { %v732_v45 = vpop.permute.xlu1 %731  ;;  %v730_v4 = vpop.permute.xlu0 %729  ;;  %v695_v5 = vadd.f32 %v691_v51, %v672_v60  ;;  %v1399_v39 = vrot.slane %v1385_v12, 2  ;;  %v1402_v6 = vsel %vm1239_vm3, %v1397_v41, %v1401_v48 }
 0x10b   : > { %v737_v47 = vsel %vm713_vm7, %v730_v4, %v732_v45  ;;  %v1433_v51 = vrot.slane %v1419_v46, 2  ;;  %v1431_v45 = vrot.slane %v1420_v56, 2  ;;  %v1454_v4 = vstv %s378_s1  ;;  %s382_s1 = sld [smem:[#allocation2 + %s381_s6]]  ;;  %s387_s6 = sadd.s32 71, %s4195_s11 }
 0x10c   : > { %v741_v13 = vadd.f32 %v737_v47, %v718_v19  ;;  %1335 = vrot.lane.b32.xlu1 %v1328_v54, %s7013_s0  ;;  %1333 = vrot.lane.b32.xlu0 %v1326_v59, %s7013_s0  ;;  %v719_v40 = vadd.f32 %v715_v49, %v695_v5  ;;  %v7017_v54 = vld [vmem:[#allocation8_spill] sm:$0xff]  ;;  %v1430_v19 = vrot.slane %v1418_v52, 2  ;;  %v1456_v5 = vmul.f32 %v1454_v4, %v4762_v53 }
 0x10d   : > { %v1435_v47 = vsel %vm1239_vm3, %v1433_v51, %v1434_v37 }
 0x10e   : > { %v762_v58 = vadd.f32 %v4485_v62, %v741_v13  ;;  %v736_v63 = vpop.permute.xlu1 %735  ;;  %v734_v24 = vpop.permute.xlu0 %733  ;;  %v1394_v62 = vrot.slane %v1383_v25, 2  ;;  %v1432_v13 = vsel %vm1239_vm3, %v1430_v19, %v1431_v45  ;;  %v1458_v25 = vmul.f32 %v4889_v11, %v1454_v4 }
 0x10f   : > { %v738_v27 = vsel %vm713_vm7, %v734_v24, %v736_v63  ;;  %v1437_v63 = vsel %vm1239_vm3, %v1431_v45, %v1436_v28  ;;  %v1470_v24 = vrot.slane %v1456_v5, 2 }
 0x110   : > { %v4903_v17 = vadd.f32 %v4489_v29, %v762_v58  ;;  %v742_v3 = vadd.f32 %v738_v27, %v719_v40  ;;  %1368 = vrot.lane.b32.xlu1 %v1361_v42, %s7014_s30  ;;  %1366 = vrot.lane.b32.xlu0 %v1358_v44, %s7014_s30  ;;  %v1400_v60 = vsel %vm1239_vm3, %v1394_v62, %v1399_v39  ;;  %v1471_v7 = vrot.slane %v1458_v25, 2 }
 0x111   : > { %v1455_v42 = vmul.f32 %v1454_v4, %v4778_v20  ;;  %v1457_v44 = vmul.f32 %v4811_v9, %v1454_v4  ;;  %v1460_v40 = vmul.f32 %v1454_v4, %v4801_v57  ;;  %v1439_v58 = vsel %vm1239_vm3, %v1434_v37, %v1438_v43 }
 0x112   : > { %v763_v36 = vadd.f32 %v4496_v35, %v742_v3  ;;  %v4912_v29 = vpop.permute.xlu1 %809  ;;  %v4914_v15 = vpop.permute.xlu0 %807  ;;  %v1395_v35 = vsel %vm1239_vm3, %v1393_v16, %v1394_v62  ;;  %v1459_v27 = vmul.f32 %v1454_v4, %v4804_v14  ;;  %v1491_v3 = vstv %s282_s21  ;;  %s286_s21 = sld [smem:[#allocation2 + %s285_s20]]  ;;  %s291_s20 = sadd.s32 23, %s4195_s11 }
 0x113   : > { %v1467_v41 = vrot.slane %v1455_v42, 2  ;;  %v1468_v10 = vrot.slane %v1457_v44, 2  ;;  %v1493_v12 = vmul.f32 %v1491_v3, %v4703_v38  ;;  %v1495_v32 = vmul.f32 %v4852_v22, %v1491_v3 }
 0x114   : > { %v4918_v59 = vadd.f32 %v7017_v54, %v763_v36  ;;  %1372 = vrot.lane.b32.xlu1 %v1365_v21, %s7014_s30  ;;  %1370 = vrot.lane.b32.xlu0 %v1363_v1, %s7014_s30  ;;  %v1475_v21 = vrot.slane %v1460_v40, 2  ;;  %v1473_v1 = vrot.slane %v1459_v27, 2  ;;  %v1472_v36 = vsel %vm1239_vm3, %v1470_v24, %v1471_v7 }
 0x115   : > { %v1492_v48 = vmul.f32 %v1491_v3, %v4710_v23  ;;  %v1494_v54 = vmul.f32 %v4866_v55, %v1491_v3  ;;  %v1507_v52 = vrot.slane %v1493_v12, 2  ;;  %v1508_v56 = vrot.slane %v1495_v32, 2 }
 0x116   : > { %v4927_v8 = vpop.permute.xlu1 %813  ;;  %v4929_v26 = vpop.permute.xlu0 %811  ;;  %v1474_v39 = vsel %vm1239_vm3, %v1468_v10, %v1473_v1  ;;  %v1496_v30 = vmul.f32 %v1491_v3, %v4748_v0  ;;  %v1532_v43 = vmul.f32 %v4889_v11, %v1528_v33  ;;  %v1531_v25 = vmul.f32 %v4811_v9, %v1528_v33 }
 0x117   : > { %v1504_v51 = vrot.slane %v1492_v48, 2  ;;  %v1505_v37 = vrot.slane %v1494_v54, 2  ;;  %v1509_v45 = vsel %vm1239_vm3, %v1507_v52, %v1508_v56  ;;  %v1534_v40 = vmul.f32 %v1528_v33, %v4801_v57 }
 0x118   : > { %1405 = vrot.lane.b32.xlu1 %v1398_v31, %s7014_s30  ;;  %1403 = vrot.lane.b32.xlu0 %v1395_v35, %s7014_s30  ;;  %v1469_v31 = vsel %vm1239_vm3, %v1467_v41, %v1468_v10  ;;  %v1476_v35 = vsel %vm1239_vm3, %v1471_v7, %v1475_v21  ;;  %v1510_v5 = vrot.slane %v1496_v30, 2  ;;  %v1545_v24 = vrot.slane %v1532_v43, 2 }
 0x119   : > { %v1506_v28 = vsel %vm1239_vm3, %v1504_v51, %v1505_v37  ;;  %v1533_v27 = vmul.f32 %v1528_v33, %v4804_v14  ;;  %v1542_v10 = vrot.slane %v1531_v25, 2  ;;  %v1549_v12 = vrot.slane %v1534_v40, 2 }
 0x11a   : > { %v4938_v2 = vpop.permute.xlu1 %846  ;;  %v4940_v49 = vpop.permute.xlu0 %844  ;;  %v1511_v7 = vsel %vm1239_vm3, %v1505_v37, %v1510_v5  ;;  %v1602_v43 = vstv %s382_s1  ;;  %s5102_s1 = sld [smem:[#allocation2 + %s387_s6]]  ;;  %s391_s6 = sadd.s32 73, %s4195_s11 }
 0x11b   : > { %v1604_v40 = vmul.f32 %v1602_v43, %v4762_v53 }
 0x11c   : > { %1409 = vrot.lane.b32.xlu1 %v1402_v6, %s7014_s30  ;;  %1407 = vrot.lane.b32.xlu0 %v1400_v60, %s7014_s30  ;;  %v1497_v6 = vmul.f32 %v1491_v3, %v4740_v18  ;;  %v1565_v3 = vstv %s284_s7  ;;  %s290_s7 = sld [smem:[#allocation2 + %s289_s29]]  ;;  %s293_s29 = sadd.s32 24, %s4195_s11 }
 0x11d   : > { %v1569_v54 = vmul.f32 %v4852_v22, %v1565_v3  ;;  %v1571_v30 = vmul.f32 %v1565_v3, %v4740_v18 }
 0x11e   : > { %v4950_v61 = vpop.permute.xlu1 %850  ;;  %v4952_v34 = vpop.permute.xlu0 %848  ;;  %v1512_v4 = vrot.slane %v1497_v6, 2  ;;  %v1550_v6 = vsel %vm1239_vm3, %v1545_v24, %v1549_v12 }
 0x120   : > { %1442 = vrot.lane.b32.xlu1 %v1435_v47, %s4073_s4  ;;  %1440 = vrot.lane.b32.xlu0 %v1432_v13, %s4073_s4  ;;  %v1530_v47 = vmul.f32 %v1528_v33, %v4762_v53  ;;  %v1529_v13 = vmul.f32 %v1528_v33, %v4778_v20  ;;  %v1570_v33 = vmul.f32 %v1565_v3, %v4748_v0 }
 0x122   : > { %v4961_v16 = vpop.permute.xlu1 %883  ;;  %v4963_v62 = vpop.permute.xlu0 %881  ;;  %v1541_v41 = vrot.slane %v1529_v13, 2  ;;  %v1586_v13 = vrot.slane %v1571_v30, 2  ;;  %v1584_v25 = vrot.slane %v1570_v33, 2 }
 0x124   : > { %1446 = vrot.lane.b32.xlu1 %v1439_v58, %s4073_s4  ;;  %1444 = vrot.lane.b32.xlu0 %v1437_v63, %s4073_s4  ;;  %v1513_v58 = vsel %vm1239_vm3, %v1508_v56, %v1512_v4  ;;  %v1544_v63 = vrot.slane %v1530_v47, 2  ;;  %v1543_v48 = vsel %vm1239_vm3, %v1541_v41, %v1542_v10 }
 0x126   : > { %v4973_v46 = vpop.permute.xlu1 %887  ;;  %v4975_v50 = vpop.permute.xlu0 %885  ;;  %v1546_v32 = vsel %vm1239_vm3, %v1544_v63, %v1545_v24 }
 0x128   : > { %1479 = vrot.lane.b32.xlu1 %v1472_v36, %s4073_s4  ;;  %1477 = vrot.lane.b32.xlu0 %v1469_v31, %s4073_s4  ;;  %v1547_v36 = vrot.slane %v1533_v27, 2  ;;  %v1567_v31 = vmul.f32 %v1565_v3, %v4703_v38  ;;  %v1603_v27 = vmul.f32 %v1602_v43, %v4778_v20 }
 0x12a   : > { %v4984_v60 = vpop.permute.xlu1 %920  ;;  %v4986_v19 = vpop.permute.xlu0 %918  ;;  %v1548_v51 = vsel %vm1239_vm3, %v1542_v10, %v1547_v36  ;;  %v1581_v37 = vrot.slane %v1567_v31, 2  ;;  %v1618_v36 = vrot.slane %v1604_v40, 2 }
 0x12c   : > { %1483 = vrot.lane.b32.xlu1 %v1476_v35, %s4073_s4  ;;  %1481 = vrot.lane.b32.xlu0 %v1474_v39, %s4073_s4  ;;  %v1566_v35 = vmul.f32 %v1565_v3, %v4710_v23  ;;  %v1568_v39 = vmul.f32 %v4866_v55, %v1565_v3  ;;  %v1608_v3 = vmul.f32 %v1602_v43, %v4801_v57 }
 0x12e   : > { %v4996_v42 = vpop.permute.xlu1 %924  ;;  %v4998_v44 = vpop.permute.xlu0 %922  ;;  %v1578_v4 = vrot.slane %v1566_v35, 2  ;;  %v1579_v47 = vrot.slane %v1568_v39, 2  ;;  %v1607_v35 = vmul.f32 %v1602_v43, %v4804_v14  ;;  %v1639_v39 = vstv %s286_s21  ;;  %s292_s21 = sld [smem:[#allocation2 + %s291_s20]]  ;;  %s295_s20 = sadd.s32 25, %s4195_s11 }
 0x12f   : > { %v1641_v33 = vmul.f32 %v1639_v39, %v4703_v38 }
 0x130   : > { %1516 = vrot.lane.b32.xlu1 %v1509_v45, %s4074_s5  ;;  %1514 = vrot.lane.b32.xlu0 %v1506_v28, %s4074_s5  ;;  %v1582_v45 = vrot.slane %v1569_v54, 2  ;;  %v1580_v24 = vsel %vm1239_vm3, %v1578_v4, %v1579_v47 }
 0x131   : > { %v1655_v38 = vrot.slane %v1641_v33, 2 }
 0x132   : > { %v5007_v21 = vpop.permute.xlu1 %957  ;;  %v5009_v1 = vpop.permute.xlu0 %955  ;;  %v1583_v63 = vsel %vm1239_vm3, %v1581_v37, %v1582_v45  ;;  %v1587_v12 = vsel %vm1239_vm3, %v1582_v45, %v1586_v13  ;;  %v1623_v37 = vrot.slane %v1608_v3, 2  ;;  %v1643_v45 = vmul.f32 %v4852_v22, %v1639_v39 }
 0x133   : > { %v1642_v13 = vmul.f32 %v4866_v55, %v1639_v39 }
 0x134   : > { %1520 = vrot.lane.b32.xlu1 %v1513_v58, %s4074_s5  ;;  %1518 = vrot.lane.b32.xlu0 %v1511_v7, %s4074_s5  ;;  %v1606_v58 = vmul.f32 %v4889_v11, %v1602_v43  ;;  %v1605_v7 = vmul.f32 %v4811_v9, %v1602_v43  ;;  %v1640_v43 = vmul.f32 %v1639_v39, %v4710_v23 }
 0x135   : > { %v1653_v3 = vrot.slane %v1642_v13, 2 }
 0x136   : > { %v5019_v52 = vpop.permute.xlu1 %961  ;;  %v5021_v56 = vpop.permute.xlu0 %959  ;;  %v1619_v31 = vrot.slane %v1606_v58, 2  ;;  %v1616_v54 = vrot.slane %v1605_v7, 2  ;;  %v1652_v7 = vrot.slane %v1640_v43, 2 }
 0x138   : > { %1553 = vrot.lane.b32.xlu1 %v1546_v32, %s4074_s5  ;;  %1551 = vrot.lane.b32.xlu0 %v1543_v48, %s4074_s5  ;;  %v1585_v32 = vsel %vm1239_vm3, %v1579_v47, %v1584_v25  ;;  %v1615_v48 = vrot.slane %v1603_v27, 2  ;;  %v1620_v30 = vsel %vm1239_vm3, %v1618_v36, %v1619_v31  ;;  %v1621_v47 = vrot.slane %v1607_v35, 2 }
 0x139   : > { %v1624_v58 = vsel %vm1239_vm3, %v1619_v31, %v1623_v37  ;;  %v1644_v27 = vmul.f32 %v1639_v39, %v4748_v0 }
 0x13a   : > { %v5030_v28 = vpop.permute.xlu1 %994  ;;  %v5032_v5 = vpop.permute.xlu0 %992  ;;  %v1617_v4 = vsel %vm1239_vm3, %v1615_v48, %v1616_v54  ;;  %v1622_v23 = vsel %vm1239_vm3, %v1616_v54, %v1621_v47  ;;  %v1654_v54 = vsel %vm1239_vm3, %v1652_v7, %v1653_v3 }
 0x13b   : > { %v1658_v48 = vrot.slane %v1644_v27, 2  ;;  %v5109_v27 = vld [vmem:[%s4204_s10] sm:$0xf8] }
 0x13c   : > { %1557 = vrot.lane.b32.xlu1 %v1550_v6, %s4074_s5  ;;  %1555 = vrot.lane.b32.xlu0 %v1548_v51, %s4074_s5 }
 0x13e   : > { %v5042_v41 = vpop.permute.xlu1 %998  ;;  %v5044_v10 = vpop.permute.xlu0 %996 }
 0x140   : > { %1590 = vrot.lane.b32.xlu1 %v1583_v63, %s4075_s28  ;;  %1588 = vrot.lane.b32.xlu0 %v1580_v24, %s4075_s28  ;;  %v1656_v63 = vrot.slane %v1643_v45, 2  ;;  %v1645_v24 = vmul.f32 %v1639_v39, %v4740_v18 }
 0x142   : > { %v5053_v6 = vpop.permute.xlu1 %1031  ;;  %v5055_v51 = vpop.permute.xlu0 %1029  ;;  %v1657_v31 = vsel %vm1239_vm3, %v1655_v38, %v1656_v63  ;;  %v1660_v18 = vrot.slane %v1645_v24, 2  ;;  %v5100_v38 = vld [vmem:[%s4204_s10 + $0x8] sm:$0xf8]  ;;  %v1754_v24 = vstv %s290_s7  ;;  %s294_s7 = sld [smem:[#allocation2 + %s293_s29]]  ;;  %s297_s29 = sadd.s32 26, %s4195_s11 }
 0x143   : > { %v1756_v7 = vmul.f32 %v1754_v24, %v5100_v38 }
 0x144   : > { %1594 = vrot.lane.b32.xlu1 %v1587_v12, %s4075_s28  ;;  %1592 = vrot.lane.b32.xlu0 %v1585_v32, %s4075_s28  ;;  %v1676_v12 = vstv %s384_s25  ;;  %s390_s25 = sld [smem:[#allocation2 + %s389_s2]]  ;;  %s393_s2 = sadd.s32 74, %s4195_s11 }
 0x145   : > { %v1678_v0 = vmul.f32 %v1676_v12, %v4762_v53  ;;  %v1680_v35 = vmul.f32 %v4889_v11, %v1676_v12  ;;  %v1677_v39 = vmul.f32 %v1676_v12, %v4778_v20  ;;  %v1679_v37 = vmul.f32 %v4811_v9, %v1676_v12 }
 0x146   : > { %v5065_v25 = vpop.permute.xlu1 %1035  ;;  %v5067_v40 = vpop.permute.xlu0 %1033  ;;  %v1682_v45 = vmul.f32 %v1676_v12, %v4801_v57  ;;  %v1661_v53 = vsel %vm1239_vm3, %v1656_v63, %v1660_v18  ;;  %v1659_v20 = vsel %vm1239_vm3, %v1653_v3, %v1658_v48  ;;  %v1758_v3 = vmul.f32 %v4852_v22, %v1754_v24 }
 0x147   : > { %v1692_v47 = vrot.slane %v1678_v0, 2  ;;  %v1693_v43 = vrot.slane %v1680_v35, 2  ;;  %v1689_v13 = vrot.slane %v1677_v39, 2  ;;  %v1755_v18 = vmul.f32 %v1754_v24, %v5109_v27  ;;  %v5120_v0 = vld [vmem:[%s4204_s10 + $0x28] sm:$0x7] }
 0x148   : > { %1627 = vrot.lane.b32.xlu1 %v1620_v30, %s4075_s28  ;;  %1625 = vrot.lane.b32.xlu0 %v1617_v4, %s4075_s28  ;;  %v1681_v4 = vmul.f32 %v1676_v12, %v4804_v14  ;;  %v1697_v63 = vrot.slane %v1682_v45, 2  ;;  %v1757_v48 = vmul.f32 %v4866_v55, %v1754_v24  ;;  %v5127_v39 = vld [vmem:[%s4204_s10 + $0x20] sm:$0x7] }
 0x149   : > { %v1694_v12 = vsel %vm1239_vm3, %v1692_v47, %v1693_v43  ;;  %v1767_v47 = vrot.slane %v1755_v18, 3 }
 0x14a   : > { %v5076_v32 = vpop.permute.xlu1 %1068  ;;  %v5078_v36 = vpop.permute.xlu0 %1066 }
 0x14b   : > { %7018 = vst [vmem:[#allocation8_spill] sm:$0xff] %v5076_v32  ;;  %7019 = vst [vmem:[#allocation9_spill] sm:$0xff] %v5078_v36 }
 0x14c   : > { %1631 = vrot.lane.b32.xlu1 %v1624_v58, %s4075_s28  ;;  %1629 = vrot.lane.b32.xlu0 %v1622_v23, %s4075_s28  ;;  %v1690_v58 = vrot.slane %v1679_v37, 2  ;;  %v1695_v23 = vrot.slane %v1681_v4, 2  ;;  %v1698_v37 = vsel %vm1239_vm3, %v1693_v43, %v1697_v63  ;;  %v1770_v4 = vrot.slane %v1756_v7, 3 }
 0x14d   : > { %v1791_v43 = vstv %s5102_s1  ;;  %s392_s1 = sld [smem:[#allocation2 + %s391_s6]]  ;;  %s395_s6 = sadd.s32 75, %s4195_s11 }
 0x14e   : > { %v5088_v30 = vpop.permute.xlu1 %1072  ;;  %v5090_v33 = vpop.permute.xlu0 %1070  ;;  %v1696_v45 = vsel %vm1239_vm3, %v1690_v58, %v1695_v23  ;;  %v5145_v23 = vld [vmem:[%s4223_s24] sm:$0xf8] }
 0x14f   : > { %7020 = vst [vmem:[#allocation10_spill] sm:$0xff] %v5088_v30  ;;  %7021 = vst [vmem:[#allocation11_spill] sm:$0xff] %v5090_v33 }
 0x150   : > { %1664 = vrot.lane.b32.xlu1 %v1657_v31, %s4076_s9  ;;  %1662 = vrot.lane.b32.xlu0 %v1654_v54, %s4076_s9  ;;  %v1691_v31 = vsel %vm1239_vm3, %v1689_v13, %v1690_v58  ;;  %v1768_v13 = vrot.slane %v1757_v48, 3 }
 0x152   : > { %v5104_v57 = vpop.permute.xlu1 %1105  ;;  %v5106_v14 = vpop.permute.xlu0 %1103  ;;  %v1769_v18 = vsel %vm1724_vm8, %v1767_v47, %v1768_v13 }
 0x153   : > { %7022 = vst [vmem:[#allocation12_spill] sm:$0xff] %v5104_v57  ;;  %7023 = vst [vmem:[#allocation13_spill] sm:$0xff] %v5106_v14  ;;  %v5159_v14 = vld [vmem:[%s4223_s24 + $0x20] sm:$0x7] }
 0x154   : > { %1668 = vrot.lane.b32.xlu1 %v1661_v53, %s4076_s9  ;;  %1666 = vrot.lane.b32.xlu0 %v1659_v20, %s4076_s9  ;;  %v1771_v53 = vrot.slane %v1758_v3, 3  ;;  %v1760_v20 = vmul.f32 %v1754_v24, %v5120_v0  ;;  %v1796_v57 = vmul.f32 %v1791_v43, %v5159_v14 }
 0x156   : > { %v5122_v54 = vpop.permute.xlu1 %1109  ;;  %v5124_v35 = vpop.permute.xlu0 %1107  ;;  %v1772_v7 = vsel %vm1724_vm8, %v1770_v4, %v1771_v53  ;;  %v1775_v3 = vrot.slane %v1760_v20, 3 }
 0x157   : > { %7024 = vst [vmem:[#allocation14_spill] sm:$0xff] %v5122_v54  ;;  %7025 = vst [vmem:[#allocation15_spill] sm:$0xff] %v5124_v35  ;;  %v1759_v35 = vmul.f32 %v1754_v24, %v5127_v39  ;;  %v5137_v54 = vld [vmem:[%s4223_s24 + $0x8] sm:$0xf8] }
 0x158   : > { %1701 = vrot.lane.b32.xlu1 %v1694_v12, %s4076_s9  ;;  %1699 = vrot.lane.b32.xlu0 %v1691_v31, %s4076_s9  ;;  %v1793_v24 = vmul.f32 %v1791_v43, %v5137_v54  ;;  %v1795_v12 = vmul.f32 %v4889_v11, %v1791_v43  ;;  %v5153_v31 = vld [vmem:[%s4223_s24 + $0x28] sm:$0x7]  ;;  %v1776_v20 = vsel %vm1724_vm8, %v1771_v53, %v1775_v3  ;;  %v1810_v3 = vrot.slane %v1796_v57, 3 }
 0x159   : > { %v1773_v48 = vrot.slane %v1759_v35, 3  ;;  %v1797_v4 = vmul.f32 %v1791_v43, %v5153_v31 }
 0x15a   : > { %v5140_v58 = vpop.permute.xlu1 %1142  ;;  %v5142_v63 = vpop.permute.xlu0 %1140  ;;  %v1807_v35 = vrot.slane %v1793_v24, 3  ;;  %v1808_v47 = vrot.slane %v1795_v12, 3 }
 0x15b   : > { %7026 = vst [vmem:[#allocation16_spill] sm:$0xff] %v5140_v58  ;;  %7027 = vst [vmem:[#allocation17_spill] sm:$0xff] %v5142_v63  ;;  %v1792_v63 = vmul.f32 %v1791_v43, %v5145_v23  ;;  %v1794_v58 = vmul.f32 %v4811_v9, %v1791_v43  ;;  %v1774_v33 = vsel %vm1724_vm8, %v1768_v13, %v1773_v48 }
 0x15c   : > { %1705 = vrot.lane.b32.xlu1 %v1698_v37, %s4076_s9  ;;  %1703 = vrot.lane.b32.xlu0 %v1696_v45, %s4076_s9  ;;  %v1809_v53 = vsel %vm1724_vm8, %v1807_v35, %v1808_v47 }
 0x15d   : > { %v1804_v30 = vrot.slane %v1792_v63, 3  ;;  %v1805_v36 = vrot.slane %v1794_v58, 3 }
 0x15e   : > { %v5161_v37 = vpop.permute.xlu1 %1146  ;;  %v5163_v45 = vpop.permute.xlu0 %1144 }
 0x15f   : > { %7028 = vst [vmem:[#allocation18_spill] sm:$0xff] %v5161_v37  ;;  %7029 = vst [vmem:[#allocation19_spill] sm:$0xff] %v5163_v45  ;;  %v1828_v37 = vstv %s292_s21  ;;  %v1806_v13 = vsel %vm1724_vm8, %v1804_v30, %v1805_v36  ;;  %v1811_v57 = vsel %vm1724_vm8, %v1805_v36, %v1810_v3  ;;  %s296_s21 = sld [smem:[#allocation2 + %s295_s20]]  ;;  %s299_s20 = sadd.s32 27, %s4195_s11 }
 0x160   : > { %1779 = vrot.lane.b32.xlu1 %v1772_v7, %s7013_s0  ;;  %1777 = vrot.lane.b32.xlu0 %v1769_v18, %s7013_s0  ;;  %v1812_v7 = vrot.slane %v1797_v4, 3  ;;  %v1830_v43 = vmul.f32 %v1828_v37, %v5100_v38  ;;  %v1832_v58 = vmul.f32 %v4852_v22, %v1828_v37  ;;  %v1829_v63 = vmul.f32 %v1828_v37, %v5109_v27 }
 0x161   : > { %v1831_v24 = vmul.f32 %v4866_v55, %v1828_v37  ;;  %v1834_v48 = vmul.f32 %v1828_v37, %v5120_v0  ;;  %v1833_v4 = vmul.f32 %v1828_v37, %v5127_v39 }
 0x162   : > { %v5172_v45 = vpop.permute.xlu1 %1179  ;;  %v5174_v32 = vpop.permute.xlu0 %1177  ;;  %v1844_v30 = vrot.slane %v1830_v43, 3  ;;  %v1841_v35 = vrot.slane %v1829_v63, 3 }
 0x163   : > { %7030 = vst [vmem:[#allocation20_spill] sm:$0xff] %v5172_v45  ;;  %7031 = vst [vmem:[#allocation21_spill] sm:$0xff] %v5174_v32  ;;  %v1842_v32 = vrot.slane %v1831_v24, 3  ;;  %v1849_v36 = vrot.slane %v1834_v48, 3 }
 0x164   : > { %1783 = vrot.lane.b32.xlu1 %v1776_v20, %s7013_s0  ;;  %1781 = vrot.lane.b32.xlu0 %v1774_v33, %s7013_s0  ;;  %v1813_v33 = vsel %vm1724_vm8, %v1808_v47, %v1812_v7  ;;  %v1845_v20 = vrot.slane %v1832_v58, 3  ;;  %v1847_v7 = vrot.slane %v1833_v4, 3 }
 0x165   : > { %v1843_v43 = vsel %vm1724_vm8, %v1841_v35, %v1842_v32 }
 0x166   : > { %v5184_v12 = vpop.permute.xlu1 %1183  ;;  %v5186_v18 = vpop.permute.xlu0 %1181  ;;  %v1846_v3 = vsel %vm1724_vm8, %v1844_v30, %v1845_v20  ;;  %v1848_v30 = vsel %vm1724_vm8, %v1842_v32, %v1847_v7 }
 0x167   : > { %7032 = vst [vmem:[#allocation22_spill] sm:$0xff] %v5184_v12  ;;  %7033 = vst [vmem:[#allocation23_spill] sm:$0xff] %v5186_v18  ;;  %v1865_v12 = vstv %s390_s25  ;;  %s394_s25 = sld [smem:[#allocation2 + %s393_s2]]  ;;  %s397_s2 = sadd.s32 76, %s4195_s11 }
 0x168   : > { %1816 = vrot.lane.b32.xlu1 %v1809_v53, %s7013_s0  ;;  %1814 = vrot.lane.b32.xlu0 %v1806_v13, %s7013_s0  ;;  %v1867_v53 = vmul.f32 %v1865_v12, %v5137_v54  ;;  %v1869_v37 = vmul.f32 %v4889_v11, %v1865_v12  ;;  %v1866_v13 = vmul.f32 %v1865_v12, %v5145_v23 }
 0x169   : > { %v1868_v58 = vmul.f32 %v4811_v9, %v1865_v12 }
 0x16a   : > { %v5195_v18 = vpop.permute.xlu1 %1216  ;;  %v5197_v47 = vpop.permute.xlu0 %1214  ;;  %v1881_v48 = vrot.slane %v1867_v53, 3  ;;  %v1882_v4 = vrot.slane %v1869_v37, 3  ;;  %v1878_v35 = vrot.slane %v1866_v13, 3 }
 0x16b   : > { %7034 = vst [vmem:[#allocation24_spill] sm:$0xff] %v5195_v18  ;;  %7035 = vst [vmem:[#allocation25_spill] sm:$0xff] %v5197_v47  ;;  %v1879_v47 = vrot.slane %v1868_v58, 3  ;;  %v1870_v18 = vmul.f32 %v1865_v12, %v5159_v14 }
 0x16c   : > { %1820 = vrot.lane.b32.xlu1 %v1813_v33, %s7013_s0  ;;  %1818 = vrot.lane.b32.xlu0 %v1811_v57, %s7013_s0  ;;  %v1871_v33 = vmul.f32 %v1865_v12, %v5153_v31  ;;  %v1850_v57 = vsel %vm1724_vm8, %v1845_v20, %v1849_v36  ;;  %v1883_v32 = vsel %vm1724_vm8, %v1881_v48, %v1882_v4 }
 0x16d   : > { %v1880_v12 = vsel %vm1724_vm8, %v1878_v35, %v1879_v47  ;;  %v1884_v7 = vrot.slane %v1870_v18, 3 }
 0x16e   : > { %v5207_v63 = vpop.permute.xlu1 %1220  ;;  %v5209_v24 = vpop.permute.xlu0 %1218 }
 0x16f   : > { %7036 = vst [vmem:[#allocation26_spill] sm:$0xff] %v5207_v63  ;;  %7037 = vst [vmem:[#allocation27_spill] sm:$0xff] %v5209_v24  ;;  %v1902_v63 = vstv %s294_s7  ;;  %v1885_v48 = vsel %vm1724_vm8, %v1879_v47, %v1884_v7  ;;  %s298_s7 = sld [smem:[#allocation2 + %s297_s29]]  ;;  %s303_s29 = sadd.s32 29, %s4195_s11 }
 0x170   : > { %1853 = vrot.lane.b32.xlu1 %v1846_v3, %s7014_s30  ;;  %1851 = vrot.lane.b32.xlu0 %v1843_v43, %s7014_s30  ;;  %v1886_v3 = vrot.slane %v1871_v33, 3  ;;  %v1904_v20 = vmul.f32 %v1902_v63, %v5100_v38  ;;  %v1906_v36 = vmul.f32 %v4852_v22, %v1902_v63  ;;  %v1903_v53 = vmul.f32 %v1902_v63, %v5109_v27 }
 0x171   : > { %v1905_v37 = vmul.f32 %v4866_v55, %v1902_v63  ;;  %v1907_v18 = vmul.f32 %v1902_v63, %v5127_v39 }
 0x172   : > { %v5218_v24 = vpop.permute.xlu1 %1294  ;;  %v5220_v45 = vpop.permute.xlu0 %1292  ;;  %v1887_v58 = vsel %vm1724_vm8, %v1882_v4, %v1886_v3  ;;  %v1918_v33 = vrot.slane %v1904_v20, 3  ;;  %v1915_v35 = vrot.slane %v1903_v53, 3 }
 0x173   : > { %7038 = vst [vmem:[#allocation28_spill] sm:$0xff] %v5218_v24  ;;  %7039 = vst [vmem:[#allocation29_spill] sm:$0xff] %v5220_v45  ;;  %v1916_v45 = vrot.slane %v1905_v37, 3  ;;  %v1921_v20 = vrot.slane %v1907_v18, 3 }
 0x174   : > { %1857 = vrot.lane.b32.xlu1 %v1850_v57, %s7014_s30  ;;  %1855 = vrot.lane.b32.xlu0 %v1848_v30, %s7014_s30  ;;  %v1919_v57 = vrot.slane %v1906_v36, 3  ;;  %v1908_v30 = vmul.f32 %v1902_v63, %v5120_v0 }
 0x175   : > { %v1917_v47 = vsel %vm1724_vm8, %v1915_v35, %v1916_v45 }
 0x176   : > { %v5230_v43 = vpop.permute.xlu1 %1298  ;;  %v5232_v13 = vpop.permute.xlu0 %1296  ;;  %v1920_v3 = vsel %vm1724_vm8, %v1918_v33, %v1919_v57 }
 0x177   : > { %7040 = vst [vmem:[#allocation30_spill] sm:$0xff] %v5230_v43  ;;  %7041 = vst [vmem:[#allocation31_spill] sm:$0xff] %v5232_v13  ;;  %v1939_v43 = vstv %s392_s1  ;;  %s396_s1 = sld [smem:[#allocation2 + %s395_s6]]  ;;  %s401_s6 = sadd.s32 78, %s4195_s11 }
 0x178   : > { %1890 = vrot.lane.b32.xlu1 %v1883_v32, %s7014_s30  ;;  %1888 = vrot.lane.b32.xlu0 %v1880_v12, %s7014_s30  ;;  %v1923_v32 = vrot.slane %v1908_v30, 3  ;;  %v1941_v63 = vmul.f32 %v1939_v43, %v5137_v54  ;;  %v1943_v36 = vmul.f32 %v4889_v11, %v1939_v43  ;;  %v1940_v12 = vmul.f32 %v1939_v43, %v5145_v23 }
 0x179   : > { %v1942_v7 = vmul.f32 %v4811_v9, %v1939_v43  ;;  %v1922_v30 = vsel %vm1724_vm8, %v1916_v45, %v1921_v20 }
 0x17a   : > { %v5241_v13 = vpop.permute.xlu1 %1331  ;;  %v5243_v4 = vpop.permute.xlu0 %1329  ;;  %v1924_v33 = vsel %vm1724_vm8, %v1919_v57, %v1923_v32  ;;  %v1955_v18 = vrot.slane %v1941_v63, 3  ;;  %v1956_v35 = vrot.slane %v1943_v36, 3  ;;  %v1952_v9 = vrot.slane %v1940_v12, 3 }
 0x17b   : > { %7042 = vst [vmem:[#allocation32_spill] sm:$0xff] %v5241_v13  ;;  %7043 = vst [vmem:[#allocation33_spill] sm:$0xff] %v5243_v4  ;;  %v1953_v4 = vrot.slane %v1942_v7, 3 }
 0x17c   : > { %1894 = vrot.lane.b32.xlu1 %v1887_v58, %s7014_s30  ;;  %1892 = vrot.lane.b32.xlu0 %v1885_v48, %s7014_s30  ;;  %v1945_v58 = vmul.f32 %v1939_v43, %v5153_v31  ;;  %v1944_v48 = vmul.f32 %v1939_v43, %v5159_v14  ;;  %v1957_v32 = vsel %vm1724_vm8, %v1955_v18, %v1956_v35 }
 0x17d   : > { %v1954_v20 = vsel %vm1724_vm8, %v1952_v9, %v1953_v4  ;;  %v2013_v9 = vstv %s394_s25  ;;  %s398_s25 = sld [smem:[#allocation2 + %s397_s2]]  ;;  %s403_s2 = sadd.s32 79, %s4195_s11 }
 0x17e   : > { %v5253_v53 = vpop.permute.xlu1 %1335  ;;  %v5255_v37 = vpop.permute.xlu0 %1333  ;;  %v1958_v57 = vrot.slane %v1944_v48, 3 }
 0x17f   : > { %7044 = vst [vmem:[#allocation34_spill] sm:$0xff] %v5253_v53  ;;  %7045 = vst [vmem:[#allocation35_spill] sm:$0xff] %v5255_v37  ;;  %v1976_v53 = vstv %s296_s21  ;;  %s300_s21 = sld [smem:[#allocation2 + %s299_s20]]  ;;  %s305_s20 = sadd.s32 30, %s4195_s11 }
 0x180   : > { %1927 = vrot.lane.b32.xlu1 %v1920_v3, %s4073_s4  ;;  %1925 = vrot.lane.b32.xlu0 %v1917_v47, %s4073_s4  ;;  %v1960_v3 = vrot.slane %v1945_v58, 3  ;;  %v1978_v45 = vmul.f32 %v1976_v53, %v5100_v38  ;;  %v1980_v43 = vmul.f32 %v4852_v22, %v1976_v53  ;;  %v1977_v63 = vmul.f32 %v1976_v53, %v5109_v27 }
 0x181   : > { %v1979_v47 = vmul.f32 %v4866_v55, %v1976_v53  ;;  %v1959_v22 = vsel %vm1724_vm8, %v1953_v4, %v1958_v57  ;;  %v1981_v48 = vmul.f32 %v1976_v53, %v5127_v39  ;;  %v2015_v57 = vmul.f32 %v2013_v9, %v5137_v54 }
 0x182   : > { %v5264_v37 = vpop.permute.xlu1 %1368  ;;  %v5266_v13 = vpop.permute.xlu0 %1366  ;;  %v1961_v7 = vsel %vm1724_vm8, %v1956_v35, %v1960_v3  ;;  %v1992_v58 = vrot.slane %v1978_v45, 3  ;;  %v1989_v18 = vrot.slane %v1977_v63, 3  ;;  %v2017_v45 = vmul.f32 %v4889_v11, %v2013_v9 }
 0x183   : > { %7046 = vst [vmem:[#allocation36_spill] sm:$0xff] %v5264_v37  ;;  %7047 = vst [vmem:[#allocation37_spill] sm:$0xff] %v5266_v13  ;;  %v1990_v55 = vrot.slane %v1979_v47, 3 }
 0x184   : > { %1931 = vrot.lane.b32.xlu1 %v1924_v33, %s4073_s4  ;;  %1929 = vrot.lane.b32.xlu0 %v1922_v30, %s4073_s4  ;;  %v1993_v33 = vrot.slane %v1980_v43, 3  ;;  %v1982_v30 = vmul.f32 %v1976_v53, %v5120_v0  ;;  %v1995_v43 = vrot.slane %v1981_v48, 3  ;;  %v2018_v48 = vmul.f32 %v2013_v9, %v5159_v14 }
 0x185   : > { %v1991_v53 = vsel %vm1724_vm8, %v1989_v18, %v1990_v55  ;;  %v2030_v18 = vrot.slane %v2017_v45, 3 }
 0x186   : > { %v5276_v36 = vpop.permute.xlu1 %1372  ;;  %v5278_v12 = vpop.permute.xlu0 %1370  ;;  %v1994_v4 = vsel %vm1724_vm8, %v1992_v58, %v1993_v33  ;;  %v1997_v3 = vrot.slane %v1982_v30, 3  ;;  %v2029_v30 = vrot.slane %v2015_v57, 3  ;;  %v5323_v57 = vld [vmem:[%s4204_s10 + $0x18] sm:$0xff] }
 0x187   : > { %7048 = vst [vmem:[#allocation38_spill] sm:$0xff] %v5276_v36  ;;  %7049 = vst [vmem:[#allocation39_spill] sm:$0xff] %v5278_v12 }
 0x188   : > { %1964 = vrot.lane.b32.xlu1 %v1957_v32, %s4073_s4  ;;  %1962 = vrot.lane.b32.xlu0 %v1954_v20, %s4073_s4  ;;  %v2014_v32 = vmul.f32 %v2013_v9, %v5145_v23  ;;  %v5299_v20 = vld [vmem:[%s4223_s24 + $0x10] sm:$0xff]  ;;  %v1998_v58 = vsel %vm1724_vm8, %v1993_v33, %v1997_v3  ;;  %v2031_v33 = vsel %vm1724_vm8, %v2029_v30, %v2030_v18 }
 0x189   : > { %v2016_v63 = vmul.f32 %v5299_v20, %v2013_v9 }
 0x18a   : > { %v5287_v12 = vpop.permute.xlu1 %1405  ;;  %v5289_v35 = vpop.permute.xlu0 %1403 }
 0x18b   : > { %7050 = vst [vmem:[#allocation40_spill] sm:$0xff] %v5287_v12  ;;  %7051 = vst [vmem:[#allocation41_spill] sm:$0xff] %v5289_v35  ;;  %v1996_v35 = vsel %vm1724_vm8, %v1990_v55, %v1995_v43  ;;  %v2026_v12 = vrot.slane %v2014_v32, 3  ;;  %v5328_v32 = vld [vmem:[%s4204_s10 + $0x10] sm:$0xff] }
 0x18c   : > { %1968 = vrot.lane.b32.xlu1 %v1961_v7, %s4073_s4  ;;  %1966 = vrot.lane.b32.xlu0 %v1959_v22, %s4073_s4  ;;  %v2019_v22 = vmul.f32 %v2013_v9, %v5153_v31  ;;  %v2032_v9 = vrot.slane %v2018_v48, 3 }
 0x18e   : > { %v5302_v47 = vpop.permute.xlu1 %1409  ;;  %v5304_v7 = vpop.permute.xlu0 %1407 }
 0x18f   : > { %7052 = vst [vmem:[#allocation42_spill] sm:$0xff] %v5302_v47  ;;  %7053 = vst [vmem:[#allocation43_spill] sm:$0xff] %v5304_v7  ;;  %v2027_v47 = vrot.slane %v2016_v63, 3  ;;  %v2050_v7 = vstv %s298_s7  ;;  %s304_s7 = sld [smem:[#allocation2 + %s303_s29]]  ;;  %s307_s29 = sadd.s32 31, %s4195_s11 }
 0x190   : > { %2001 = vrot.lane.b32.xlu1 %v1994_v4, %s4074_s5  ;;  %1999 = vrot.lane.b32.xlu0 %v1991_v53, %s4074_s5  ;;  %v2034_v53 = vrot.slane %v2019_v22, 3  ;;  %v2052_v55 = vmul.f32 %v2050_v7, %v5100_v38  ;;  %v2054_v45 = vmul.f32 %v5323_v57, %v2050_v7  ;;  %v2051_v43 = vmul.f32 %v2050_v7, %v5109_v27 }
 0x191   : > { %v2028_v3 = vsel %vm1724_vm8, %v2026_v12, %v2027_v47  ;;  %v2053_v63 = vmul.f32 %v5328_v32, %v2050_v7  ;;  %v2033_v12 = vsel %vm1724_vm8, %v2027_v47, %v2032_v9  ;;  %v2056_v48 = vmul.f32 %v2050_v7, %v5120_v0 }
 0x192   : > { %v5313_v36 = vpop.permute.xlu1 %1442  ;;  %v5315_v4 = vpop.permute.xlu0 %1440  ;;  %v2066_v30 = vrot.slane %v2052_v55, 3  ;;  %v2063_v13 = vrot.slane %v2051_v43, 3 }
 0x193   : > { %7054 = vst [vmem:[#allocation44_spill] sm:$0xff] %v5313_v36  ;;  %7055 = vst [vmem:[#allocation45_spill] sm:$0xff] %v5315_v4  ;;  %v2055_v4 = vmul.f32 %v2050_v7, %v5127_v39  ;;  %v2067_v36 = vrot.slane %v2054_v45, 3  ;;  %v2064_v37 = vrot.slane %v2053_v63, 3  ;;  %v2071_v47 = vrot.slane %v2056_v48, 3 }
 0x194   : > { %2005 = vrot.lane.b32.xlu1 %v1998_v58, %s4074_s5  ;;  %2003 = vrot.lane.b32.xlu0 %v1996_v35, %s4074_s5  ;;  %v2035_v58 = vsel %vm1724_vm8, %v2030_v18, %v2034_v53 }
 0x195   : > { %v2069_v53 = vrot.slane %v2055_v4, 3  ;;  %v2068_v9 = vsel %vm1724_vm8, %v2066_v30, %v2067_v36  ;;  %v2065_v55 = vsel %vm1724_vm8, %v2063_v13, %v2064_v37 }
 0x196   : > { %v5331_v22 = vpop.permute.xlu1 %1446  ;;  %v5333_v35 = vpop.permute.xlu0 %1444 }
 0x197   : > { %7056 = vst [vmem:[#allocation46_spill] sm:$0xff] %v5331_v22  ;;  %7057 = vst [vmem:[#allocation47_spill] sm:$0xff] %v5333_v35  ;;  %v2087_v22 = vstv %s396_s1  ;;  %v2070_v4 = vsel %vm1724_vm8, %v2064_v37, %v2069_v53  ;;  %s5417_s1 = sld [smem:[#allocation2 + %s401_s6]]  ;;  %s405_s6 = sadd.s32 80, %s4195_s11 }
 0x198   : > { %2038 = vrot.lane.b32.xlu1 %v2031_v33, %s4074_s5  ;;  %2036 = vrot.lane.b32.xlu0 %v2028_v3, %s4074_s5  ;;  %v2089_v33 = vmul.f32 %v2087_v22, %v5137_v54  ;;  %v2091_v7 = vmul.f32 %v4889_v11, %v2087_v22  ;;  %v2088_v3 = vmul.f32 %v2087_v22, %v5145_v23 }
 0x199   : > { %v2090_v45 = vmul.f32 %v5299_v20, %v2087_v22  ;;  %v2072_v11 = vsel %vm1724_vm8, %v2067_v36, %v2071_v47 }
 0x19a   : > { %v5342_v35 = vpop.permute.xlu1 %1479  ;;  %v5344_v18 = vpop.permute.xlu0 %1477  ;;  %v2103_v13 = vrot.slane %v2089_v33, 3  ;;  %v2100_v30 = vrot.slane %v2088_v3, 3 }
 0x19b   : > { %7058 = vst [vmem:[#allocation48_spill] sm:$0xff] %v5342_v35  ;;  %7059 = vst [vmem:[#allocation49_spill] sm:$0xff] %v5344_v18  ;;  %v2101_v48 = vrot.slane %v2090_v45, 3  ;;  %v2092_v18 = vmul.f32 %v2087_v22, %v5159_v14 }
 0x19c   : > { %2042 = vrot.lane.b32.xlu1 %v2035_v58, %s4074_s5  ;;  %2040 = vrot.lane.b32.xlu0 %v2033_v12, %s4074_s5  ;;  %v2093_v58 = vmul.f32 %v2087_v22, %v5153_v31  ;;  %v2104_v12 = vrot.slane %v2091_v7, 3 }
 0x19d   : > { %v2102_v22 = vsel %vm1724_vm8, %v2100_v30, %v2101_v48  ;;  %v2106_v53 = vrot.slane %v2092_v18, 3  ;;  %v2161_v30 = vstv %s398_s25  ;;  %s404_s25 = sld [smem:[#allocation2 + %s403_s2]]  ;;  %s407_s2 = sadd.s32 81, %s4195_s11 }
 0x19e   : > { %v5354_v43 = vpop.permute.xlu1 %1483  ;;  %v5356_v63 = vpop.permute.xlu0 %1481  ;;  %v2105_v37 = vsel %vm1724_vm8, %v2103_v13, %v2104_v12 }
 0x19f   : > { %7060 = vst [vmem:[#allocation50_spill] sm:$0xff] %v5354_v43  ;;  %7061 = vst [vmem:[#allocation51_spill] sm:$0xff] %v5356_v63  ;;  %v2124_v43 = vstv %s300_s21  ;;  %v2107_v18 = vsel %vm1724_vm8, %v2101_v48, %v2106_v53  ;;  %v5398_v48 = vld [vmem:[%s4223_s24 + $0x18] sm:$0xff]  ;;  %s306_s21 = sld [smem:[#allocation2 + %s305_s20]]  ;;  %s309_s20 = sadd.s32 32, %s4195_s11 }
 0x1a0   : > { %2075 = vrot.lane.b32.xlu1 %v2068_v9, %s4075_s28  ;;  %2073 = vrot.lane.b32.xlu0 %v2065_v55, %s4075_s28  ;;  %v2108_v9 = vrot.slane %v2093_v58, 3  ;;  %v2126_v36 = vmul.f32 %v2124_v43, %v5100_v38  ;;  %v2128_v47 = vmul.f32 %v5323_v57, %v2124_v43  ;;  %v2125_v33 = vmul.f32 %v2124_v43, %v5109_v27 }
 0x1a1   : > { %v2127_v7 = vmul.f32 %v5328_v32, %v2124_v43  ;;  %v2129_v27 = vmul.f32 %v2124_v43, %v5127_v39  ;;  %v2163_v39 = vmul.f32 %v2161_v30, %v5137_v54  ;;  %v2166_v54 = vmul.f32 %v2161_v30, %v5159_v14 }
 0x1a2   : > { %v5365_v63 = vpop.permute.xlu1 %1516  ;;  %v5367_v35 = vpop.permute.xlu0 %1514  ;;  %v2109_v45 = vsel %vm1724_vm8, %v2104_v12, %v2108_v9  ;;  %v2140_v38 = vrot.slane %v2126_v36, 3  ;;  %v2141_v58 = vrot.slane %v2128_v47, 3  ;;  %v2165_v36 = vmul.f32 %v5398_v48, %v2161_v30 }
 0x1a3   : > { %7062 = vst [vmem:[#allocation52_spill] sm:$0xff] %v5365_v63  ;;  %7063 = vst [vmem:[#allocation53_spill] sm:$0xff] %v5367_v35  ;;  %v2138_v13 = vrot.slane %v2127_v7, 3  ;;  %v2162_v47 = vmul.f32 %v2161_v30, %v5145_v23  ;;  %v2167_v7 = vmul.f32 %v2161_v30, %v5153_v31 }
 0x1a4   : > { %2079 = vrot.lane.b32.xlu1 %v2072_v11, %s4075_s28  ;;  %2077 = vrot.lane.b32.xlu0 %v2070_v4, %s4075_s28  ;;  %v2130_v11 = vmul.f32 %v2124_v43, %v5120_v0  ;;  %v2137_v4 = vrot.slane %v2125_v33, 3  ;;  %v2142_v0 = vsel %vm1724_vm8, %v2140_v38, %v2141_v58  ;;  %v2177_v38 = vrot.slane %v2163_v39, 3 }
 0x1a6   : > { %v5377_v55 = vpop.permute.xlu1 %1520  ;;  %v5379_v3 = vpop.permute.xlu0 %1518  ;;  %v2145_v9 = vrot.slane %v2130_v11, 3  ;;  %v2139_v43 = vsel %vm1724_vm8, %v2137_v4, %v2138_v13  ;;  %v2178_v11 = vrot.slane %v2165_v36, 3  ;;  %v5415_v4 = vld [vmem:[%s4204_s10 + $0x8] sm:$0xf0] }
 0x1a7   : > { %7064 = vst [vmem:[#allocation54_spill] sm:$0xff] %v5377_v55  ;;  %7065 = vst [vmem:[#allocation55_spill] sm:$0xff] %v5379_v3 }
 0x1a8   : > { %2112 = vrot.lane.b32.xlu1 %v2105_v37, %s4075_s28  ;;  %2110 = vrot.lane.b32.xlu0 %v2102_v22, %s4075_s28  ;;  %v2143_v37 = vrot.slane %v2129_v27, 3  ;;  %v2164_v22 = vmul.f32 %v5299_v20, %v2161_v30  ;;  %v2174_v27 = vrot.slane %v2162_v47, 3  ;;  %v5424_v30 = vld [vmem:[%s4204_s10] sm:$0xf0]  ;;  %v5435_v47 = vld [vmem:[%s4204_s10 + $0x28] sm:$0xf] }
 0x1aa   : > { %v5388_v3 = vpop.permute.xlu1 %1553  ;;  %v5390_v12 = vpop.permute.xlu0 %1551  ;;  %v2144_v23 = vsel %vm1724_vm8, %v2138_v13, %v2143_v37  ;;  %v2180_v13 = vrot.slane %v2166_v54, 3  ;;  %v2179_v37 = vsel %vm1724_vm8, %v2177_v38, %v2178_v11  ;;  %v5442_v54 = vld [vmem:[%s4204_s10 + $0x20] sm:$0xf] }
 0x1ab   : > { %7066 = vst [vmem:[#allocation56_spill] sm:$0xff] %v5388_v3  ;;  %7067 = vst [vmem:[#allocation57_spill] sm:$0xff] %v5390_v12  ;;  %v5474_v12 = vld [vmem:[%s4223_s24 + $0x20] sm:$0xf] }
 0x1ac   : > { %2116 = vrot.lane.b32.xlu1 %v2109_v45, %s4075_s28  ;;  %2114 = vrot.lane.b32.xlu0 %v2107_v18, %s4075_s28  ;;  %v2146_v45 = vsel %vm1724_vm8, %v2141_v58, %v2145_v9  ;;  %v2175_v18 = vrot.slane %v2164_v22, 3  ;;  %v2182_v58 = vrot.slane %v2167_v7, 3 }
 0x1ae   : > { %v5403_v53 = vpop.permute.xlu1 %1557  ;;  %v5405_v33 = vpop.permute.xlu0 %1555  ;;  %v2176_v39 = vsel %vm1724_vm8, %v2174_v27, %v2175_v18 }
 0x1af   : > { %7068 = vst [vmem:[#allocation58_spill] sm:$0xff] %v5403_v53  ;;  %7069 = vst [vmem:[#allocation59_spill] sm:$0xff] %v5405_v33  ;;  %v2239_v33 = vstv %s304_s7  ;;  %v5452_v53 = vld [vmem:[%s4223_s24 + $0x8] sm:$0xf0]  ;;  %s308_s7 = sld [smem:[#allocation2 + %s307_s29]]  ;;  %s311_s29 = sadd.s32 33, %s4195_s11 }
 0x1b0   : > { %2149 = vrot.lane.b32.xlu1 %v2142_v0, %s4076_s9  ;;  %2147 = vrot.lane.b32.xlu0 %v2139_v43, %s4076_s9  ;;  %v2241_v0 = vmul.f32 %v2239_v33, %v5415_v4  ;;  %v2243_v9 = vmul.f32 %v5323_v57, %v2239_v33  ;;  %v2240_v43 = vmul.f32 %v2239_v33, %v5424_v30 }
 0x1b1   : > { %v2242_v36 = vmul.f32 %v5328_v32, %v2239_v33 }
 0x1b2   : > { %v5419_v31 = vpop.permute.xlu1 %1590  ;;  %v5421_v14 = vpop.permute.xlu0 %1588  ;;  %v2255_v38 = vrot.slane %v2241_v0, 4  ;;  %v2256_v27 = vrot.slane %v2243_v9, 4 }
 0x1b3   : > { %7070 = vst [vmem:[#allocation60_spill] sm:$0xff] %v5419_v31  ;;  %7071 = vst [vmem:[#allocation61_spill] sm:$0xff] %v5421_v14  ;;  %v2252_v14 = vrot.slane %v2240_v43, 4  ;;  %v2244_v31 = vmul.f32 %v2239_v33, %v5442_v54 }
 0x1b4   : > { %2153 = vrot.lane.b32.xlu1 %v2146_v45, %s4076_s9  ;;  %2151 = vrot.lane.b32.xlu0 %v2144_v23, %s4076_s9  ;;  %v2183_v45 = vsel %vm1724_vm8, %v2178_v11, %v2182_v58  ;;  %v2181_v23 = vsel %vm1724_vm8, %v2175_v18, %v2180_v13  ;;  %v2276_v11 = vstv %s5417_s1  ;;  %v5460_v13 = vld [vmem:[%s4223_s24] sm:$0xf0]  ;;  %v2257_v0 = vsel %vm2209_vm9, %v2255_v38, %v2256_v27  ;;  %s406_s1 = sld [smem:[#allocation2 + %s405_s6]]  ;;  %s409_s6 = sadd.s32 82, %s4195_s11 }
 0x1b5   : > { %v2281_v3 = vmul.f32 %v2276_v11, %v5474_v12 }
 0x1b6   : > { %v5437_v22 = vpop.permute.xlu1 %1594  ;;  %v5439_v7 = vpop.permute.xlu0 %1592 }
 0x1b7   : > { %7072 = vst [vmem:[#allocation62_spill] sm:$0xff] %v5437_v22  ;;  %7073 = vst [vmem:[#allocation63_spill] sm:$0xff] %v5439_v7  ;;  %v2245_v22 = vmul.f32 %v2239_v33, %v5435_v47  ;;  %v2253_v7 = vrot.slane %v2242_v36, 4  ;;  %v2278_v33 = vmul.f32 %v2276_v11, %v5452_v53  ;;  %v2258_v36 = vrot.slane %v2244_v31, 4 }
 0x1b8   : > { %2186 = vrot.lane.b32.xlu1 %v2179_v37, %s4076_s9  ;;  %2184 = vrot.lane.b32.xlu0 %v2176_v39, %s4076_s9  ;;  %v2280_v37 = vmul.f32 %v5398_v48, %v2276_v11  ;;  %v5468_v39 = vld [vmem:[%s4223_s24 + $0x28] sm:$0xf] }
 0x1b9   : > { %v2260_v9 = vrot.slane %v2245_v22, 4  ;;  %v2254_v43 = vsel %vm2209_vm9, %v2252_v14, %v2253_v7  ;;  %v2282_v22 = vmul.f32 %v2276_v11, %v5468_v39  ;;  %v2292_v31 = vrot.slane %v2278_v33, 4 }
 0x1ba   : > { %v5455_v18 = vpop.permute.xlu1 %1627  ;;  %v5457_v58 = vpop.permute.xlu0 %1625  ;;  %v2293_v38 = vrot.slane %v2280_v37, 4  ;;  %v2259_v55 = vsel %vm2209_vm9, %v2253_v7, %v2258_v36 }
 0x1bb   : > { %7074 = vst [vmem:[#allocation64_spill] sm:$0xff] %v5455_v18  ;;  %7075 = vst [vmem:[#allocation65_spill] sm:$0xff] %v5457_v58  ;;  %v2277_v58 = vmul.f32 %v2276_v11, %v5460_v13  ;;  %v2279_v18 = vmul.f32 %v5299_v20, %v2276_v11  ;;  %v2261_v14 = vsel %vm2209_vm9, %v2256_v27, %v2260_v9  ;;  %v2295_v9 = vrot.slane %v2281_v3, 4 }
 0x1bc   : > { %2190 = vrot.lane.b32.xlu1 %v2183_v45, %s4076_s9  ;;  %2188 = vrot.lane.b32.xlu0 %v2181_v23, %s4076_s9  ;;  %v2294_v27 = vsel %vm2209_vm9, %v2292_v31, %v2293_v38 }
 0x1bd   : > { %v2289_v35 = vrot.slane %v2277_v58, 4  ;;  %v2290_v63 = vrot.slane %v2279_v18, 4 }
 0x1be   : > { %v5476_v45 = vpop.permute.xlu1 %1631  ;;  %v5478_v23 = vpop.permute.xlu0 %1629 }
 0x1bf   : > { %7076 = vst [vmem:[#allocation66_spill] sm:$0xff] %v5476_v45  ;;  %7077 = vst [vmem:[#allocation67_spill] sm:$0xff] %v5478_v23  ;;  %v2313_v45 = vstv %s306_s21  ;;  %v2291_v7 = vsel %vm2209_vm9, %v2289_v35, %v2290_v63  ;;  %v2296_v3 = vsel %vm2209_vm9, %v2290_v63, %v2295_v9  ;;  %s310_s21 = sld [smem:[#allocation2 + %s309_s20]]  ;;  %s313_s20 = sadd.s32 34, %s4195_s11 }
 0x1c0   : > { %2264 = vrot.lane.b32.xlu1 %v2257_v0, %s7013_s0  ;;  %2262 = vrot.lane.b32.xlu0 %v2254_v43, %s7013_s0  ;;  %v2297_v0 = vrot.slane %v2282_v22, 4  ;;  %v2315_v11 = vmul.f32 %v2313_v45, %v5415_v4  ;;  %v2317_v18 = vmul.f32 %v5323_v57, %v2313_v45  ;;  %v2314_v58 = vmul.f32 %v2313_v45, %v5424_v30 }
 0x1c1   : > { %v2316_v33 = vmul.f32 %v5328_v32, %v2313_v45  ;;  %v2319_v36 = vmul.f32 %v2313_v45, %v5435_v47  ;;  %v2318_v22 = vmul.f32 %v2313_v45, %v5442_v54 }
 0x1c2   : > { %v5487_v23 = vpop.permute.xlu1 %1664  ;;  %v5489_v24 = vpop.permute.xlu0 %1662  ;;  %v2329_v35 = vrot.slane %v2315_v11, 4  ;;  %v2326_v31 = vrot.slane %v2314_v58, 4 }
 0x1c3   : > { %7078 = vst [vmem:[#allocation68_spill] sm:$0xff] %v5487_v23  ;;  %7079 = vst [vmem:[#allocation69_spill] sm:$0xff] %v5489_v24  ;;  %v2327_v24 = vrot.slane %v2316_v33, 4  ;;  %v2334_v63 = vrot.slane %v2319_v36, 4 }
 0x1c4   : > { %2268 = vrot.lane.b32.xlu1 %v2261_v14, %s7013_s0  ;;  %2266 = vrot.lane.b32.xlu0 %v2259_v55, %s7013_s0  ;;  %v2298_v55 = vsel %vm2209_vm9, %v2293_v38, %v2297_v0  ;;  %v2330_v14 = vrot.slane %v2317_v18, 4  ;;  %v2332_v0 = vrot.slane %v2318_v22, 4 }
 0x1c5   : > { %v2328_v11 = vsel %vm2209_vm9, %v2326_v31, %v2327_v24 }
 0x1c6   : > { %v5499_v37 = vpop.permute.xlu1 %1668  ;;  %v5501_v43 = vpop.permute.xlu0 %1666  ;;  %v2331_v9 = vsel %vm2209_vm9, %v2329_v35, %v2330_v14  ;;  %v2333_v35 = vsel %vm2209_vm9, %v2327_v24, %v2332_v0 }
 0x1c7   : > { %7080 = vst [vmem:[#allocation70_spill] sm:$0xff] %v5499_v37  ;;  %7081 = vst [vmem:[#allocation71_spill] sm:$0xff] %v5501_v43  ;;  %v2350_v37 = vstv %s404_s25  ;;  %s408_s25 = sld [smem:[#allocation2 + %s407_s2]] }
 0x1c8   : > { %2301 = vrot.lane.b32.xlu1 %v2294_v27, %s7013_s0  ;;  %2299 = vrot.lane.b32.xlu0 %v2291_v7, %s7013_s0  ;;  %v2352_v27 = vmul.f32 %v2350_v37, %v5452_v53  ;;  %v2354_v45 = vmul.f32 %v5398_v48, %v2350_v37  ;;  %v2351_v7 = vmul.f32 %v2350_v37, %v5460_v13  ;;  %s5687_s2 = sld [smem:[#allocation2 + %s313_s20]]  ;;  %s317_s20 = sadd.s32 36, %s4195_s11 }
 0x1c9   : > { %v2353_v18 = vmul.f32 %v5299_v20, %v2350_v37 }
 0x1ca   : > { %v5510_v43 = vpop.permute.xlu1 %1701  ;;  %v5512_v38 = vpop.permute.xlu0 %1699  ;;  %v2366_v36 = vrot.slane %v2352_v27, 4  ;;  %v2367_v22 = vrot.slane %v2354_v45, 4  ;;  %v2363_v31 = vrot.slane %v2351_v7, 4 }
 0x1cb   : > { %7082 = vst [vmem:[#allocation72_spill] sm:$0xff] %v5510_v43  ;;  %7083 = vst [vmem:[#allocation73_spill] sm:$0xff] %v5512_v38  ;;  %v2364_v38 = vrot.slane %v2353_v18, 4  ;;  %v2355_v43 = vmul.f32 %v2350_v37, %v5474_v12 }
 0x1cc   : > { %2305 = vrot.lane.b32.xlu1 %v2298_v55, %s7013_s0  ;;  %2303 = vrot.lane.b32.xlu0 %v2296_v3, %s7013_s0  ;;  %v2356_v55 = vmul.f32 %v2350_v37, %v5468_v39  ;;  %v2335_v3 = vsel %vm2209_vm9, %v2330_v14, %v2334_v63  ;;  %v2368_v24 = vsel %vm2209_vm9, %v2366_v36, %v2367_v22 }
 0x1cd   : > { %v2365_v37 = vsel %vm2209_vm9, %v2363_v31, %v2364_v38  ;;  %v2369_v0 = vrot.slane %v2355_v43, 4 }
 0x1ce   : > { %v5522_v58 = vpop.permute.xlu1 %1705  ;;  %v5524_v33 = vpop.permute.xlu0 %1703 }
 0x1cf   : > { %7084 = vst [vmem:[#allocation74_spill] sm:$0xff] %v5522_v58  ;;  %7085 = vst [vmem:[#allocation75_spill] sm:$0xff] %v5524_v33  ;;  %v2387_v58 = vstv %s308_s7  ;;  %v2370_v36 = vsel %vm2209_vm9, %v2364_v38, %v2369_v0  ;;  %s5608_s7 = sld [smem:[#allocation2 + %s311_s29]]  ;;  %s411_s29 = sadd.s32 83, %s4195_s11 }
 0x1d0   : > { %2338 = vrot.lane.b32.xlu1 %v2331_v9, %s7014_s30  ;;  %2336 = vrot.lane.b32.xlu0 %v2328_v11, %s7014_s30  ;;  %v2371_v9 = vrot.slane %v2356_v55, 4  ;;  %v2389_v14 = vmul.f32 %v2387_v58, %v5415_v4  ;;  %v2391_v63 = vmul.f32 %v5323_v57, %v2387_v58  ;;  %v2388_v27 = vmul.f32 %v2387_v58, %v5424_v30 }
 0x1d1   : > { %v2390_v45 = vmul.f32 %v5328_v32, %v2387_v58  ;;  %v2392_v43 = vmul.f32 %v2387_v58, %v5442_v54 }
 0x1d2   : > { %v5533_v33 = vpop.permute.xlu1 %1779  ;;  %v5535_v23 = vpop.permute.xlu0 %1777  ;;  %v2372_v18 = vsel %vm2209_vm9, %v2367_v22, %v2371_v9  ;;  %v2403_v55 = vrot.slane %v2389_v14, 4  ;;  %v2400_v31 = vrot.slane %v2388_v27, 4 }
 0x1d3   : > { %7086 = vst [vmem:[#allocation76_spill] sm:$0xff] %v5533_v33  ;;  %7087 = vst [vmem:[#allocation77_spill] sm:$0xff] %v5535_v23  ;;  %v2401_v23 = vrot.slane %v2390_v45, 4  ;;  %v2406_v14 = vrot.slane %v2392_v43, 4 }
 0x1d4   : > { %2342 = vrot.lane.b32.xlu1 %v2335_v3, %s7014_s30  ;;  %2340 = vrot.lane.b32.xlu0 %v2333_v35, %s7014_s30  ;;  %v2404_v3 = vrot.slane %v2391_v63, 4  ;;  %v2393_v35 = vmul.f32 %v2387_v58, %v5435_v47 }
 0x1d5   : > { %v2402_v38 = vsel %vm2209_vm9, %v2400_v31, %v2401_v23 }
 0x1d6   : > { %v5545_v11 = vpop.permute.xlu1 %1783  ;;  %v5547_v7 = vpop.permute.xlu0 %1781  ;;  %v2405_v9 = vsel %vm2209_vm9, %v2403_v55, %v2404_v3 }
 0x1d7   : > { %7088 = vst [vmem:[#allocation78_spill] sm:$0xff] %v5545_v11  ;;  %7089 = vst [vmem:[#allocation79_spill] sm:$0xff] %v5547_v7  ;;  %v2424_v11 = vstv %s406_s1  ;;  %s5648_s1 = sld [smem:[#allocation2 + %s409_s6]] }
 0x1d8   : > { %2375 = vrot.lane.b32.xlu1 %v2368_v24, %s7014_s30  ;;  %2373 = vrot.lane.b32.xlu0 %v2365_v37, %s7014_s30  ;;  %v2408_v24 = vrot.slane %v2393_v35, 4  ;;  %v2426_v58 = vmul.f32 %v2424_v11, %v5452_v53  ;;  %v2428_v63 = vmul.f32 %v5398_v48, %v2424_v11  ;;  %v2425_v37 = vmul.f32 %v2424_v11, %v5460_v13  ;;  %s5728_s6 = sld [smem:[#allocation2 + %s411_s29]] }
 0x1d9   : > { %v2427_v0 = vmul.f32 %v5299_v20, %v2424_v11  ;;  %v2407_v35 = vsel %vm2209_vm9, %v2401_v23, %v2406_v14 }
 0x1da   : > { %v5556_v7 = vpop.permute.xlu1 %1816  ;;  %v5558_v22 = vpop.permute.xlu0 %1814  ;;  %v2409_v55 = vsel %vm2209_vm9, %v2404_v3, %v2408_v24  ;;  %v2440_v43 = vrot.slane %v2426_v58, 4  ;;  %v2441_v31 = vrot.slane %v2428_v63, 4 }
 0x1db   : > { %7090 = vst [vmem:[#allocation80_spill] sm:$0xff] %v5556_v7  ;;  %7091 = vst [vmem:[#allocation81_spill] sm:$0xff] %v5558_v22  ;;  %v2437_v22 = vrot.slane %v2425_v37, 4  ;;  %v2438_v7 = vrot.slane %v2427_v0, 4  ;;  %v815_v0 = vsel %vm478_vm1, %v4914_v15, %v4912_v29  ;;  %v2498_v15 = vstv %s408_s25 }
 0x1dc   : > { %2379 = vrot.lane.b32.xlu1 %v2372_v18, %s7014_s30  ;;  %2377 = vrot.lane.b32.xlu0 %v2370_v36, %s7014_s30  ;;  %v2430_v18 = vmul.f32 %v2424_v11, %v5468_v39  ;;  %v2429_v36 = vmul.f32 %v2424_v11, %v5474_v12  ;;  %v2442_v24 = vsel %vm2209_vm9, %v2440_v43, %v2441_v31 }
 0x1dd   : > { %v2439_v14 = vsel %vm2209_vm9, %v2437_v22, %v2438_v7 }
 0x1de   : > { %v5568_v27 = vpop.permute.xlu1 %1820  ;;  %v5570_v45 = vpop.permute.xlu0 %1818  ;;  %v2443_v3 = vrot.slane %v2429_v36, 4 }
 0x1df   : > { %7092 = vst [vmem:[#allocation82_spill] sm:$0xff] %v5568_v27  ;;  %7093 = vst [vmem:[#allocation83_spill] sm:$0xff] %v5570_v45  ;;  %v2461_v27 = vstv %s310_s21  ;;  %s273_s21 = sadd.s32 14, %s4195_s11 }
 0x1e0   : > { %2412 = vrot.lane.b32.xlu1 %v2405_v9, %s4073_s4  ;;  %2410 = vrot.lane.b32.xlu0 %v2402_v38, %s4073_s4  ;;  %v2445_v9 = vrot.slane %v2430_v18, 4  ;;  %v2463_v23 = vmul.f32 %v2461_v27, %v5415_v4  ;;  %v2465_v11 = vmul.f32 %v5323_v57, %v2461_v27  ;;  %v2462_v58 = vmul.f32 %v2461_v27, %v5424_v30  ;;  %s5689_s25 = sld [smem:[#allocation2 + %s273_s21]] }
 0x1e1   : > { %v2464_v38 = vmul.f32 %v5328_v32, %v2461_v27  ;;  %v816_v18 = vsel %vm478_vm1, %v4929_v26, %v4927_v8  ;;  %v2444_v22 = vsel %vm2209_vm9, %v2438_v7, %v2443_v3  ;;  %v2467_v36 = vmul.f32 %v2461_v27, %v5435_v47  ;;  %s5778_s21 = sld [smem:[#allocation2 + %s317_s20]] }
 0x1e2   : > { %v5579_v45 = vpop.permute.xlu1 %1853  ;;  %v5581_v33 = vpop.permute.xlu0 %1851  ;;  %v2478_v43 = vrot.slane %v2465_v11, 4  ;;  %v2466_v29 = vmul.f32 %v2461_v27, %v5442_v54  ;;  %v852_v7 = vsel %vm478_vm1, %v4940_v49, %v4938_v2  ;;  %v853_v27 = vsel %vm478_vm1, %v4952_v34, %v4950_v61 }
 0x1e3   : > { %v2499_v2 = vmul.f32 %v2498_v15, %v5460_v13  ;;  %v2501_v49 = vmul.f32 %v5299_v20, %v2498_v15 }
 0x1e4   : > { %2416 = vrot.lane.b32.xlu1 %v2409_v55, %s4073_s4  ;;  %2414 = vrot.lane.b32.xlu0 %v2407_v35, %s4073_s4  ;;  %v2446_v55 = vsel %vm2209_vm9, %v2441_v31, %v2445_v9  ;;  %v2477_v35 = vrot.slane %v2463_v23, 4  ;;  %v819_v31 = vadd.f32 %v815_v0, %v4903_v17  ;;  %v820_v9 = vadd.f32 %v816_v18, %v4918_v59 }
 0x1e5   : > { %v2482_v23 = vrot.slane %v2467_v36, 4  ;;  %v2500_v17 = vmul.f32 %v2498_v15, %v5452_v53  ;;  %v2502_v59 = vmul.f32 %v5398_v48, %v2498_v15  ;;  %v2504_v0 = vmul.f32 %v2498_v15, %v5468_v39 }
 0x1e6   : > { %v5591_v63 = vpop.permute.xlu1 %1857  ;;  %v5593_v37 = vpop.permute.xlu0 %1855  ;;  %v2479_v3 = vsel %vm2209_vm9, %v2477_v35, %v2478_v43  ;;  %v2503_v35 = vmul.f32 %v2498_v15, %v5474_v12 }
 0x1e7   : > { %7094 = vst [vmem:[#allocation84_spill] sm:$0xff] %v5591_v63  ;;  %7095 = vst [vmem:[#allocation85_spill] sm:$0xff] %v5593_v37  ;;  %v2474_v37 = vrot.slane %v2462_v58, 4  ;;  %v2475_v63 = vrot.slane %v2464_v38, 4  ;;  %v857_v58 = vadd.f32 %v853_v27, %v820_v9  ;;  %v889_v38 = vsel %vm525_vm2, %v4963_v62, %v4961_v16 }
 0x1e8   : > { %2449 = vrot.lane.b32.xlu1 %v2442_v24, %s4073_s4  ;;  %2447 = vrot.lane.b32.xlu0 %v2439_v14, %s4073_s4  ;;  %v2480_v24 = vrot.slane %v2466_v29, 4  ;;  %v856_v14 = vadd.f32 %v852_v7, %v819_v31  ;;  %v2483_v18 = vsel %vm2209_vm9, %v2478_v43, %v2482_v23  ;;  %v2511_v29 = vrot.slane %v2499_v2, 4 }
 0x1e9   : > { %v2476_v11 = vsel %vm2209_vm9, %v2474_v37, %v2475_v63  ;;  %v890_v37 = vsel %vm525_vm2, %v4975_v50, %v4973_v46  ;;  %v2512_v16 = vrot.slane %v2501_v49, 4  ;;  %v2535_v62 = vstv %s5608_s7  ;;  %s371_s7 = sadd.s32 63, %s4195_s11 }
 0x1ea   : > { %v5610_v8 = vpop.permute.xlu1 %1890  ;;  %v5612_v26 = vpop.permute.xlu0 %1888  ;;  %v2481_v36 = vsel %vm2209_vm9, %v2475_v63, %v2480_v24  ;;  %v893_v31 = vadd.f32 %v889_v38, %v856_v14  ;;  %v894_v9 = vadd.f32 %v890_v37, %v857_v58  ;;  %v926_v43 = vsel %vm525_vm2, %v4986_v19, %v4984_v60 }
 0x1eb   : > { %v2519_v7 = vrot.slane %v2504_v0, 4  ;;  %v927_v63 = vsel %vm525_vm2, %v4998_v44, %v4996_v42  ;;  %v2517_v27 = vrot.slane %v2503_v35, 4  ;;  %v2513_v23 = vsel %vm2209_vm9, %v2511_v29, %v2512_v16 }
 0x1ec   : > { %2453 = vrot.lane.b32.xlu1 %v2446_v55, %s4073_s4  ;;  %2451 = vrot.lane.b32.xlu0 %v2444_v22, %s4073_s4  ;;  %v2514_v55 = vrot.slane %v2500_v17, 4  ;;  %v2515_v22 = vrot.slane %v2502_v59, 4  ;;  %v2539_v17 = vmul.f32 %v5323_v57, %v2535_v62  ;;  %v2536_v60 = vmul.f32 %v2535_v62, %v5424_v30 }
 0x1ed   : > { %v2538_v19 = vmul.f32 %v5328_v32, %v2535_v62  ;;  %v930_v59 = vadd.f32 %v926_v43, %v893_v31  ;;  %v963_v24 = vsel %vm572_vm4, %v5009_v1, %v5007_v21  ;;  %v964_v2 = vsel %vm572_vm4, %v5021_v56, %v5019_v52 }
 0x1ee   : > { %v5630_v61 = vpop.permute.xlu1 %1894  ;;  %v5632_v34 = vpop.permute.xlu0 %1892  ;;  %v2516_v15 = vsel %vm2209_vm9, %v2514_v55, %v2515_v22  ;;  %v2520_v49 = vsel %vm2209_vm9, %v2515_v22, %v2519_v7  ;;  %v2518_v14 = vsel %vm2209_vm9, %v2512_v16, %v2517_v27  ;;  %v2541_v38 = vmul.f32 %v2535_v62, %v5435_v47 }
 0x1ef   : > { %v2540_v37 = vmul.f32 %v2535_v62, %v5442_v54  ;;  %v2552_v0 = vrot.slane %v2539_v17, 4  ;;  %v2548_v21 = vrot.slane %v2536_v60, 4  ;;  %v2549_v1 = vrot.slane %v2538_v19, 4 }
 0x1f0   : > { %2486 = vrot.lane.b32.xlu1 %v2479_v3, %s4074_s5  ;;  %2484 = vrot.lane.b32.xlu0 %v2476_v11, %s4074_s5  ;;  %v2537_v3 = vmul.f32 %v2535_v62, %v5415_v4  ;;  %v931_v11 = vadd.f32 %v927_v63, %v894_v9  ;;  %v967_v55 = vadd.f32 %v963_v24, %v930_v59  ;;  %v2556_v29 = vrot.slane %v2541_v38, 4 }
 0x1f1   : > { %v1000_v35 = vsel %vm572_vm4, %v5032_v5, %v5030_v28  ;;  %v2554_v16 = vrot.slane %v2540_v37, 4  ;;  %v2550_v43 = vsel %vm2209_vm9, %v2548_v21, %v2549_v1  ;;  %v1038_v27 = vsel %vm619_vm5, %v5067_v40, %v5065_v25  ;;  %v7098_v37 = vld [vmem:[#allocation10_spill] sm:$0xff] }
 0x1f2   : > { %v5650_v46 = vpop.permute.xlu1 %1927  ;;  %v5652_v50 = vpop.permute.xlu0 %1925  ;;  %v2551_v58 = vrot.slane %v2537_v3, 4  ;;  %v968_v22 = vadd.f32 %v964_v2, %v931_v11  ;;  %v2609_v11 = vstv %s5687_s2  ;;  %v1232_v40 = vstv %s5689_s25  ;;  %s415_s2 = sadd.s32 85, %s4195_s11  ;;  %s287_s25 = sadd.s32 21, %s4195_s11 }
 0x1f3   : > { %v2555_v17 = vsel %vm2209_vm9, %v2549_v1, %v2554_v16  ;;  %v2612_v16 = vmul.f32 %v5328_v32, %v2609_v11  ;;  %s5836_s29 = sld [smem:[#allocation2 + %s415_s2]]  ;;  %s417_s2 = sadd.s32 86, %s4195_s11 }
 0x1f4   : > { %2490 = vrot.lane.b32.xlu1 %v2483_v18, %s4074_s5  ;;  %2488 = vrot.lane.b32.xlu0 %v2481_v36, %s4074_s5  ;;  %v2572_v18 = vstv %s5648_s1  ;;  %v1001_v36 = vsel %vm572_vm4, %v5044_v10, %v5042_v41  ;;  %v2553_v9 = vsel %vm2209_vm9, %v2551_v58, %v2552_v0  ;;  %v1004_v41 = vadd.f32 %v1000_v35, %v967_v55  ;;  %s5730_s1 = sld [smem:[#allocation2 + %s371_s7]]  ;;  %v7097_v58 = vld [vmem:[#allocation9_spill] sm:$0xff] }
 0x1f5   : > { %v2574_v62 = vmul.f32 %v2572_v18, %v5452_v53  ;;  %v2576_v31 = vmul.f32 %v5398_v48, %v2572_v18  ;;  %v2573_v28 = vmul.f32 %v2572_v18, %v5460_v13  ;;  %v2575_v5 = vmul.f32 %v5299_v20, %v2572_v18  ;;  %s5852_s7 = sld [smem:[#allocation2 + %s287_s25]] }
 0x1f6   : > { %v5668_v42 = vpop.permute.xlu1 %1931  ;;  %v5670_v44 = vpop.permute.xlu0 %1929  ;;  %v1005_v63 = vadd.f32 %v1001_v36, %v968_v22  ;;  %v2578_v3 = vmul.f32 %v2572_v18, %v5468_v39  ;;  %v2611_v55 = vmul.f32 %v2609_v11, %v5415_v4  ;;  %v5748_v22 = vmul.f32 %v5323_v57, %v2609_v11  ;;  %s5955_s25 = sld [smem:[#allocation2 + %s417_s2]]  ;;  %s399_s2 = sadd.s32 77, %s4195_s11 }
 0x1f7   : > { %v2588_v60 = vrot.slane %v2574_v62, 4  ;;  %v2589_v19 = vrot.slane %v2576_v31, 4  ;;  %v2585_v59 = vrot.slane %v2573_v28, 4  ;;  %v3931_v31 = vld [vmem:[%s4204_s10] sm:$0xfc] }
 0x1f8   : > { %2523 = vrot.lane.b32.xlu1 %v2516_v15, %s4074_s5  ;;  %2521 = vrot.lane.b32.xlu0 %v2513_v23, %s4074_s5  ;;  %v1037_v15 = vsel %vm619_vm5, %v5055_v51, %v5053_v6  ;;  %v2557_v23 = vsel %vm2209_vm9, %v2552_v0, %v2556_v29  ;;  %v2586_v6 = vrot.slane %v2575_v5, 4  ;;  %v2577_v51 = vmul.f32 %v2572_v18, %v5474_v12  ;;  %v7099_v0 = vld [vmem:[#allocation11_spill] sm:$0xff] }
 0x1f9   : > { %v1041_v25 = vadd.f32 %v1037_v15, %v1004_v41  ;;  %v1075_v21 = vsel %vm619_vm5, %v7099_v0, %v7098_v37  ;;  %v2593_v1 = vrot.slane %v2578_v3, 4  ;;  %v2590_v18 = vsel %vm2209_vm9, %v2588_v60, %v2589_v19  ;;  %v7102_v41 = vld [vmem:[#allocation12_spill] sm:$0xff]  ;;  %v7104_v15 = vld [vmem:[#allocation14_spill] sm:$0xff] }
 0x1fa   : > { %v5691_v52 = vpop.permute.xlu1 %1964  ;;  %v5693_v56 = vpop.permute.xlu0 %1962  ;;  %v2587_v35 = vsel %vm2209_vm9, %v2585_v59, %v2586_v6  ;;  %v2591_v36 = vrot.slane %v2577_v51, 4  ;;  %v2610_v29 = vmul.f32 %v2609_v11, %v5424_v30  ;;  %v2626_v60 = vrot.slane %v5748_v22, 4 }
 0x1fb   : > { %v2615_v59 = vmul.f32 %v2609_v11, %v5435_v47  ;;  %v2614_v51 = vmul.f32 %v2609_v11, %v5442_v54  ;;  %v1249_v37 = vstv %s5730_s1  ;;  %v7108_v54 = vld [vmem:[#allocation16_spill] sm:$0xff]  ;;  %v7109_v11 = vld [vmem:[#allocation17_spill] sm:$0xff]  ;;  %s385_s1 = sadd.s32 70, %s4195_s11 }
 0x1fc   : > { %2527 = vrot.lane.b32.xlu1 %v2520_v49, %s4074_s5  ;;  %2525 = vrot.lane.b32.xlu0 %v2518_v14, %s4074_s5  ;;  %v1042_v49 = vadd.f32 %v1038_v27, %v1005_v63  ;;  %v7096_v14 = vld [vmem:[#allocation8_spill] sm:$0xff]  ;;  %v7103_v63 = vld [vmem:[#allocation13_spill] sm:$0xff]  ;;  %v7105_v27 = vld [vmem:[#allocation15_spill] sm:$0xff] }
 0x1fd   : > { %v1074_v38 = vsel %vm619_vm5, %v7097_v58, %v7096_v14  ;;  %v1111_v30 = vsel %vm666_vm6, %v7103_v63, %v7102_v41  ;;  %v1112_v3 = vsel %vm666_vm6, %v7105_v27, %v7104_v15  ;;  %v2623_v14 = vrot.slane %v2612_v16, 4  ;;  %v3932_v63 = vld [vmem:[%s4223_s24] sm:$0xfc]  ;;  %v3933_v27 = vld [vmem:[%s4204_s10 + $0x20] sm:$0x3] }
 0x1fe   : > { %v5709_v10 = vpop.permute.xlu1 %1968  ;;  %v5711_v7 = vpop.permute.xlu0 %1966  ;;  %v1078_v62 = vadd.f32 %v1074_v38, %v1041_v25  ;;  %v1079_v5 = vadd.f32 %v1075_v21, %v1042_v49  ;;  %v2592_v25 = vsel %vm2209_vm9, %v2586_v6, %v2591_v36  ;;  %v2622_v49 = vrot.slane %v2610_v29, 4 }
 0x1ff   : > { %v2646_v58 = vstv %s5728_s6  ;;  %v1148_v6 = vsel %vm666_vm6, %v7109_v11, %v7108_v54  ;;  %v2630_v36 = vrot.slane %v2615_v59, 4  ;;  %v2628_v29 = vrot.slane %v2614_v51, 4  ;;  %v7115_v59 = vld [vmem:[#allocation21_spill] sm:$0xff]  ;;  %s319_s6 = sadd.s32 37, %s4195_s11 }
 0x200   : > { %2560 = vrot.lane.b32.xlu1 %v2553_v9, %s4075_s28  ;;  %2558 = vrot.lane.b32.xlu0 %v2550_v43, %s4075_s28  ;;  %v5754_v9 = vmul.f32 %v3931_v31, %v1232_v40  ;;  %v5757_v43 = vmul.f32 %v5328_v32, %v1232_v40  ;;  %v1115_v47 = vadd.f32 %v1111_v30, %v1078_v62  ;;  %s5898_s20 = sld [smem:[#allocation2 + %s319_s6]]  ;;  %s301_s6 = sadd.s32 28, %s4195_s11 }
 0x201   : > { %v2648_v16 = vmul.f32 %v2646_v58, %v5452_v53  ;;  %v2624_v62 = vsel %vm2209_vm9, %v2622_v49, %v2623_v14  ;;  %v5799_v31 = vmul.f32 %v5398_v48, %v2646_v58  ;;  %v5806_v30 = vmul.f32 %v3932_v63, %v1249_v37  ;;  %v7122_v63 = vld [vmem:[#allocation26_spill] sm:$0xff] }
 0x202   : > { %v5733_v24 = vpop.permute.xlu1 %2001  ;;  %v5735_v2 = vpop.permute.xlu0 %1999  ;;  %v1241_v38 = vrot.slane %v5757_v43, 2  ;;  %v1152_v41 = vadd.f32 %v1148_v6, %v1115_v47  ;;  %v5809_v15 = vmul.f32 %v5299_v20, %v1249_v37  ;;  %v1235_v53 = vmul.f32 %v3933_v27, %v1232_v40  ;;  %v7117_v47 = vld [vmem:[#allocation23_spill] sm:$0xff] }
 0x203   : > { %v2651_v49 = vmul.f32 %v2646_v58, %v5474_v12  ;;  %v2629_v54 = vsel %vm2209_vm9, %v2623_v14, %v2628_v29  ;;  %v2662_v11 = vrot.slane %v2648_v16, 4  ;;  %v5847_v16 = vld [vmem:[%s4204_s10] sm:$0xe0]  ;;  %v7123_v27 = vld [vmem:[#allocation27_spill] sm:$0xff] }
 0x204   : > { %2564 = vrot.lane.b32.xlu1 %v2557_v23, %s4075_s28  ;;  %2562 = vrot.lane.b32.xlu0 %v2555_v17, %s4075_s28  ;;  %v2594_v23 = vsel %vm2209_vm9, %v2589_v19, %v2593_v1  ;;  %v2625_v17 = vrot.slane %v2611_v55, 4  ;;  %v1240_v19 = vrot.slane %v5754_v9, 2  ;;  %v1116_v1 = vadd.f32 %v1112_v3, %v1079_v5  ;;  %v7111_v55 = vld [vmem:[#allocation19_spill] sm:$0xff] }
 0x205   : > { %v2647_v9 = vmul.f32 %v2646_v58, %v5460_v13  ;;  %v5803_v5 = vmul.f32 %v5299_v20, %v2646_v58  ;;  %v7116_v20 = vld [vmem:[#allocation22_spill] sm:$0xff] }
 0x206   : > { %v5759_v28 = vpop.permute.xlu1 %2005  ;;  %v5761_v4 = vpop.permute.xlu0 %2003  ;;  %v1186_v40 = vsel %vm713_vm7, %v7117_v47, %v7116_v20  ;;  %v5873_v20 = vld [vmem:[%s4204_s10 + $0x20] sm:$0x1f]  ;;  %v1256_v47 = vrot.slane %v5806_v30, 2 }
 0x207   : > { %7100 = vst [vmem:[#allocation8_spill] sm:$0xff] %v5759_v28  ;;  %7101 = vst [vmem:[#allocation9_spill] sm:$0xff] %v5761_v4  ;;  %v2659_v6 = vrot.slane %v2647_v9, 4  ;;  %v2660_v12 = vrot.slane %v5803_v5, 4  ;;  %v7121_v9 = vld [vmem:[#allocation25_spill] sm:$0xff] }
 0x208   : > { %2597 = vrot.lane.b32.xlu1 %v2590_v18, %s4075_s28  ;;  %2595 = vrot.lane.b32.xlu0 %v2587_v35, %s4075_s28  ;;  %v7110_v18 = vld [vmem:[#allocation18_spill] sm:$0xff]  ;;  %v2627_v35 = vsel %vm2209_vm9, %v2625_v17, %v2626_v60  ;;  %v7114_v17 = vld [vmem:[#allocation20_spill] sm:$0xff] }
 0x209   : > { %v1149_v22 = vsel %vm666_vm6, %v7111_v55, %v7110_v18  ;;  %v1185_v51 = vsel %vm713_vm7, %v7115_v59, %v7114_v17  ;;  %v2724_v18 = vstv %s5778_s21  ;;  %v2661_v59 = vsel %vm2209_vm9, %v2659_v6, %v2660_v12  ;;  %s5900_s21 = sld [smem:[#allocation2 + %s385_s1]]  ;;  %s419_s1 = sadd.s32 87, %s4195_s11 }
 0x20a   : > { %v5783_v0 = vpop.permute.xlu1 %2038  ;;  %v5785_v21 = vpop.permute.xlu0 %2036  ;;  %v1153_v13 = vadd.f32 %v1149_v22, %v1116_v1  ;;  %v2631_v1 = vsel %vm2209_vm9, %v2626_v60, %v2630_v36  ;;  %v1189_v55 = vadd.f32 %v1185_v51, %v1152_v41  ;;  %v1242_v22 = vsel %vm1239_vm3, %v1240_v19, %v1241_v38 }
 0x20b   : > { %7106 = vst [vmem:[#allocation10_spill] sm:$0xff] %v5783_v0  ;;  %7107 = vst [vmem:[#allocation11_spill] sm:$0xff] %v5785_v21  ;;  %v1243_v60 = vrot.slane %v1235_v53, 2  ;;  %v2665_v19 = vrot.slane %v2651_v49, 4  ;;  %v2725_v51 = vmul.f32 %v2724_v18, %v5847_v16  ;;  %v5870_v49 = vld [vmem:[%s4204_s10 + $0x28] sm:$0x1f] }
 0x20c   : > { %2601 = vrot.lane.b32.xlu1 %v2594_v23, %s4075_s28  ;;  %2599 = vrot.lane.b32.xlu0 %v2592_v25, %s4075_s28  ;;  %v2652_v25 = vmul.f32 %v2646_v58, %v5468_v39  ;;  %v2663_v39 = vrot.slane %v5799_v31, 4  ;;  %v5833_v58 = vld [vmem:[%s4204_s10 + $0x8] sm:$0xe0]  ;;  %v7120_v31 = vld [vmem:[#allocation24_spill] sm:$0xff]  ;;  %v7191_v0 = vld [vmem:[#allocation70_spill] sm:$0xff] }
 0x20d   : > { %v1222_v5 = vsel %vm713_vm7, %v7121_v9, %v7120_v31  ;;  %v2726_v53 = vmul.f32 %v2724_v18, %v5833_v58  ;;  %v2666_v30 = vsel %vm2209_vm9, %v2660_v12, %v2665_v19  ;;  %v2761_v12 = vstv %s5836_s29  ;;  %s321_s29 = sadd.s32 38, %s4195_s11 }
 0x20e   : > { %v5812_v3 = vpop.permute.xlu1 %2042  ;;  %v5814_v23 = vpop.permute.xlu0 %2040  ;;  %v2667_v41 = vrot.slane %v2652_v25, 4  ;;  %v2664_v17 = vsel %vm2209_vm9, %v2662_v11, %v2663_v39  ;;  %v5867_v25 = vmul.f32 %v5328_v32, %v2724_v18 }
 0x20f   : > { %7112 = vst [vmem:[#allocation12_spill] sm:$0xff] %v5812_v3  ;;  %7113 = vst [vmem:[#allocation13_spill] sm:$0xff] %v5814_v23  ;;  %v2740_v43 = vrot.slane %v2726_v53, 5  ;;  %v7143_v23 = vld [vmem:[#allocation37_spill] sm:$0xff] }
 0x210   : > { %2634 = vrot.lane.b32.xlu1 %v2627_v35, %s4076_s9  ;;  %2632 = vrot.lane.b32.xlu0 %v2624_v62, %s4076_s9  ;;  %v3934_v35 = vld [vmem:[%s4223_s24 + $0x20] sm:$0x3]  ;;  %v1190_v62 = vadd.f32 %v1186_v40, %v1153_v13  ;;  %v5861_v13 = vmul.f32 %v5323_v57, %v2724_v18  ;;  %v1257_v40 = vrot.slane %v5809_v15, 2  ;;  %v1226_v57 = vadd.f32 %v1222_v5, %v1189_v55  ;;  %v5907_v5 = vld [vmem:[%s4223_s24] sm:$0xe0] }
 0x211   : > { %v1252_v36 = vmul.f32 %v3934_v35, %v1249_v37  ;;  %v1223_v37 = vsel %vm713_vm7, %v7123_v27, %v7122_v63  ;;  %v2668_v35 = vsel %vm2209_vm9, %v2663_v39, %v2667_v41  ;;  %v2730_v15 = vmul.f32 %v2724_v18, %v5870_v49  ;;  %v5895_v39 = vld [vmem:[%s4223_s24 + $0x8] sm:$0xe0] }
 0x212   : > { %v5842_v14 = vpop.permute.xlu1 %2075  ;;  %v5844_v29 = vpop.permute.xlu0 %2073  ;;  %v1227_v6 = vadd.f32 %v1223_v37, %v1190_v62  ;;  %v2729_v55 = vmul.f32 %v2724_v18, %v5873_v20  ;;  %v1247_v62 = vadd.f32 %v1242_v22, %v1226_v57  ;;  %v1258_v18 = vsel %vm1239_vm3, %v1256_v47, %v1257_v40 }
 0x213   : > { %7118 = vst [vmem:[#allocation14_spill] sm:$0xff] %v5842_v14  ;;  %7119 = vst [vmem:[#allocation15_spill] sm:$0xff] %v5844_v29  ;;  %v1259_v32 = vrot.slane %v1252_v36, 2  ;;  %v2738_v36 = vrot.slane %v5867_v25, 5  ;;  %v1717_v63 = vstv %s5852_s7  ;;  %v2745_v27 = vrot.slane %v2730_v15, 5  ;;  %v5923_v25 = vld [vmem:[%s4223_s24 + $0x10] sm:$0xff] }
 0x214   : > { %2638 = vrot.lane.b32.xlu1 %v2631_v1, %s4076_s9  ;;  %2636 = vrot.lane.b32.xlu0 %v2629_v54, %s4076_s9  ;;  %v1244_v1 = vsel %vm1239_vm3, %v1241_v38, %v1243_v60  ;;  %v2741_v38 = vrot.slane %v5861_v13, 5  ;;  %v2737_v60 = vrot.slane %v2725_v51, 5  ;;  %v2743_v37 = vrot.slane %v2729_v55, 5  ;;  %v5917_v13 = vld [vmem:[%s4223_s24 + $0x28] sm:$0x1f]  ;;  %v7130_v15 = vld [vmem:[#allocation28_spill] sm:$0xff] }
 0x215   : > { %v1260_v41 = vsel %vm1239_vm3, %v1257_v40, %v1259_v32  ;;  %v1248_v19 = vadd.f32 %v1244_v1, %v1227_v6  ;;  %v2763_v53 = vmul.f32 %v2761_v12, %v5895_v39  ;;  %v2762_v51 = vmul.f32 %v2761_v12, %v5907_v5  ;;  %v5927_v40 = vld [vmem:[%s4223_s24 + $0x20] sm:$0x1f]  ;;  %v5934_v6 = vld [vmem:[%s4204_s10 + $0x10] sm:$0xff]  ;;  %v7131_v55 = vld [vmem:[#allocation29_spill] sm:$0xff]  ;;  %s6030_s7 = sld [smem:[#allocation2 + %s321_s29]]  ;;  %s323_s29 = sadd.s32 39, %s4195_s11 }
 0x216   : > { %v5880_v54 = vpop.permute.xlu1 %2079  ;;  %v5882_v11 = vpop.permute.xlu0 %2077  ;;  %v2742_v22 = vsel %vm2694_vm10, %v2740_v43, %v2741_v38  ;;  %v2764_v47 = vmul.f32 %v5923_v25, %v2761_v12  ;;  %v1263_v57 = vadd.f32 %v1258_v18, %v1247_v62  ;;  %v3936_v1 = vld [vmem:[%s4204_s10] sm:$0xf8]  ;;  %v7133_v62 = vld [vmem:[#allocation31_spill] sm:$0xff] }
 0x217   : > { %7124 = vst [vmem:[#allocation16_spill] sm:$0xff] %v5880_v54  ;;  %7125 = vst [vmem:[#allocation17_spill] sm:$0xff] %v5882_v11  ;;  %v5931_v32 = vmul.f32 %v3936_v1, %v1717_v63  ;;  %v1264_v43 = vadd.f32 %v1260_v41, %v1248_v19  ;;  %v7132_v11 = vld [vmem:[#allocation30_spill] sm:$0xff]  ;;  %v2767_v1 = vmul.f32 %v2761_v12, %v5917_v13  ;;  %v2777_v41 = vrot.slane %v2763_v53, 5 }
 0x218   : > { %2671 = vrot.lane.b32.xlu1 %v2664_v17, %s4076_s9  ;;  %2669 = vrot.lane.b32.xlu0 %v2661_v59, %s4076_s9  ;;  %v2739_v17 = vsel %vm2694_vm10, %v2737_v60, %v2738_v36  ;;  %v2765_v59 = vmul.f32 %v5398_v48, %v2761_v12  ;;  %v1300_v60 = vsel %vm478_vm1, %v7131_v55, %v7130_v15  ;;  %v2774_v55 = vrot.slane %v2762_v51, 5  ;;  %v7138_v51 = vld [vmem:[#allocation34_spill] sm:$0xff] }
 0x219   : > { %v1301_v18 = vsel %vm478_vm1, %v7133_v62, %v7132_v11  ;;  %v2766_v19 = vmul.f32 %v2761_v12, %v5927_v40  ;;  %v2775_v54 = vrot.slane %v2764_v47, 5  ;;  %v2798_v11 = vstv %s5898_s20  ;;  %v7139_v47 = vld [vmem:[#allocation35_spill] sm:$0xff]  ;;  %s6063_s20 = sld [smem:[#allocation2 + %s301_s6]]  ;;  %s421_s6 = sadd.s32 88, %s4195_s11 }
 0x21a   : > { %v5902_v31 = vpop.permute.xlu1 %2112  ;;  %v5904_v9 = vpop.permute.xlu0 %2110  ;;  %v2778_v15 = vrot.slane %v2765_v59, 5  ;;  %v1725_v62 = vrot.slane %v5931_v32, 3  ;;  %v1305_v12 = vadd.f32 %v1301_v18, %v1264_v43  ;;  %v2782_v59 = vrot.slane %v2767_v1, 5 }
 0x21b   : > { %7126 = vst [vmem:[#allocation18_spill] sm:$0xff] %v5902_v31  ;;  %7127 = vst [vmem:[#allocation19_spill] sm:$0xff] %v5904_v9  ;;  %v5961_v9 = vstv %s5900_s21  ;;  %v1338_v32 = vsel %vm478_vm1, %v7139_v47, %v7138_v51  ;;  %v2776_v18 = vsel %vm2694_vm10, %v2774_v55, %v2775_v54  ;;  %v2799_v1 = vmul.f32 %v2798_v11, %v5847_v16  ;;  %v3940_v51 = vld [vmem:[%s4204_s10 + $0x20] sm:$0x7]  ;;  %s6081_s21 = sld [smem:[#allocation2 + %s419_s1]] }
 0x21c   : > { %2675 = vrot.lane.b32.xlu1 %v2668_v35, %s4076_s9  ;;  %2673 = vrot.lane.b32.xlu0 %v2666_v30, %s4076_s9  ;;  %v5937_v35 = vmul.f32 %v5934_v6, %v1717_v63  ;;  %v7142_v31 = vld [vmem:[#allocation36_spill] sm:$0xff]  ;;  %v2783_v29 = vsel %vm2694_vm10, %v2778_v15, %v2782_v59  ;;  %s6204_s1 = sld [smem:[#allocation2 + %s421_s6]]  ;;  %s425_s6 = sadd.s32 90, %s4195_s11 }
 0x21e   : > { %v5939_v30 = vpop.permute.xlu1 %2116  ;;  %v5941_v48 = vpop.permute.xlu0 %2114  ;;  %v7146_v59 = vrot.slane %v5937_v35, 3 }
 0x21f   : > { %7128 = vst [vmem:[#allocation20_spill] sm:$0xff] %v5939_v30  ;;  %7129 = vst [vmem:[#allocation21_spill] sm:$0xff] %v5941_v48  ;;  %v2746_v30 = vsel %vm2694_vm10, %v2741_v38, %v2745_v27  ;;  %v2744_v48 = vsel %vm2694_vm10, %v2738_v36, %v2743_v37  ;;  %v1304_v36 = vadd.f32 %v1300_v60, %v1263_v57  ;;  %v7136_v27 = vld [vmem:[#allocation32_spill] sm:$0xff]  ;;  %v7137_v37 = vld [vmem:[#allocation33_spill] sm:$0xff] }
 0x220   : > { %2749 = vrot.lane.b32.xlu1 %v2742_v22, %s7013_s0  ;;  %2747 = vrot.lane.b32.xlu0 %v2739_v17, %s7013_s0  ;;  %v1337_v53 = vsel %vm478_vm1, %v7137_v37, %v7136_v27  ;;  %v2780_v22 = vrot.slane %v2766_v19, 5  ;;  %v5977_v57 = vld [vmem:[%s4204_s10 + $0x18] sm:$0xff]  ;;  %v2779_v60 = vsel %vm2694_vm10, %v2777_v41, %v2778_v15  ;;  %v5986_v27 = vmul.f32 %v5934_v6, %v2798_v11 }
 0x221   : > { %v5980_v43 = vmul.f32 %v5977_v57, %v2798_v11  ;;  %v5994_v37 = vmul.f32 %v5923_v25, %v5961_v9  ;;  %v5997_v41 = vmul.f32 %v3940_v51, %v1717_v63 }
 0x222   : > { %v5963_v17 = vpop.permute.xlu1 %2149  ;;  %v5965_v38 = vpop.permute.xlu0 %2147  ;;  %v2781_v63 = vsel %vm2694_vm10, %v2775_v54, %v2780_v22 }
 0x223   : > { %7134 = vst [vmem:[#allocation22_spill] sm:$0xff] %v5963_v17  ;;  %7135 = vst [vmem:[#allocation23_spill] sm:$0xff] %v5965_v38  ;;  %v2800_v38 = vmul.f32 %v2798_v11, %v5833_v58  ;;  %v1342_v17 = vadd.f32 %v1338_v32, %v1305_v12  ;;  %v2815_v12 = vrot.slane %v5980_v43, 5  ;;  %v2835_v32 = vstv %s5955_s25  ;;  %s6125_s25 = sld [smem:[#allocation2 + %s399_s2]]  ;;  %s423_s2 = sadd.s32 89, %s4195_s11 }
 0x224   : > { %2753 = vrot.lane.b32.xlu1 %v2746_v30, %s7013_s0  ;;  %2751 = vrot.lane.b32.xlu0 %v2744_v48, %s7013_s0  ;;  %v1341_v30 = vadd.f32 %v1337_v53, %v1304_v36  ;;  %v3939_v48 = vld [vmem:[%s4223_s24] sm:$0xf8]  ;;  %v1374_v36 = vsel %vm525_vm2, %v7143_v23, %v7142_v31  ;;  %v7144_v53 = vld [vmem:[#allocation38_spill] sm:$0xff]  ;;  %v2812_v23 = vrot.slane %v5986_v27, 5  ;;  %v2804_v31 = vmul.f32 %v2798_v11, %v5870_v49 }
 0x225   : > { %v5990_v19 = vmul.f32 %v3939_v48, %v5961_v9  ;;  %v7145_v48 = vld [vmem:[#allocation39_spill] sm:$0xff]  ;;  %v2814_v51 = vrot.slane %v2800_v38, 5 }
 0x226   : > { %v5999_v47 = vpop.permute.xlu1 %2153  ;;  %v6001_v55 = vpop.permute.xlu0 %2151  ;;  %v1375_v3 = vsel %vm525_vm2, %v7145_v48, %v7144_v53  ;;  %v2803_v53 = vmul.f32 %v2798_v11, %v5873_v20  ;;  %v1378_v15 = vadd.f32 %v1374_v36, %v1341_v30  ;;  %v7150_v11 = vld [vmem:[#allocation41_spill] sm:$0xff]  ;;  %v7151_v30 = vld [vmem:[#allocation42_spill] sm:$0xff]  ;;  %v7152_v36 = vld [vmem:[#allocation43_spill] sm:$0xff]  ;;  %v1728_v48 = vrot.slane %v5997_v41, 3 }
 0x227   : > { %7140 = vst [vmem:[#allocation24_spill] sm:$0xff] %v5999_v47  ;;  %7141 = vst [vmem:[#allocation25_spill] sm:$0xff] %v6001_v55  ;;  %v2811_v55 = vrot.slane %v2799_v1, 5  ;;  %v1741_v54 = vrot.slane %v5990_v19, 3  ;;  %v7149_v1 = vld [vmem:[#allocation40_spill] sm:$0xff]  ;;  %v2837_v19 = vmul.f32 %v2835_v32, %v5895_v39  ;;  %v7154_v47 = vld [vmem:[#allocation45_spill] sm:$0xff] }
 0x228   : > { %2786 = vrot.lane.b32.xlu1 %v2779_v60, %s7013_s0  ;;  %2784 = vrot.lane.b32.xlu0 %v2776_v18, %s7013_s0  ;;  %v6022_v60 = vsel %vm1724_vm8, %v1725_v62, %v7146_v59  ;;  %v1379_v18 = vadd.f32 %v1375_v3, %v1342_v17  ;;  %v1411_v27 = vsel %vm525_vm2, %v7150_v11, %v7149_v1  ;;  %v6044_v3 = vld [vmem:[%s4223_s24 + $0x18] sm:$0xff]  ;;  %v2817_v41 = vrot.slane %v2803_v53, 5 }
 0x229   : > { %v1412_v62 = vsel %vm525_vm2, %v7152_v36, %v7151_v30  ;;  %v6047_v17 = vmul.f32 %v6044_v3, %v2835_v32  ;;  %v2836_v59 = vmul.f32 %v2835_v32, %v5907_v5  ;;  %v6051_v1 = vmul.f32 %v5923_v25, %v2835_v32 }
 0x22a   : > { %v6026_v38 = vpop.permute.xlu1 %2186  ;;  %v6028_v43 = vpop.permute.xlu0 %2184  ;;  %v2816_v11 = vsel %vm2694_vm10, %v2814_v51, %v2815_v12  ;;  %v2813_v30 = vsel %vm2694_vm10, %v2811_v55, %v2812_v23  ;;  %v2819_v36 = vrot.slane %v2804_v31, 5  ;;  %v1416_v22 = vadd.f32 %v1412_v62, %v1379_v18  ;;  %v7157_v55 = vld [vmem:[#allocation46_spill] sm:$0xff]  ;;  %v7158_v31 = vld [vmem:[#allocation47_spill] sm:$0xff]  ;;  %v7160_v18 = vld [vmem:[#allocation49_spill] sm:$0xff] }
 0x22b   : > { %7147 = vst [vmem:[#allocation26_spill] sm:$0xff] %v6026_v38  ;;  %7148 = vst [vmem:[#allocation27_spill] sm:$0xff] %v6028_v43  ;;  %v3942_v38 = vld [vmem:[%s4223_s24 + $0x20] sm:$0x7]  ;;  %v1449_v53 = vsel %vm572_vm4, %v7158_v31, %v7157_v55  ;;  %v2851_v62 = vrot.slane %v2837_v19, 5  ;;  %v2840_v55 = vmul.f32 %v2835_v32, %v5927_v40  ;;  %v7162_v19 = vld [vmem:[#allocation51_spill] sm:$0xff] }
 0x22c   : > { %2790 = vrot.lane.b32.xlu1 %v2783_v29, %s7013_s0  ;;  %2788 = vrot.lane.b32.xlu0 %v2781_v63, %s7013_s0  ;;  %v1415_v29 = vadd.f32 %v1411_v27, %v1378_v15  ;;  %v7153_v63 = vld [vmem:[#allocation44_spill] sm:$0xff]  ;;  %v6061_v14 = vmul.f32 %v3942_v38, %v5961_v9  ;;  %v2852_v9 = vrot.slane %v6047_v17, 5  ;;  %v2848_v38 = vrot.slane %v2836_v59, 5 }
 0x22d   : > { %v1448_v43 = vsel %vm572_vm4, %v7154_v47, %v7153_v63  ;;  %v7159_v15 = vld [vmem:[#allocation48_spill] sm:$0xff]  ;;  %v2841_v47 = vmul.f32 %v2835_v32, %v5917_v13  ;;  %v2849_v63 = vrot.slane %v6051_v1, 5  ;;  %v7163_v17 = vrot.slane %v5994_v37, 3 }
 0x22e   : > { %v6065_v4 = vpop.permute.xlu1 %2190  ;;  %v6067_v51 = vpop.permute.xlu0 %2188  ;;  %v1485_v27 = vsel %vm572_vm4, %v7160_v18, %v7159_v15  ;;  %v1452_v31 = vadd.f32 %v1448_v43, %v1415_v29  ;;  %v7161_v15 = vld [vmem:[#allocation50_spill] sm:$0xff]  ;;  %v7164_v1 = vrot.slane %v5937_v35, 3 }
 0x22f   : > { %7155 = vst [vmem:[#allocation28_spill] sm:$0xff] %v6065_v4  ;;  %7156 = vst [vmem:[#allocation29_spill] sm:$0xff] %v6067_v51  ;;  %v1486_v18 = vsel %vm572_vm4, %v7162_v19, %v7161_v15  ;;  %v2818_v51 = vsel %vm2694_vm10, %v2812_v23, %v2817_v41  ;;  %v6091_v59 = vsel %vm1724_vm8, %v1741_v54, %v7163_v17  ;;  %v2872_v15 = vstv %s6030_s7  ;;  %v7170_v41 = vld [vmem:[#allocation55_spill] sm:$0xff]  ;;  %s6153_s7 = sld [smem:[#allocation2 + %s323_s29]]  ;;  %s327_s29 = sadd.s32 41, %s4195_s11 }
 0x230   : > { %2823 = vrot.lane.b32.xlu1 %v2816_v11, %s7014_s30  ;;  %2821 = vrot.lane.b32.xlu0 %v2813_v30, %s7014_s30  ;;  %v2820_v11 = vsel %vm2694_vm10, %v2815_v12, %v2819_v36  ;;  %v1453_v30 = vadd.f32 %v1449_v53, %v1416_v22  ;;  %v6096_v32 = vsel %vm1724_vm8, %v7164_v1, %v1728_v48  ;;  %v7167_v12 = vld [vmem:[#allocation52_spill] sm:$0xff]  ;;  %v7168_v36 = vld [vmem:[#allocation53_spill] sm:$0xff]  ;;  %v7169_v22 = vld [vmem:[#allocation54_spill] sm:$0xff]  ;;  %v2856_v35 = vrot.slane %v2841_v47, 5 }
 0x231   : > { %v1489_v19 = vadd.f32 %v1485_v27, %v1452_v31  ;;  %v1522_v23 = vsel %vm619_vm5, %v7168_v36, %v7167_v12  ;;  %v1523_v54 = vsel %vm619_vm5, %v7170_v41, %v7169_v22  ;;  %v2853_v48 = vsel %vm2694_vm10, %v2851_v62, %v2852_v9  ;;  %v7172_v36 = vld [vmem:[#allocation57_spill] sm:$0xff]  ;;  %v7175_v22 = vld [vmem:[#allocation58_spill] sm:$0xff]  ;;  %v7176_v41 = vld [vmem:[#allocation59_spill] sm:$0xff] }
 0x232   : > { %v6098_v43 = vpop.permute.xlu1 %2264  ;;  %v6100_v29 = vpop.permute.xlu0 %2262  ;;  %v1490_v53 = vadd.f32 %v1486_v18, %v1453_v30  ;;  %v2850_v27 = vsel %vm2694_vm10, %v2848_v38, %v2849_v63  ;;  %v2854_v31 = vrot.slane %v2840_v55, 5  ;;  %v2874_v17 = vmul.f32 %v2872_v15, %v5833_v58  ;;  %v7171_v30 = vld [vmem:[#allocation56_spill] sm:$0xff] }
 0x233   : > { %7165 = vst [vmem:[#allocation30_spill] sm:$0xff] %v6098_v43  ;;  %7166 = vst [vmem:[#allocation31_spill] sm:$0xff] %v6100_v29  ;;  %v6116_v1 = vmul.f32 %v5977_v57, %v2872_v15  ;;  %v2873_v12 = vmul.f32 %v2872_v15, %v5847_v16  ;;  %v6120_v47 = vmul.f32 %v5934_v6, %v2872_v15  ;;  %v6128_v62 = vstv %s6063_s20  ;;  %v7180_v43 = vld [vmem:[#allocation63_spill] sm:$0xff]  ;;  %s325_s20 = sadd.s32 40, %s4195_s11 }
 0x234   : > { %2827 = vrot.lane.b32.xlu1 %v2820_v11, %s7014_s30  ;;  %2825 = vrot.lane.b32.xlu0 %v2818_v51, %s7014_s30  ;;  %v1526_v18 = vadd.f32 %v1522_v23, %v1489_v19  ;;  %v1527_v11 = vadd.f32 %v1523_v54, %v1490_v53  ;;  %v1559_v51 = vsel %vm619_vm5, %v7172_v36, %v7171_v30  ;;  %v7177_v19 = vld [vmem:[#allocation60_spill] sm:$0xff]  ;;  %v7178_v23 = vld [vmem:[#allocation61_spill] sm:$0xff]  ;;  %v7179_v53 = vld [vmem:[#allocation62_spill] sm:$0xff]  ;;  %v2888_v4 = vrot.slane %v2874_v17, 5 }
 0x235   : > { %v1560_v29 = vsel %vm619_vm5, %v7176_v41, %v7175_v22  ;;  %v1596_v54 = vsel %vm666_vm6, %v7178_v23, %v7177_v19  ;;  %v1597_v30 = vsel %vm666_vm6, %v7180_v43, %v7179_v53  ;;  %v2857_v36 = vsel %vm2694_vm10, %v2852_v9, %v2856_v35  ;;  %v7181_v35 = vld [vmem:[#allocation64_spill] sm:$0xff] }
 0x236   : > { %v6130_v38 = vpop.permute.xlu1 %2268  ;;  %v6132_v55 = vpop.permute.xlu0 %2266  ;;  %v2877_v22 = vmul.f32 %v2872_v15, %v5873_v20  ;;  %v2909_v41 = vstv %s6081_s21  ;;  %v2889_v19 = vrot.slane %v6116_v1, 5  ;;  %v2885_v23 = vrot.slane %v2873_v12, 5  ;;  %s6235_s21 = sld [smem:[#allocation2 + %s325_s20]]  ;;  %s331_s20 = sadd.s32 43, %s4195_s11 }
 0x237   : > { %7173 = vst [vmem:[#allocation32_spill] sm:$0xff] %v6130_v38  ;;  %7174 = vst [vmem:[#allocation33_spill] sm:$0xff] %v6132_v55  ;;  %v2855_v55 = vsel %vm2694_vm10, %v2849_v63, %v2854_v31  ;;  %v2878_v38 = vmul.f32 %v2872_v15, %v5870_v49  ;;  %v2886_v28 = vrot.slane %v6120_v47, 5  ;;  %v1563_v9 = vadd.f32 %v1559_v51, %v1526_v18  ;;  %v7184_v31 = vld [vmem:[#allocation67_spill] sm:$0xff] }
 0x238   : > { %2860 = vrot.lane.b32.xlu1 %v2853_v48, %s7014_s30  ;;  %2858 = vrot.lane.b32.xlu0 %v2850_v27, %s7014_s30  ;;  %v1564_v43 = vadd.f32 %v1560_v29, %v1527_v11  ;;  %v7182_v48 = vld [vmem:[#allocation65_spill] sm:$0xff]  ;;  %v7183_v27 = vld [vmem:[#allocation66_spill] sm:$0xff]  ;;  %v2911_v1 = vmul.f32 %v2909_v41, %v5895_v39  ;;  %v6167_v12 = vmul.f32 %v6044_v3, %v2909_v41 }
 0x239   : > { %v1633_v63 = vsel %vm666_vm6, %v7182_v48, %v7181_v35  ;;  %v1634_v15 = vsel %vm666_vm6, %v7184_v31, %v7183_v27  ;;  %v2910_v29 = vmul.f32 %v2909_v41, %v5907_v5  ;;  %v6171_v47 = vmul.f32 %v5923_v25, %v2909_v41  ;;  %v3943_v48 = vld [vmem:[%s4204_s10] sm:$0xf0] }
 0x23a   : > { %v6161_v53 = vpop.permute.xlu1 %2301  ;;  %v6163_v17 = vpop.permute.xlu0 %2299  ;;  %v1600_v18 = vadd.f32 %v1596_v54, %v1563_v9  ;;  %v1601_v11 = vadd.f32 %v1597_v30, %v1564_v43  ;;  %v2893_v51 = vrot.slane %v2878_v38, 5  ;;  %v2891_v35 = vrot.slane %v2877_v22, 5  ;;  %v7188_v9 = vld [vmem:[#allocation69_spill] sm:$0xff] }
 0x23b   : > { %7185 = vst [vmem:[#allocation34_spill] sm:$0xff] %v6161_v53  ;;  %7186 = vst [vmem:[#allocation35_spill] sm:$0xff] %v6163_v17  ;;  %v6177_v27 = vmul.f32 %v3943_v48, %v6128_v62  ;;  %v6181_v31 = vmul.f32 %v5934_v6, %v6128_v62  ;;  %v2890_v17 = vsel %vm2694_vm10, %v2888_v4, %v2889_v19  ;;  %v2925_v48 = vrot.slane %v2911_v1, 5 }
 0x23c   : > { %2864 = vrot.lane.b32.xlu1 %v2857_v36, %s7014_s30  ;;  %2862 = vrot.lane.b32.xlu0 %v2855_v55, %s7014_s30  ;;  %v2887_v53 = vsel %vm2694_vm10, %v2885_v23, %v2886_v28  ;;  %v1637_v54 = vadd.f32 %v1633_v63, %v1600_v18  ;;  %v1638_v30 = vadd.f32 %v1634_v15, %v1601_v11  ;;  %v7187_v36 = vld [vmem:[#allocation68_spill] sm:$0xff]  ;;  %v2219_v55 = vstv %s6125_s25  ;;  %v7192_v63 = vld [vmem:[#allocation71_spill] sm:$0xff]  ;;  %s6281_s25 = sld [smem:[#allocation2 + %s423_s2]]  ;;  %s429_s2 = sadd.s32 92, %s4195_s11 }
 0x23d   : > { %v1670_v38 = vsel %vm713_vm7, %v7188_v9, %v7187_v36  ;;  %v2926_v21 = vrot.slane %v6167_v12, 5  ;;  %v2922_v4 = vrot.slane %v2910_v29, 5  ;;  %v2923_v23 = vrot.slane %v6171_v47, 5  ;;  %v7193_v12 = vld [vmem:[#allocation72_spill] sm:$0xff]  ;;  %v7194_v29 = vld [vmem:[#allocation73_spill] sm:$0xff] }
 0x23e   : > { %v6190_v22 = vpop.permute.xlu1 %2305  ;;  %v6192_v43 = vpop.permute.xlu0 %2303  ;;  %v1671_v15 = vsel %vm713_vm7, %v7192_v63, %v7191_v0  ;;  %v1744_v18 = vrot.slane %v6061_v14, 3  ;;  %v2894_v1 = vsel %vm2694_vm10, %v2889_v19, %v2893_v51  ;;  %v2892_v11 = vsel %vm2694_vm10, %v2886_v28, %v2891_v35  ;;  %v3945_v19 = vld [vmem:[%s4204_s10 + $0x20] sm:$0xf] }
 0x23f   : > { %7189 = vst [vmem:[#allocation36_spill] sm:$0xff] %v6190_v22  ;;  %7190 = vst [vmem:[#allocation37_spill] sm:$0xff] %v6192_v43  ;;  %v1707_v47 = vsel %vm713_vm7, %v7194_v29, %v7193_v12  ;;  %v2915_v36 = vmul.f32 %v2909_v41, %v5917_v13  ;;  %v2914_v0 = vmul.f32 %v2909_v41, %v5927_v40  ;;  %v2946_v14 = vstv %s6153_s7  ;;  %v7197_v29 = vld [vmem:[#allocation74_spill] sm:$0xff]  ;;  %v7198_v43 = vld [vmem:[#allocation75_spill] sm:$0xff]  ;;  %s6317_s7 = sld [smem:[#allocation2 + %s327_s29]]  ;;  %s315_s29 = sadd.s32 35, %s4195_s11 }
 0x240   : > { %2897 = vrot.lane.b32.xlu1 %v2890_v17, %s4073_s4  ;;  %2895 = vrot.lane.b32.xlu0 %v2887_v53, %s4073_s4  ;;  %v1674_v9 = vadd.f32 %v1670_v38, %v1637_v54  ;;  %v3944_v17 = vld [vmem:[%s4223_s24] sm:$0xf0]  ;;  %v6214_v53 = vmul.f32 %v5923_v25, %v2219_v55  ;;  %v2205_v28 = vmul.f32 %v3945_v19, %v6128_v62  ;;  %v2210_v22 = vrot.slane %v6177_v27, 4 }
 0x241   : > { %v2220_v63 = vmul.f32 %v3944_v17, %v2219_v55  ;;  %v1675_v12 = vadd.f32 %v1671_v15, %v1638_v30  ;;  %v1708_v41 = vsel %vm713_vm7, %v7198_v43, %v7197_v29  ;;  %v2927_v54 = vsel %vm2694_vm10, %v2925_v48, %v2926_v21  ;;  %v3946_v29 = vld [vmem:[%s4223_s24 + $0x20] sm:$0xf] }
 0x242   : > { %v6218_v51 = vpop.permute.xlu1 %2338  ;;  %v6220_v35 = vpop.permute.xlu0 %2336  ;;  %v2924_v38 = vsel %vm2694_vm10, %v2922_v4, %v2923_v23  ;;  %v1711_v17 = vadd.f32 %v1707_v47, %v1674_v9  ;;  %v2948_v62 = vmul.f32 %v2946_v14, %v5833_v58  ;;  %v2950_v30 = vmul.f32 %v5977_v57, %v2946_v14 }
 0x243   : > { %7195 = vst [vmem:[#allocation38_spill] sm:$0xff] %v6218_v51  ;;  %7196 = vst [vmem:[#allocation39_spill] sm:$0xff] %v6220_v35  ;;  %v2930_v15 = vrot.slane %v2915_v36, 5  ;;  %v2928_v19 = vrot.slane %v2914_v0, 5  ;;  %v2947_v43 = vmul.f32 %v2946_v14, %v5847_v16  ;;  %v2949_v48 = vmul.f32 %v5934_v6, %v2946_v14 }
 0x244   : > { %2901 = vrot.lane.b32.xlu1 %v2894_v1, %s4073_s4  ;;  %2899 = vrot.lane.b32.xlu0 %v2892_v11, %s4073_s4  ;;  %v1712_v4 = vadd.f32 %v1708_v41, %v1675_v12  ;;  %v2211_v27 = vrot.slane %v6181_v31, 4  ;;  %v2226_v1 = vrot.slane %v2220_v63, 4  ;;  %v2952_v9 = vmul.f32 %v2946_v14, %v5870_v49 }
 0x245   : > { %v2213_v0 = vrot.slane %v2205_v28, 4  ;;  %v6245_v35 = vmul.f32 %v3946_v29, %v2219_v55  ;;  %v2951_v51 = vmul.f32 %v2946_v14, %v5873_v20  ;;  %v1732_v12 = vadd.f32 %v6022_v60, %v1711_v17 }
 0x246   : > { %v6238_v47 = vpop.permute.xlu1 %2342  ;;  %v6240_v11 = vpop.permute.xlu0 %2340  ;;  %v2962_v31 = vrot.slane %v2948_v62, 5  ;;  %v2963_v63 = vrot.slane %v2950_v30, 5  ;;  %v2983_v41 = vstv %s6204_s1  ;;  %v2959_v36 = vrot.slane %v2947_v43, 5  ;;  %s6369_s1 = sld [smem:[#allocation2 + %s425_s6]]  ;;  %s333_s6 = sadd.s32 44, %s4195_s11 }
 0x247   : > { %7199 = vst [vmem:[#allocation40_spill] sm:$0xff] %v6238_v47  ;;  %7200 = vst [vmem:[#allocation41_spill] sm:$0xff] %v6240_v11  ;;  %v2931_v11 = vsel %vm2694_vm10, %v2926_v21, %v2930_v15  ;;  %v2929_v47 = vsel %vm2694_vm10, %v2923_v23, %v2928_v19  ;;  %v2960_v28 = vrot.slane %v2949_v48, 5  ;;  %v7201_v55 = vrot.slane %v5994_v37, 3 }
 0x248   : > { %2934 = vrot.lane.b32.xlu1 %v2927_v54, %s4073_s4  ;;  %2932 = vrot.lane.b32.xlu0 %v2924_v38, %s4073_s4  ;;  %v1733_v60 = vadd.f32 %v6096_v32, %v1712_v4  ;;  %v6260_v54 = vsel %vm2209_vm9, %v2210_v22, %v2211_v27  ;;  %v2967_v21 = vrot.slane %v2952_v9, 5  ;;  %v7204_v23 = vrot.slane %v6214_v53, 4 }
 0x249   : > { %v1745_v14 = vsel %vm1724_vm8, %v7201_v55, %v1744_v18  ;;  %v2965_v30 = vrot.slane %v2951_v51, 5  ;;  %v2985_v37 = vmul.f32 %v2983_v41, %v5895_v39  ;;  %v2987_v18 = vmul.f32 %v6044_v3, %v2983_v41  ;;  %v7209_v55 = vld [vmem:[#allocation78_spill] sm:$0xff] }
 0x24a   : > { %v6262_v38 = vpop.permute.xlu1 %2375  ;;  %v6264_v17 = vpop.permute.xlu0 %2373  ;;  %v6269_v62 = vsel %vm2209_vm9, %v2226_v1, %v7204_v23  ;;  %v1748_v32 = vadd.f32 %v6091_v59, %v1732_v12  ;;  %v6275_v22 = vsel %vm2209_vm9, %v2211_v27, %v2213_v0  ;;  %v2229_v15 = vrot.slane %v6245_v35, 4  ;;  %v7205_v27 = vld [vmem:[#allocation76_spill] sm:$0xff]  ;;  %v7206_v1 = vld [vmem:[#allocation77_spill] sm:$0xff] }
 0x24b   : > { %7202 = vst [vmem:[#allocation42_spill] sm:$0xff] %v6262_v38  ;;  %7203 = vst [vmem:[#allocation43_spill] sm:$0xff] %v6264_v17  ;;  %v2964_v19 = vsel %vm2694_vm10, %v2962_v31, %v2963_v63  ;;  %v2961_v51 = vsel %vm2694_vm10, %v2959_v36, %v2960_v28  ;;  %v2984_v43 = vmul.f32 %v2983_v41, %v5907_v5  ;;  %v3020_v48 = vstv %s6235_s21  ;;  %v7217_v38 = vld [vmem:[#allocation83_spill] sm:$0xff]  ;;  %s6411_s21 = sld [smem:[#allocation2 + %s331_s20]]  ;;  %s413_s20 = sadd.s32 84, %s4195_s11 }
 0x24c   : > { %2938 = vrot.lane.b32.xlu1 %v2931_v11, %s4073_s4  ;;  %2936 = vrot.lane.b32.xlu0 %v2929_v47, %s4073_s4  ;;  %v2986_v59 = vmul.f32 %v5923_v25, %v2983_v41  ;;  %v1749_v4 = vadd.f32 %v1745_v14, %v1733_v60  ;;  %v1785_v35 = vsel %vm478_vm1, %v7206_v1, %v7205_v27  ;;  %v2999_v29 = vrot.slane %v2985_v37, 5  ;;  %v7210_v14 = vld [vmem:[#allocation79_spill] sm:$0xff]  ;;  %v7212_v37 = vld [vmem:[#allocation81_spill] sm:$0xff] }
 0x24d   : > { %v2968_v9 = vsel %vm2694_vm10, %v2963_v63, %v2967_v21  ;;  %v2989_v0 = vmul.f32 %v2983_v41, %v5917_v13  ;;  %v2966_v36 = vsel %vm2694_vm10, %v2960_v28, %v2965_v30  ;;  %v3000_v12 = vrot.slane %v2987_v18, 5 }
 0x24e   : > { %v6290_v11 = vpop.permute.xlu1 %2379  ;;  %v6292_v47 = vpop.permute.xlu0 %2377  ;;  %v2988_v31 = vmul.f32 %v2983_v41, %v5927_v40  ;;  %v1786_v60 = vsel %vm478_vm1, %v7210_v14, %v7209_v55  ;;  %v3022_v23 = vmul.f32 %v3020_v48, %v5833_v58  ;;  %v3024_v63 = vmul.f32 %v5977_v57, %v3020_v48  ;;  %v7211_v41 = vld [vmem:[#allocation80_spill] sm:$0xff] }
 0x24f   : > { %7207 = vst [vmem:[#allocation44_spill] sm:$0xff] %v6290_v11  ;;  %7208 = vst [vmem:[#allocation45_spill] sm:$0xff] %v6292_v47  ;;  %v2996_v21 = vrot.slane %v2984_v43, 5  ;;  %v2997_v27 = vrot.slane %v2986_v59, 5  ;;  %v3021_v28 = vmul.f32 %v3020_v48, %v5847_v16  ;;  %v3023_v30 = vmul.f32 %v5934_v6, %v3020_v48 }
 0x250   : > { %2971 = vrot.lane.b32.xlu1 %v2964_v19, %s4074_s5  ;;  %2969 = vrot.lane.b32.xlu0 %v2961_v51, %s4074_s5  ;;  %v1822_v18 = vsel %vm478_vm1, %v7212_v37, %v7211_v41  ;;  %v3004_v51 = vrot.slane %v2989_v0, 5  ;;  %v3026_v55 = vmul.f32 %v3020_v48, %v5870_v49  ;;  %v3025_v14 = vmul.f32 %v3020_v48, %v5873_v20 }
 0x251   : > { %v1789_v43 = vadd.f32 %v1785_v35, %v1748_v32  ;;  %v7215_v59 = vrot.slane %v6214_v53, 4  ;;  %v3001_v41 = vsel %vm2694_vm10, %v2999_v29, %v3000_v12  ;;  %v3002_v37 = vrot.slane %v2988_v31, 5  ;;  %v7216_v53 = vld [vmem:[#allocation82_spill] sm:$0xff] }
 0x252   : > { %v6311_v1 = vpop.permute.xlu1 %2412  ;;  %v6313_v19 = vpop.permute.xlu0 %2410  ;;  %v1790_v11 = vadd.f32 %v1786_v60, %v1749_v4  ;;  %v3036_v0 = vrot.slane %v3022_v23, 5  ;;  %v2998_v17 = vsel %vm2694_vm10, %v2996_v21, %v2997_v27  ;;  %v3033_v32 = vrot.slane %v3021_v28, 5 }
 0x253   : > { %7213 = vst [vmem:[#allocation46_spill] sm:$0xff] %v6311_v1  ;;  %7214 = vst [vmem:[#allocation47_spill] sm:$0xff] %v6313_v19  ;;  %v6322_v47 = vsel %vm2209_vm9, %v7215_v59, %v2229_v15  ;;  %v3037_v19 = vrot.slane %v3024_v63, 5  ;;  %v3057_v1 = vstv %s6281_s25  ;;  %v1826_v48 = vadd.f32 %v1822_v18, %v1789_v43  ;;  %v7218_v59 = vld [vmem:[#allocation84_spill] sm:$0xff]  ;;  %s6461_s25 = sld [smem:[#allocation2 + %s429_s2]]  ;;  %s431_s2 = sadd.s32 93, %s4195_s11 }
 0x254   : > { %2975 = vrot.lane.b32.xlu1 %v2968_v9, %s4074_s5  ;;  %2973 = vrot.lane.b32.xlu0 %v2966_v36, %s4074_s5  ;;  %v3034_v35 = vrot.slane %v3023_v30, 5  ;;  %v1823_v15 = vsel %vm478_vm1, %v7217_v38, %v7216_v53  ;;  %v3005_v9 = vsel %vm2694_vm10, %v3000_v12, %v3004_v51  ;;  %v3041_v36 = vrot.slane %v3026_v55, 5 }
 0x255   : > { %v3039_v31 = vrot.slane %v3025_v14, 5  ;;  %v1859_v60 = vsel %vm525_vm2, %v5581_v33, %v5579_v45  ;;  %v3003_v23 = vsel %vm2694_vm10, %v2997_v27, %v3002_v37  ;;  %v3059_v63 = vmul.f32 %v3057_v1, %v5895_v39 }
 0x256   : > { %v6332_v29 = vpop.permute.xlu1 %2416  ;;  %v6334_v4 = vpop.permute.xlu0 %2414  ;;  %v3061_v21 = vmul.f32 %v6044_v3, %v3057_v1  ;;  %v3038_v38 = vsel %vm2694_vm10, %v3036_v0, %v3037_v19  ;;  %v3058_v12 = vmul.f32 %v3057_v1, %v5907_v5  ;;  %v6348_v28 = vmul.f32 %v5923_v25, %v3057_v1 }
 0x257   : > { %v1827_v33 = vadd.f32 %v1823_v15, %v1790_v11  ;;  %v1896_v45 = vsel %vm525_vm2, %v5612_v26, %v5610_v8  ;;  %v3035_v27 = vsel %vm2694_vm10, %v3033_v32, %v3034_v35  ;;  %v3063_v30 = vmul.f32 %v3057_v1, %v5917_v13  ;;  %v7219_v11 = vld [vmem:[#allocation85_spill] sm:$0xff] }
 0x258   : > { %3008 = vrot.lane.b32.xlu1 %v3001_v41, %s4074_s5  ;;  %3006 = vrot.lane.b32.xlu0 %v2998_v17, %s4074_s5  ;;  %v1863_v18 = vadd.f32 %v1859_v60, %v1826_v48  ;;  %v3042_v55 = vsel %vm2694_vm10, %v3037_v19, %v3041_v36  ;;  %v3040_v14 = vsel %vm2694_vm10, %v3034_v35, %v3039_v31  ;;  %v3094_v43 = vstv %s6317_s7  ;;  %s6515_s7 = sld [smem:[#allocation2 + %s315_s29]]  ;;  %s335_s29 = sadd.s32 45, %s4195_s11 }
 0x259   : > { %v1860_v41 = vsel %vm525_vm2, %v7219_v11, %v7218_v59  ;;  %v1933_v8 = vsel %vm572_vm4, %v5652_v50, %v5650_v46  ;;  %v3073_v26 = vrot.slane %v3059_v63, 5  ;;  %v3074_v37 = vrot.slane %v3061_v21, 5  ;;  %v7224_v59 = vld [vmem:[#allocation14_spill] sm:$0xff]  ;;  %v7225_v11 = vld [vmem:[#allocation15_spill] sm:$0xff] }
 0x25a   : > { %v6356_v51 = vpop.permute.xlu1 %2449  ;;  %v6358_v17 = vpop.permute.xlu0 %2447  ;;  %v1900_v0 = vadd.f32 %v1896_v45, %v1863_v18  ;;  %v3070_v19 = vrot.slane %v3058_v12, 5  ;;  %v3071_v48 = vrot.slane %v6348_v28, 5  ;;  %v3062_v32 = vmul.f32 %v3057_v1, %v5927_v40 }
 0x25b   : > { %v1897_v35 = vsel %vm525_vm2, %v5632_v34, %v5630_v61  ;;  %v1970_v46 = vsel %vm572_vm4, %v5693_v56, %v5691_v52  ;;  %v3078_v50 = vrot.slane %v3063_v30, 5  ;;  %v3096_v53 = vmul.f32 %v3094_v43, %v5833_v58 }
 0x25c   : > { %3012 = vrot.lane.b32.xlu1 %v3005_v9, %s4074_s5  ;;  %3010 = vrot.lane.b32.xlu0 %v3003_v23, %s4074_s5  ;;  %v1864_v15 = vadd.f32 %v1860_v41, %v1827_v33  ;;  %v1937_v9 = vadd.f32 %v1933_v8, %v1900_v0  ;;  %v6387_v60 = vmul.f32 %v5977_v57, %v3094_v43  ;;  %v3076_v63 = vrot.slane %v3062_v32, 5  ;;  %v7226_v32 = vld [vmem:[#allocation12_spill] sm:$0xff] }
 0x25d   : > { %v3095_v1 = vmul.f32 %v3094_v43, %v5847_v16  ;;  %v1934_v61 = vsel %vm572_vm4, %v5670_v44, %v5668_v42  ;;  %v2007_v34 = vsel %vm619_vm5, %v5735_v2, %v5733_v24  ;;  %v3075_v52 = vsel %vm2694_vm10, %v3073_v26, %v3074_v37  ;;  %v7220_v44 = vld [vmem:[#allocation10_spill] sm:$0xff]  ;;  %v7221_v24 = vld [vmem:[#allocation11_spill] sm:$0xff] }
 0x25e   : > { %v6382_v36 = vpop.permute.xlu1 %2453  ;;  %v6384_v31 = vpop.permute.xlu0 %2451  ;;  %v6399_v56 = vmul.f32 %v5934_v6, %v3094_v43  ;;  %v1901_v58 = vadd.f32 %v1897_v35, %v1864_v15  ;;  %v1974_v23 = vadd.f32 %v1970_v46, %v1937_v9  ;;  %v3072_v16 = vsel %vm2694_vm10, %v3070_v19, %v3071_v48  ;;  %v7227_v35 = vld [vmem:[#allocation13_spill] sm:$0xff] }
 0x25f   : > { %v1971_v42 = vsel %vm572_vm4, %v5711_v7, %v5709_v10  ;;  %v2044_v2 = vsel %vm619_vm5, %v7221_v24, %v7220_v44  ;;  %v3079_v21 = vsel %vm2694_vm10, %v3074_v37, %v3078_v50  ;;  %v3110_v12 = vrot.slane %v3096_v53, 5  ;;  %v7222_v10 = vld [vmem:[#allocation8_spill] sm:$0xff]  ;;  %v7223_v7 = vld [vmem:[#allocation9_spill] sm:$0xff]  ;;  %v7228_v50 = vld [vmem:[#allocation18_spill] sm:$0xff] }
 0x260   : > { %3045 = vrot.lane.b32.xlu1 %v3038_v38, %s4075_s28  ;;  %3043 = vrot.lane.b32.xlu0 %v3035_v27, %s4075_s28  ;;  %v1938_v38 = vadd.f32 %v1934_v61, %v1901_v58  ;;  %v2011_v28 = vadd.f32 %v2007_v34, %v1974_v23  ;;  %v3111_v27 = vrot.slane %v6387_v60, 5  ;;  %v3107_v30 = vrot.slane %v3095_v1, 5  ;;  %v7229_v53 = vld [vmem:[#allocation19_spill] sm:$0xff]  ;;  %v7230_v23 = vld [vmem:[#allocation16_spill] sm:$0xff] }
 0x261   : > { %v2008_v18 = vsel %vm619_vm5, %v7223_v7, %v7222_v10  ;;  %v2081_v41 = vsel %vm666_vm6, %v7225_v11, %v7224_v59  ;;  %v3108_v8 = vrot.slane %v6399_v56, 5  ;;  %v3131_v26 = vstv %s6369_s1  ;;  %v7235_v10 = vld [vmem:[#allocation21_spill] sm:$0xff]  ;;  %s6554_s1 = sld [smem:[#allocation2 + %s333_s6]]  ;;  %s433_s6 = sadd.s32 94, %s4195_s11 }
 0x262   : > { %v6413_v33 = vpop.permute.xlu1 %2486  ;;  %v6415_v45 = vpop.permute.xlu0 %2484  ;;  %v1975_v37 = vadd.f32 %v1971_v42, %v1938_v38  ;;  %v2048_v0 = vadd.f32 %v2044_v2, %v2011_v28  ;;  %v3100_v19 = vmul.f32 %v3094_v43, %v5870_v49  ;;  %v2045_v46 = vsel %vm619_vm5, %v7227_v35, %v7226_v32  ;;  %v7231_v42 = vld [vmem:[#allocation17_spill] sm:$0xff]  ;;  %v7234_v28 = vld [vmem:[#allocation20_spill] sm:$0xff] }
 0x263   : > { %v2118_v15 = vsel %vm666_vm6, %v7229_v53, %v7228_v50  ;;  %v3077_v9 = vsel %vm2694_vm10, %v3071_v48, %v3076_v63  ;;  %v3099_v1 = vmul.f32 %v3094_v43, %v5873_v20  ;;  %v3112_v49 = vsel %vm2694_vm10, %v3110_v12, %v3111_v27  ;;  %v7232_v20 = vld [vmem:[#allocation22_spill] sm:$0xff]  ;;  %v7233_v43 = vld [vmem:[#allocation23_spill] sm:$0xff]  ;;  %v6479_v35 = vld [vmem:[%s4204_s10] sm:$0xc0] }
 0x264   : > { %3049 = vrot.lane.b32.xlu1 %v3042_v55, %s4075_s28  ;;  %3047 = vrot.lane.b32.xlu0 %v3040_v14, %s4075_s28  ;;  %v2012_v61 = vadd.f32 %v2008_v18, %v1975_v37  ;;  %v2085_v34 = vadd.f32 %v2081_v41, %v2048_v0  ;;  %v3133_v58 = vmul.f32 %v3131_v26, %v5895_v39  ;;  %v3115_v39 = vrot.slane %v3100_v19, 5  ;;  %v7237_v18 = vld [vmem:[#allocation27_spill] sm:$0xff]  ;;  %v7239_v50 = vld [vmem:[#allocation25_spill] sm:$0xff] }
 0x265   : > { %v2082_v48 = vsel %vm666_vm6, %v7231_v42, %v7230_v23  ;;  %v2155_v63 = vsel %vm713_vm7, %v7233_v43, %v7232_v20  ;;  %v3109_v44 = vsel %vm2694_vm10, %v3107_v30, %v3108_v8  ;;  %v6456_v24 = vmul.f32 %v6044_v3, %v3131_v26  ;;  %v7236_v30 = vld [vmem:[#allocation26_spill] sm:$0xff]  ;;  %v6491_v23 = vld [vmem:[%s4204_s10 + $0x20] sm:$0x3f] }
 0x266   : > { %v6438_v55 = vpop.permute.xlu1 %2490  ;;  %v6440_v14 = vpop.permute.xlu0 %2488  ;;  %v2049_v2 = vadd.f32 %v2045_v46, %v2012_v61  ;;  %v2122_v12 = vadd.f32 %v2118_v15, %v2085_v34  ;;  %v3132_v38 = vmul.f32 %v3131_v26, %v5907_v5  ;;  %v2119_v7 = vsel %vm666_vm6, %v7235_v10, %v7234_v28  ;;  %v7238_v46 = vld [vmem:[#allocation24_spill] sm:$0xff]  ;;  %v6488_v34 = vld [vmem:[%s4204_s10 + $0x28] sm:$0x3f] }
 0x267   : > { %v2192_v59 = vsel %vm713_vm7, %v7237_v18, %v7236_v30  ;;  %v3113_v11 = vrot.slane %v3099_v1, 5  ;;  %v3209_v41 = vstv %s6411_s21  ;;  %v3147_v19 = vrot.slane %v3133_v58, 5  ;;  %v7240_v43 = vld [vmem:[#allocation28_spill] sm:$0xff]  ;;  %s6582_s21 = sld [smem:[#allocation2 + %s413_s20]]  ;;  %s339_s20 = sadd.s32 47, %s4195_s11 }
 0x268   : > { %3082 = vrot.lane.b32.xlu1 %v3075_v52, %s4075_s28  ;;  %3080 = vrot.lane.b32.xlu0 %v3072_v16, %s4075_s28  ;;  %v6470_v52 = vld [vmem:[%s4204_s10 + $0x8] sm:$0xc0]  ;;  %v2086_v16 = vadd.f32 %v2082_v48, %v2049_v2  ;;  %v2159_v37 = vadd.f32 %v2155_v63, %v2122_v12  ;;  %v3134_v32 = vmul.f32 %v5923_v25, %v3131_v26  ;;  %v3148_v15 = vrot.slane %v6456_v24, 5 }
 0x269   : > { %v2156_v53 = vsel %vm713_vm7, %v7239_v50, %v7238_v46  ;;  %v3137_v1 = vmul.f32 %v3131_v26, %v5917_v13  ;;  %v3136_v61 = vmul.f32 %v3131_v26, %v5927_v40  ;;  %v3144_v48 = vrot.slane %v3132_v38, 5  ;;  %v7241_v63 = vld [vmem:[#allocation29_spill] sm:$0xff]  ;;  %v7243_v50 = vld [vmem:[#allocation31_spill] sm:$0xff] }
 0x26a   : > { %v6473_v0 = vpop.permute.xlu1 %2523  ;;  %v6475_v5 = vpop.permute.xlu0 %2521  ;;  %v2123_v42 = vadd.f32 %v2119_v7, %v2086_v16  ;;  %v2196_v58 = vadd.f32 %v2192_v59, %v2159_v37  ;;  %v3211_v20 = vmul.f32 %v3209_v41, %v6470_v52  ;;  %v2193_v13 = vsel %vm713_vm7, %v7241_v63, %v7240_v43  ;;  %v6546_v43 = vld [vmem:[%s4223_s24 + $0x28] sm:$0x3f]  ;;  %v7244_v63 = vld [vmem:[#allocation34_spill] sm:$0xff] }
 0x26b   : > { %v3213_v40 = vmul.f32 %v5977_v57, %v3209_v41  ;;  %v3210_v26 = vmul.f32 %v3209_v41, %v6479_v35  ;;  %v3212_v24 = vmul.f32 %v5934_v6, %v3209_v41  ;;  %v3215_v38 = vmul.f32 %v3209_v41, %v6488_v34 }
 0x26c   : > { %3086 = vrot.lane.b32.xlu1 %v3079_v21, %s4075_s28  ;;  %3084 = vrot.lane.b32.xlu0 %v3077_v9, %s4075_s28  ;;  %v2160_v2 = vadd.f32 %v2156_v53, %v2123_v42  ;;  %v3145_v9 = vrot.slane %v3134_v32, 5  ;;  %v3214_v28 = vmul.f32 %v3209_v41, %v6491_v23  ;;  %v3116_v10 = vsel %vm2694_vm10, %v3111_v27, %v3115_v39  ;;  %v6522_v27 = vld [vmem:[%s4223_s24 + $0x8] sm:$0xc0] }
 0x26d   : > { %v3114_v7 = vsel %vm2694_vm10, %v3108_v8, %v3113_v11  ;;  %v3152_v30 = vrot.slane %v3137_v1, 5  ;;  %v3150_v18 = vrot.slane %v3136_v61, 5  ;;  %v2217_v59 = vadd.f32 %v6260_v54, %v2196_v58 }
 0x26e   : > { %v6503_v12 = vpop.permute.xlu1 %2527  ;;  %v6505_v21 = vpop.permute.xlu0 %2525  ;;  %v2197_v16 = vadd.f32 %v2193_v13, %v2160_v2  ;;  %v3149_v60 = vsel %vm2694_vm10, %v3147_v19, %v3148_v15  ;;  %v3246_v56 = vstv %s6461_s25  ;;  %v3225_v39 = vrot.slane %v3211_v20, 6  ;;  %v7242_v19 = vld [vmem:[#allocation30_spill] sm:$0xff]  ;;  %v7245_v13 = vld [vmem:[#allocation35_spill] sm:$0xff]  ;;  %s6634_s25 = sld [smem:[#allocation2 + %s431_s2]]  ;;  %s437_s2 = sadd.s32 96, %s4195_s11 }
 0x26f   : > { %v3226_v8 = vrot.slane %v3213_v40, 6  ;;  %v3222_v11 = vrot.slane %v3210_v26, 6  ;;  %v3223_v41 = vrot.slane %v3212_v24, 6  ;;  %v3146_v54 = vsel %vm2694_vm10, %v3144_v48, %v3145_v9 }
 0x270   : > { %3119 = vrot.lane.b32.xlu1 %v3112_v49, %s4076_s9  ;;  %3117 = vrot.lane.b32.xlu0 %v3109_v44, %s4076_s9  ;;  %v3230_v49 = vrot.slane %v3215_v38, 6  ;;  %v3228_v46 = vrot.slane %v3214_v28, 6  ;;  %v6531_v44 = vld [vmem:[%s4223_s24] sm:$0xc0]  ;;  %v2270_v53 = vsel %vm478_vm1, %v7243_v50, %v7242_v19  ;;  %v3153_v1 = vsel %vm2694_vm10, %v3148_v15, %v3152_v30  ;;  %v7247_v30 = vld [vmem:[#allocation33_spill] sm:$0xff] }
 0x271   : > { %v3151_v61 = vsel %vm2694_vm10, %v3145_v9, %v3150_v18  ;;  %v3248_v42 = vmul.f32 %v3246_v56, %v6522_v27  ;;  %v2233_v58 = vadd.f32 %v6269_v62, %v2217_v59  ;;  %v2218_v48 = vadd.f32 %v6275_v22, %v2197_v16  ;;  %v7248_v59 = vld [vmem:[#allocation38_spill] sm:$0xff]  ;;  %v7249_v16 = vld [vmem:[#allocation39_spill] sm:$0xff]  ;;  %v7251_v50 = vld [vmem:[#allocation37_spill] sm:$0xff] }
 0x272   : > { %v6525_v37 = vpop.permute.xlu1 %2560  ;;  %v6527_v32 = vpop.permute.xlu0 %2558  ;;  %v3250_v20 = vmul.f32 %v6044_v3, %v3246_v56  ;;  %v2307_v15 = vsel %vm478_vm1, %v7245_v13, %v7244_v63  ;;  %v3227_v40 = vsel %vm3179_vm11, %v3225_v39, %v3226_v8  ;;  %v3224_v62 = vsel %vm3179_vm11, %v3222_v11, %v3223_v41  ;;  %v7253_v63 = vld [vmem:[#allocation43_spill] sm:$0xff] }
 0x273   : > { %v3247_v22 = vmul.f32 %v3246_v56, %v6531_v44  ;;  %v2274_v26 = vadd.f32 %v2270_v53, %v2233_v58  ;;  %v6562_v9 = vsel %vm3179_vm11, %v3226_v8, %v3230_v49  ;;  %v6565_v38 = vsel %vm3179_vm11, %v3223_v41, %v3228_v46  ;;  %v7250_v46 = vld [vmem:[#allocation36_spill] sm:$0xff]  ;;  %v7252_v58 = vld [vmem:[#allocation42_spill] sm:$0xff] }
 0x274   : > { %3123 = vrot.lane.b32.xlu1 %v3116_v10, %s4076_s9  ;;  %3121 = vrot.lane.b32.xlu0 %v3114_v7, %s4076_s9  ;;  %v3249_v28 = vmul.f32 %v5923_v25, %v3246_v56  ;;  %v6569_v10 = vld [vmem:[%s4223_s24 + $0x20] sm:$0x3f]  ;;  %v2344_v39 = vsel %vm525_vm2, %v7249_v16, %v7248_v59  ;;  %v2687_v11 = vstv %s6515_s7  ;;  %v3252_v19 = vmul.f32 %v3246_v56, %v6546_v43  ;;  %v7255_v59 = vld [vmem:[#allocation41_spill] sm:$0xff]  ;;  %s6698_s7 = sld [smem:[#allocation2 + %s335_s29]] }
 0x275   : > { %v7246_v7 = vld [vmem:[#allocation32_spill] sm:$0xff]  ;;  %v2234_v8 = vadd.f32 %v6322_v47, %v2218_v48  ;;  %v2311_v41 = vadd.f32 %v2307_v15, %v2274_v26  ;;  %v3262_v25 = vrot.slane %v3248_v42, 6  ;;  %v3263_v49 = vrot.slane %v3250_v20, 6 }
 0x276   : > { %v6557_v24 = vpop.permute.xlu1 %2564  ;;  %v6559_v2 = vpop.permute.xlu0 %2562  ;;  %v2271_v18 = vsel %vm478_vm1, %v7247_v30, %v7246_v7  ;;  %v2308_v53 = vsel %vm478_vm1, %v7251_v50, %v7250_v46  ;;  %v2381_v13 = vsel %vm525_vm2, %v7253_v63, %v7252_v58  ;;  %v3259_v7 = vrot.slane %v3247_v22, 6  ;;  %v7254_v30 = vld [vmem:[#allocation40_spill] sm:$0xff]  ;;  %v7256_v46 = vld [vmem:[#allocation46_spill] sm:$0xff]  ;;  %v7257_v50 = vld [vmem:[#allocation47_spill] sm:$0xff] }
 0x277   : > { %v3251_v47 = vmul.f32 %v3246_v56, %v6569_v10  ;;  %v2275_v48 = vadd.f32 %v2271_v18, %v2234_v8  ;;  %v2348_v15 = vadd.f32 %v2344_v39, %v2311_v41  ;;  %v6593_v20 = vmul.f32 %v5934_v6, %v2687_v11  ;;  %v7258_v6 = vld [vmem:[#allocation44_spill] sm:$0xff]  ;;  %v7259_v58 = vld [vmem:[#allocation45_spill] sm:$0xff] }
 0x278   : > { %3156 = vrot.lane.b32.xlu1 %v3149_v60, %s4076_s9  ;;  %3154 = vrot.lane.b32.xlu0 %v3146_v54, %s4076_s9  ;;  %v3947_v54 = vld [vmem:[%s4204_s10] sm:$0xe0]  ;;  %v2345_v16 = vsel %vm525_vm2, %v7255_v59, %v7254_v30  ;;  %v2418_v22 = vsel %vm572_vm4, %v7257_v50, %v7256_v46  ;;  %v3260_v56 = vrot.slane %v3249_v28, 6  ;;  %v3267_v18 = vrot.slane %v3252_v19, 6 }
 0x279   : > { %v2688_v42 = vmul.f32 %v3947_v54, %v2687_v11  ;;  %v2312_v39 = vadd.f32 %v2308_v53, %v2275_v48  ;;  %v2385_v8 = vadd.f32 %v2381_v13, %v2348_v15  ;;  %v6604_v41 = vsel %vm3179_vm11, %v3262_v25, %v3263_v49 }
 0x27a   : > { %v2598_v60 = vpop.permute.xlu1 %2597  ;;  %v2596_v26 = vpop.permute.xlu0 %2595  ;;  %v2382_v63 = vsel %vm525_vm2, %v7259_v58, %v7258_v6  ;;  %v2455_v54 = vsel %vm572_vm4, %v6358_v17, %v6356_v51  ;;  %v3265_v30 = vrot.slane %v3251_v47, 6  ;;  %v6613_v28 = vstv %s6554_s1  ;;  %s337_s1 = sadd.s32 46, %s4195_s11 }
 0x27b   : > { %v2349_v19 = vadd.f32 %v2345_v16, %v2312_v39  ;;  %v2695_v13 = vrot.slane %v2688_v42, 5  ;;  %v2696_v25 = vrot.slane %v6593_v20, 5  ;;  %v2419_v48 = vsel %vm572_vm4, %v6334_v4, %v6332_v29  ;;  %v6675_v39 = vld [vmem:[%s4223_s24 + $0x10] sm:$0xff] }
 0x27c   : > { %3160 = vrot.lane.b32.xlu1 %v3153_v1, %s4076_s9  ;;  %3158 = vrot.lane.b32.xlu0 %v3151_v61, %s4076_s9  ;;  %v2422_v1 = vadd.f32 %v2418_v22, %v2385_v8  ;;  %v2492_v51 = vsel %vm619_vm5, %v6415_v45, %v6413_v33  ;;  %v3261_v17 = vsel %vm3179_vm11, %v3259_v7, %v3260_v56  ;;  %v2704_v29 = vstv %s6582_s21  ;;  %s340_s21 = sld [smem:[#allocation2 + %s339_s20]] }
 0x27d   : > { %v6625_v47 = vsel %vm3179_vm11, %v3263_v49, %v3267_v18  ;;  %v2386_v15 = vadd.f32 %v2382_v63, %v2349_v19  ;;  %v6631_v42 = vmul.f32 %v6613_v28, %v6470_v52  ;;  %v2456_v4 = vsel %vm572_vm4, %v6384_v31, %v6382_v36 }
 0x27e   : > { %v2602_v53 = vpop.permute.xlu1 %2601  ;;  %v2600_v61 = vpop.permute.xlu0 %2599  ;;  %v2459_v59 = vadd.f32 %v2455_v54, %v2422_v1  ;;  %v2529_v33 = vsel %vm619_vm5, %v6475_v5, %v6473_v0  ;;  %v3266_v45 = vsel %vm3179_vm11, %v3260_v56, %v3265_v30  ;;  %v2697_v46 = vsel %vm2694_vm10, %v2695_v13, %v2696_v25  ;;  %v6658_v5 = vld [vmem:[%s4204_s10 + $0x10] sm:$0xff] }
 0x27f   : > { %v2423_v49 = vadd.f32 %v2419_v48, %v2386_v15  ;;  %v6647_v50 = vmul.f32 %v5977_v57, %v6613_v28  ;;  %v2493_v36 = vsel %vm619_vm5, %v6440_v14, %v6438_v55  ;;  %v2566_v31 = vsel %vm666_vm6, %v6527_v32, %v6525_v37  ;;  %v3950_v14 = vld [vmem:[%s4223_s24] sm:$0xe0] }
 0x280   : > { %3234 = vrot.lane.b32.xlu1 %v3227_v40, %s7013_s0  ;;  %3232 = vrot.lane.b32.xlu0 %v3224_v62, %s7013_s0  ;;  %v3948_v40 = vld [vmem:[%s4204_s10 + $0x20] sm:$0x1f]  ;;  %v2496_v7 = vadd.f32 %v2492_v51, %v2459_v59  ;;  %v3284_v0 = vmul.f32 %v6613_v28, %v6479_v35  ;;  %v3299_v55 = vrot.slane %v6631_v42, 6  ;;  %v2705_v37 = vmul.f32 %v3950_v14, %v2704_v29 }
 0x281   : > { %v2690_v62 = vmul.f32 %v3948_v40, %v2687_v11  ;;  %v6662_v11 = vmul.f32 %v6658_v5, %v6613_v28  ;;  %v2460_v57 = vadd.f32 %v2456_v4, %v2423_v49  ;;  %v2530_v32 = vsel %vm619_vm5, %v6505_v21, %v6503_v12 }
 0x282   : > { %v2635_v20 = vpop.permute.xlu1 %2634  ;;  %v2633_v16 = vpop.permute.xlu0 %2632  ;;  %v2533_v22 = vadd.f32 %v2529_v33, %v2496_v7  ;;  %v2603_v56 = vsel %vm666_vm6, %v2596_v26, %v2598_v60  ;;  %v6678_v8 = vmul.f32 %v6675_v39, %v2704_v29  ;;  %v3300_v63 = vrot.slane %v6647_v50, 6  ;;  %v3952_v33 = vld [vmem:[%s4223_s24 + $0x20] sm:$0x1f] }
 0x283   : > { %v2698_v18 = vrot.slane %v2690_v62, 5  ;;  %v3289_v54 = vmul.f32 %v6613_v28, %v6488_v34  ;;  %v2567_v12 = vsel %vm666_vm6, %v6559_v2, %v6557_v24  ;;  %v2640_v21 = vsel %vm713_vm7, %v2633_v16, %v2635_v20 }
 0x284   : > { %3238 = vrot.lane.b32.xlu1 %v6562_v9, %s7013_s0  ;;  %3236 = vrot.lane.b32.xlu0 %v6565_v38, %s7013_s0  ;;  %v2497_v9 = vadd.f32 %v2493_v36, %v2460_v57  ;;  %v2570_v6 = vadd.f32 %v2566_v31, %v2533_v22  ;;  %v3296_v60 = vrot.slane %v3284_v0, 6  ;;  %v3297_v26 = vrot.slane %v6662_v11, 6 }
 0x285   : > { %v2711_v1 = vrot.slane %v2705_v37, 5  ;;  %v3320_v13 = vstv %s6634_s25  ;;  %v2604_v48 = vsel %vm666_vm6, %v2600_v61, %v2602_v53  ;;  %v2699_v51 = vsel %vm2694_vm10, %v2696_v25, %v2698_v18  ;;  %s341_s25 = sadd.s32 48, %s4195_s11 }
 0x286   : > { %v2639_v38 = vpop.permute.xlu1 %2638  ;;  %v2637_v58 = vpop.permute.xlu0 %2636  ;;  %v2534_v30 = vadd.f32 %v2530_v32, %v2497_v9  ;;  %v2607_v19 = vadd.f32 %v2603_v56, %v2570_v6  ;;  %v2712_v24 = vrot.slane %v6678_v8, 5  ;;  %v3288_v2 = vmul.f32 %v6613_v28, %v6491_v23  ;;  %s342_s29 = sld [smem:[#allocation2 + %s341_s25]] }
 0x287   : > { %v2641_v40 = vsel %vm713_vm7, %v2637_v58, %v2639_v38  ;;  %v3322_v61 = vmul.f32 %v3320_v13, %v6522_v27  ;;  %v3324_v25 = vmul.f32 %v6044_v3, %v3320_v13  ;;  %v3301_v49 = vsel %vm3179_vm11, %v3299_v55, %v3300_v63 }
 0x288   : > { %3271 = vrot.lane.b32.xlu1 %v6604_v41, %s7013_s0  ;;  %3269 = vrot.lane.b32.xlu0 %v3261_v17, %s7013_s0  ;;  %v2571_v15 = vadd.f32 %v2567_v12, %v2534_v30  ;;  %v2644_v59 = vadd.f32 %v2640_v21, %v2607_v19  ;;  %v3304_v41 = vrot.slane %v3289_v54, 6  ;;  %v2707_v17 = vmul.f32 %v3952_v33, %v2704_v29  ;;  %v6732_v19 = vld [vmem:[%s4204_s10 + $0x18] sm:$0xff]  ;;  %s6745_s10 = sld [smem:[#allocation2 + %s337_s1]] }
 0x289   : > { %v3298_v29 = vsel %vm3179_vm11, %v3296_v60, %v3297_v26  ;;  %v3302_v7 = vrot.slane %v3288_v2, 6  ;;  %v3321_v20 = vmul.f32 %v3320_v13, %v6531_v44  ;;  %v3323_v16 = vmul.f32 %v6675_v39, %v3320_v13 }
 0x28a   : > { %v2672_v42 = vpop.permute.xlu1 %2671  ;;  %v2670_v4 = vpop.permute.xlu0 %2669  ;;  %v2608_v62 = vadd.f32 %v2604_v48, %v2571_v15  ;;  %v2713_v0 = vsel %vm2694_vm10, %v2711_v1, %v2712_v24  ;;  %v2714_v11 = vrot.slane %v2707_v17, 5  ;;  %v3336_v57 = vrot.slane %v3322_v61, 6 }
 0x28b   : > { %v2677_v53 = vsel %vm713_vm7, %v2670_v4, %v2672_v42  ;;  %v3337_v22 = vrot.slane %v3324_v25, 6  ;;  %v3325_v14 = vmul.f32 %v3320_v13, %v6569_v10  ;;  %v3303_v37 = vsel %vm3179_vm11, %v3297_v26, %v3302_v7 }
 0x28c   : > { %v2681_v28 = vadd.f32 %v2677_v53, %v2644_v59  ;;  %3275 = vrot.lane.b32.xlu1 %v6625_v47, %s7013_s0  ;;  %3273 = vrot.lane.b32.xlu0 %v3266_v45, %s7013_s0  ;;  %v2645_v50 = vadd.f32 %v2641_v40, %v2608_v62  ;;  %v3305_v45 = vsel %vm3179_vm11, %v3300_v63, %v3304_v41  ;;  %v3333_v32 = vrot.slane %v3321_v20, 6  ;;  %s6722_s0 = sld [smem:[#allocation2 + %s433_s6]] }
 0x28d   : > { %v3334_v56 = vrot.slane %v3323_v16, 6  ;;  %v3357_v18 = vstv %s6698_s7  ;;  %v2715_v63 = vsel %vm2694_vm10, %v2712_v24, %v2714_v11  ;;  %v3338_v54 = vsel %vm3179_vm11, %v3336_v57, %v3337_v22  ;;  %s439_s7 = sadd.s32 97, %s4195_s11 }
 0x28e   : > { %v2702_v36 = vadd.f32 %v2697_v46, %v2681_v28  ;;  %v2676_v3 = vpop.permute.xlu1 %2675  ;;  %v2674_v31 = vpop.permute.xlu0 %2673  ;;  %v3326_v46 = vmul.f32 %v3320_v13, %v6546_v43  ;;  %v3339_v60 = vrot.slane %v3325_v14, 6  ;;  %v3359_v26 = vmul.f32 %v3357_v18, %v6470_v52 }
 0x28f   : > { %v2678_v47 = vsel %vm713_vm7, %v2674_v31, %v2676_v3  ;;  %v3335_v30 = vsel %vm3179_vm11, %v3333_v32, %v3334_v56  ;;  %v3361_v1 = vmul.f32 %v6732_v19, %v3357_v18  ;;  %v3358_v13 = vmul.f32 %v3357_v18, %v6479_v35 }
 0x290   : > { %v2682_v55 = vadd.f32 %v2678_v47, %v2645_v50  ;;  %3308 = vrot.lane.b32.xlu1 %v3301_v49, %s7014_s30  ;;  %3306 = vrot.lane.b32.xlu0 %v3298_v29, %s7014_s30  ;;  %v2718_v38 = vadd.f32 %v2713_v0, %v2702_v36  ;;  %v3341_v21 = vrot.slane %v3326_v46, 6  ;;  %v3360_v48 = vmul.f32 %v6658_v5, %v3357_v18  ;;  %v6753_v50 = vld [vmem:[%s4223_s24 + $0x18] sm:$0xff]  ;;  %s435_s24 = sadd.s32 95, %s4195_s11 }
 0x291   : > { %v3363_v59 = vmul.f32 %v3357_v18, %v6488_v34  ;;  %v3362_v42 = vmul.f32 %v3357_v18, %v6491_v23  ;;  %v3340_v33 = vsel %vm3179_vm11, %v3334_v56, %v3339_v60  ;;  %v3373_v17 = vrot.slane %v3359_v26, 6 }
 0x292   : > { %v2703_v8 = vadd.f32 %v2699_v51, %v2682_v55  ;;  %v2750_v9 = vpop.permute.xlu1 %2749  ;;  %v2748_v6 = vpop.permute.xlu0 %2747  ;;  %v3342_v41 = vsel %vm3179_vm11, %v3337_v22, %v3341_v21  ;;  %v3374_v40 = vrot.slane %v3361_v1, 6  ;;  %v3370_v53 = vrot.slane %v3358_v13, 6 }
 0x293   : > { %v2755_v58 = vsel %vm478_vm1, %v2748_v6, %v2750_v9  ;;  %v3371_v61 = vrot.slane %v3360_v48, 6  ;;  %v3394_v25 = vstv %s6722_s0  ;;  %v3378_v29 = vrot.slane %v3363_v59, 6  ;;  %s427_s0 = sadd.s32 91, %s4195_s11 }
 0x294   : > { %v2759_v12 = vadd.f32 %v2755_v58, %v2718_v38  ;;  %3312 = vrot.lane.b32.xlu1 %v3305_v45, %s7014_s30  ;;  %3310 = vrot.lane.b32.xlu0 %v3303_v37, %s7014_s30  ;;  %v2719_v24 = vadd.f32 %v2715_v63, %v2703_v8  ;;  %v3376_v7 = vrot.slane %v3362_v42, 6  ;;  %v3396_v16 = vmul.f32 %v3394_v25, %v6522_v27  ;;  %s428_s1 = sld [smem:[#allocation2 + %s427_s0]] }
 0x295   : > { %v3398_v36 = vmul.f32 %v6753_v50, %v3394_v25  ;;  %v3375_v3 = vsel %vm3179_vm11, %v3373_v17, %v3374_v40  ;;  %v3372_v31 = vsel %vm3179_vm11, %v3370_v53, %v3371_v61  ;;  %v3395_v0 = vmul.f32 %v3394_v25, %v6531_v44 }
 0x296   : > { %v2754_v51 = vpop.permute.xlu1 %2753  ;;  %v2752_v2 = vpop.permute.xlu0 %2751  ;;  %v3397_v11 = vmul.f32 %v6675_v39, %v3394_v25  ;;  %v3379_v22 = vsel %vm3179_vm11, %v3374_v40, %v3378_v29  ;;  %v3377_v55 = vsel %vm3179_vm11, %v3371_v61, %v3376_v7  ;;  %v3410_v14 = vrot.slane %v3396_v16, 6 }
 0x297   : > { %v2756_v15 = vsel %vm478_vm1, %v2752_v2, %v2754_v51  ;;  %v3411_v37 = vrot.slane %v3398_v36, 6  ;;  %v3431_v32 = vstv %s6745_s10  ;;  %v3407_v56 = vrot.slane %v3395_v0, 6 }
 0x298   : > { %v2760_v4 = vadd.f32 %v2756_v15, %v2719_v24  ;;  %3345 = vrot.lane.b32.xlu1 %v3338_v54, %s7014_s30  ;;  %3343 = vrot.lane.b32.xlu0 %v3335_v30, %s7014_s30  ;;  %v3408_v18 = vrot.slane %v3397_v11, 6  ;;  %v3400_v8 = vmul.f32 %v3394_v25, %v6546_v43  ;;  %v3399_v9 = vmul.f32 %v3394_v25, %v6569_v10 }
 0x299   : > { %v3433_v63 = vmul.f32 %v3431_v32, %v6470_v52  ;;  %v3435_v54 = vmul.f32 %v6732_v19, %v3431_v32  ;;  %v3432_v21 = vmul.f32 %v3431_v32, %v6479_v35  ;;  %v3434_v60 = vmul.f32 %v6658_v5, %v3431_v32 }
 0x29a   : > { %v2787_v62 = vpop.permute.xlu1 %2786  ;;  %v2785_v28 = vpop.permute.xlu0 %2784  ;;  %v3412_v26 = vsel %vm3179_vm11, %v3410_v14, %v3411_v37  ;;  %v3409_v30 = vsel %vm3179_vm11, %v3407_v56, %v3408_v18  ;;  %v3415_v1 = vrot.slane %v3400_v8, 6  ;;  %v3413_v13 = vrot.slane %v3399_v9, 6 }
 0x29b   : > { %v2792_v49 = vsel %vm478_vm1, %v2785_v28, %v2787_v62  ;;  %v3447_v2 = vrot.slane %v3433_v63, 6  ;;  %v3437_v15 = vmul.f32 %v3431_v32, %v6488_v34  ;;  %v3436_v59 = vmul.f32 %v3431_v32, %v6491_v23 }
 0x29c   : > { %v2796_v20 = vadd.f32 %v2792_v49, %v2759_v12  ;;  %3349 = vrot.lane.b32.xlu1 %v3342_v41, %s7014_s30  ;;  %3347 = vrot.lane.b32.xlu0 %v3340_v33, %s7014_s30  ;;  %s6769_s30 = sld [smem:[#allocation2 + %s435_s24]]  ;;  %v3444_v41 = vrot.slane %v3432_v21, 6  ;;  %v3445_v33 = vrot.slane %v3434_v60, 6  ;;  %v3416_v17 = vsel %vm3179_vm11, %v3411_v37, %v3415_v1  ;;  %s3818_s24 = sshll.u32 %s4052_s15, 1 }
 0x29d   : > { %v3414_v40 = vsel %vm3179_vm11, %v3408_v18, %v3413_v13  ;;  %v3452_v28 = vrot.slane %v3437_v15, 6  ;;  %v3450_v49 = vrot.slane %v3436_v59, 6  ;;  %v3505_v14 = vstv %s340_s21 }
 0x29e   : > { %v2791_v47 = vpop.permute.xlu1 %2790  ;;  %v2789_v45 = vpop.permute.xlu0 %2788 }
 0x29f   : > { %v2793_v57 = vsel %vm478_vm1, %v2789_v45, %v2791_v47 }
 0x2a0   : > { %v2797_v46 = vadd.f32 %v2793_v57, %v2760_v4  ;;  %3382 = vrot.lane.b32.xlu1 %v3375_v3, %s4073_s4  ;;  %3380 = vrot.lane.b32.xlu0 %v3372_v31, %s4073_s4  ;;  %v3448_v4 = vrot.slane %v3435_v54, 6  ;;  %v3451_v57 = vsel %vm3179_vm11, %v3445_v33, %v3450_v49 }
 0x2a2   : > { %v2824_v6 = vpop.permute.xlu1 %2823  ;;  %v2822_v38 = vpop.permute.xlu0 %2821  ;;  %v3468_v25 = vstv %s6769_s30  ;;  %v3449_v7 = vsel %vm3179_vm11, %v3447_v2, %v3448_v4  ;;  %v3453_v45 = vsel %vm3179_vm11, %v3448_v4, %v3452_v28  ;;  %v3511_v2 = vmul.f32 %v3505_v14, %v6488_v34  ;;  %s3819_s30 = sshll.u32 %s4056_s16, 3 }
 0x2a3   : > { %v2829_v58 = vsel %vm525_vm2, %v2822_v38, %v2824_v6  ;;  %v3470_v16 = vmul.f32 %v3468_v25, %v6522_v27  ;;  %v3472_v36 = vmul.f32 %v6753_v50, %v3468_v25  ;;  %v3469_v3 = vmul.f32 %v3468_v25, %v6531_v44  ;;  %s3683_s21 = sadd.s32 %s3819_s30, %s3818_s24 }
 0x2a4   : > { %v2833_v12 = vadd.f32 %v2829_v58, %v2796_v20  ;;  %3386 = vrot.lane.b32.xlu1 %v3379_v22, %s4073_s4  ;;  %3384 = vrot.lane.b32.xlu0 %v3377_v55, %s4073_s4  ;;  %v3446_v20 = vsel %vm3179_vm11, %v3444_v41, %v3445_v33  ;;  %v3471_v31 = vmul.f32 %v6675_v39, %v3468_v25 }
 0x2a5   : > { %v3474_v55 = vmul.f32 %v3468_v25, %v6546_v43  ;;  %v3484_v37 = vrot.slane %v3470_v16, 6  ;;  %v3485_v32 = vrot.slane %v3472_v36, 6  ;;  %v3481_v56 = vrot.slane %v3469_v3, 6 }
 0x2a6   : > { %v2828_v48 = vpop.permute.xlu1 %2827  ;;  %v2826_v51 = vpop.permute.xlu0 %2825  ;;  %v3482_v18 = vrot.slane %v3471_v31, 6  ;;  %v3507_v38 = vmul.f32 %v3505_v14, %v6470_v52  ;;  %v3509_v58 = vmul.f32 %v6732_v19, %v3505_v14  ;;  %v3510_v33 = vmul.f32 %v3505_v14, %v6491_v23 }
 0x2a7   : > { %v2830_v24 = vsel %vm525_vm2, %v2826_v51, %v2828_v48  ;;  %v3489_v54 = vrot.slane %v3474_v55, 6  ;;  %v3486_v21 = vsel %vm3179_vm11, %v3484_v37, %v3485_v32 }
 0x2a8   : > { %v2834_v42 = vadd.f32 %v2830_v24, %v2797_v46  ;;  %3419 = vrot.lane.b32.xlu1 %v3412_v26, %s4073_s4  ;;  %3417 = vrot.lane.b32.xlu0 %v3409_v30, %s4073_s4  ;;  %v3473_v46 = vmul.f32 %v3468_v25, %v6569_v10  ;;  %v3483_v60 = vsel %vm3179_vm11, %v3481_v56, %v3482_v18  ;;  %v3521_v51 = vrot.slane %v3507_v38, 6 }
 0x2a9   : > { %v3506_v26 = vmul.f32 %v3505_v14, %v6479_v35  ;;  %v3508_v30 = vmul.f32 %v6658_v5, %v3505_v14  ;;  %v3522_v24 = vrot.slane %v3509_v58, 6  ;;  %v3490_v59 = vsel %vm3179_vm11, %v3485_v32, %v3489_v54 }
 0x2aa   : > { %v2861_v53 = vpop.permute.xlu1 %2860  ;;  %v2859_v61 = vpop.permute.xlu0 %2858  ;;  %v3579_v32 = vstv %s342_s29 }
 0x2ab   : > { %v2866_v62 = vsel %vm525_vm2, %v2859_v61, %v2861_v53  ;;  %v3518_v4 = vrot.slane %v3506_v26, 6  ;;  %v3519_v41 = vrot.slane %v3508_v30, 6  ;;  %v3523_v25 = vsel %vm3179_vm11, %v3521_v51, %v3522_v24 }
 0x2ac   : > { %v2870_v29 = vadd.f32 %v2866_v62, %v2833_v12  ;;  %3423 = vrot.lane.b32.xlu1 %v3416_v17, %s4073_s4  ;;  %3421 = vrot.lane.b32.xlu0 %v3414_v40, %s4073_s4  ;;  %s438_s4 = sld [smem:[#allocation2 + %s437_s2]]  ;;  %v3487_v12 = vrot.slane %v3473_v46, 6  ;;  %v3526_v62 = vrot.slane %v3511_v2, 6  ;;  %s3820_s2 = sshll.u32 %s3683_s21, 7 }
 0x2ae   : > { %v2865_v0 = vpop.permute.xlu1 %2864  ;;  %v2863_v11 = vpop.permute.xlu0 %2862 }
 0x2af   : > { %v2867_v47 = vsel %vm525_vm2, %v2863_v11, %v2865_v0  ;;  %v3527_v11 = vsel %vm3179_vm11, %v3522_v24, %v3526_v62  ;;  %v3584_v24 = vmul.f32 %v3579_v32, %v6491_v23 }
 0x2b0   : > { %v2871_v22 = vadd.f32 %v2867_v47, %v2834_v42  ;;  %3456 = vrot.lane.b32.xlu1 %v3449_v7, %s4074_s5  ;;  %3454 = vrot.lane.b32.xlu0 %v3446_v20, %s4074_s5  ;;  %v3488_v42 = vsel %vm3179_vm11, %v3482_v18, %v3487_v12  ;;  %v3520_v7 = vsel %vm3179_vm11, %v3518_v4, %v3519_v41  ;;  %v3524_v20 = vrot.slane %v3510_v33, 6 }
 0x2b1   : > { %v3583_v12 = vmul.f32 %v6732_v19, %v3579_v32 }
 0x2b2   : > { %v2898_v8 = vpop.permute.xlu1 %2897  ;;  %v2896_v9 = vpop.permute.xlu0 %2895  ;;  %v3542_v17 = vstv %s438_s4  ;;  %v3525_v46 = vsel %vm3179_vm11, %v3519_v41, %v3524_v20 }
 0x2b3   : > { %v2903_v6 = vsel %vm572_vm4, %v2896_v9, %v2898_v8  ;;  %v3544_v49 = vmul.f32 %v3542_v17, %v6522_v27  ;;  %v3543_v16 = vmul.f32 %v3542_v17, %v6531_v44  ;;  %v3545_v36 = vmul.f32 %v6675_v39, %v3542_v17 }
 0x2b4   : > { %v2907_v63 = vadd.f32 %v2903_v6, %v2870_v29  ;;  %3460 = vrot.lane.b32.xlu1 %v3453_v45, %s4074_s5  ;;  %3458 = vrot.lane.b32.xlu0 %v3451_v57, %s4074_s5  ;;  %v3546_v29 = vmul.f32 %v6753_v50, %v3542_v17  ;;  %v3548_v47 = vmul.f32 %v3542_v17, %v6546_v43  ;;  %v3596_v2 = vrot.slane %v3583_v12, 6 }
 0x2b5   : > { %v3558_v57 = vrot.slane %v3544_v49, 6  ;;  %v3547_v55 = vmul.f32 %v3542_v17, %v6569_v10  ;;  %v3555_v14 = vrot.slane %v3543_v16, 6  ;;  %v3556_v37 = vrot.slane %v3545_v36, 6 }
 0x2b6   : > { %v2902_v1 = vpop.permute.xlu1 %2901  ;;  %v2900_v13 = vpop.permute.xlu0 %2899  ;;  %v3563_v9 = vrot.slane %v3548_v47, 6 }
 0x2b7   : > { %v2904_v48 = vsel %vm572_vm4, %v2900_v13, %v2902_v1  ;;  %v3561_v58 = vrot.slane %v3547_v55, 6  ;;  %v3557_v54 = vsel %vm3179_vm11, %v3555_v14, %v3556_v37 }
 0x2b8   : > { %v2908_v15 = vadd.f32 %v2904_v48, %v2871_v22  ;;  %3493 = vrot.lane.b32.xlu1 %v3486_v21, %s4074_s5  ;;  %3491 = vrot.lane.b32.xlu0 %v3483_v60, %s4074_s5  ;;  %v3559_v22 = vrot.slane %v3546_v29, 6  ;;  %v3580_v21 = vmul.f32 %v3579_v32, %v6479_v35  ;;  %v3582_v60 = vmul.f32 %v6658_v5, %v3579_v32 }
 0x2b9   : > { %v3585_v48 = vmul.f32 %v3579_v32, %v6488_v34 }
 0x2ba   : > { %v2935_v40 = vpop.permute.xlu1 %2934  ;;  %v2933_v53 = vpop.permute.xlu0 %2932  ;;  %v3560_v38 = vsel %vm3179_vm11, %v3558_v57, %v3559_v22  ;;  %v3564_v13 = vsel %vm3179_vm11, %v3559_v22, %v3563_v9 }
 0x2bb   : > { %v2940_v61 = vsel %vm572_vm4, %v2933_v53, %v2935_v40  ;;  %v3600_v17 = vrot.slane %v3585_v48, 6  ;;  %v3598_v40 = vrot.slane %v3584_v24, 6 }
 0x2bc   : > { %v2944_v28 = vadd.f32 %v2940_v61, %v2907_v63  ;;  %3497 = vrot.lane.b32.xlu1 %v3490_v59, %s4074_s5  ;;  %3495 = vrot.lane.b32.xlu0 %v3488_v42, %s4074_s5  ;;  %s440_s5 = sld [smem:[#allocation2 + %s439_s7]]  ;;  %v3581_v63 = vmul.f32 %v3579_v32, %v6470_v52  ;;  %v3562_v52 = vsel %vm3179_vm11, %v3556_v37, %v3561_v58  ;;  %v3593_v59 = vrot.slane %v3582_v60, 6 }
 0x2bd   : > { %v3601_v16 = vsel %vm3179_vm11, %v3596_v2, %v3600_v17 }
 0x2be   : > { %v2939_v3 = vpop.permute.xlu1 %2938  ;;  %v2937_v31 = vpop.permute.xlu0 %2936  ;;  %v3595_v19 = vrot.slane %v3581_v63, 6 }
 0x2bf   : > { %v2941_v0 = vsel %vm572_vm4, %v2937_v31, %v2939_v3 }
 0x2c0   : > { %v2945_v45 = vadd.f32 %v2941_v0, %v2908_v15  ;;  %3530 = vrot.lane.b32.xlu1 %v3523_v25, %s4075_s28  ;;  %3528 = vrot.lane.b32.xlu0 %v3520_v7, %s4075_s28  ;;  %v3592_v15 = vrot.slane %v3580_v21, 6  ;;  %v3597_v25 = vsel %vm3179_vm11, %v3595_v19, %v3596_v2  ;;  %v3189_v19 = vstv %s428_s1 }
 0x2c1   : > { %v3191_v17 = vmul.f32 %v6675_v39, %v3189_v19 }
 0x2c2   : > { %v2972_v56 = vpop.permute.xlu1 %2971  ;;  %v2970_v18 = vpop.permute.xlu0 %2969  ;;  %v3616_v42 = vstv %s440_s5  ;;  %v3594_v62 = vsel %vm3179_vm11, %v3592_v15, %v3593_v59  ;;  %s6936_s5 = scalar_lea.hbm %s6995_s3, %s3820_s2 }
 0x2c3   : > { %v2977_v8 = vsel %vm619_vm5, %v2970_v18, %v2972_v56  ;;  %v3618_v53 = vmul.f32 %v3616_v42, %v6522_v27  ;;  %v3620_v61 = vmul.f32 %v6753_v50, %v3616_v42  ;;  %v3619_v49 = vmul.f32 %v6675_v39, %v3616_v42 }
 0x2c4   : > { %v2981_v6 = vadd.f32 %v2977_v8, %v2944_v28  ;;  %3534 = vrot.lane.b32.xlu1 %v3527_v11, %s4075_s28  ;;  %3532 = vrot.lane.b32.xlu0 %v3525_v46, %s4075_s28  ;;  %v3617_v28 = vmul.f32 %v3616_v42, %v6531_v44  ;;  %v3599_v27 = vsel %vm3179_vm11, %v3593_v59, %v3598_v40 }
 0x2c5   : > { %v3632_v50 = vrot.slane %v3618_v53, 6  ;;  %v3633_v3 = vrot.slane %v3620_v61, 6  ;;  %v3630_v0 = vrot.slane %v3619_v49, 6  ;;  %v3622_v11 = vmul.f32 %v3616_v42, %v6546_v43 }
 0x2c6   : > { %v2976_v26 = vpop.permute.xlu1 %2975  ;;  %v2974_v30 = vpop.permute.xlu0 %2973  ;;  %v3629_v31 = vrot.slane %v3617_v28, 6  ;;  %v3621_v47 = vmul.f32 %v3616_v42, %v6569_v10  ;;  %v3192_v28 = vmul.f32 %v3189_v19, %v6569_v10 }
 0x2c7   : > { %v2978_v1 = vsel %vm619_vm5, %v2974_v30, %v2976_v26  ;;  %v3634_v46 = vsel %vm3179_vm11, %v3632_v50, %v3633_v3  ;;  %v3637_v37 = vrot.slane %v3622_v11, 6 }
 0x2c8   : > { %v2982_v51 = vadd.f32 %v2978_v1, %v2945_v45  ;;  %3567 = vrot.lane.b32.xlu1 %v3560_v38, %s4075_s28  ;;  %3565 = vrot.lane.b32.xlu0 %v3557_v54, %s4075_s28  ;;  %v3631_v14 = vsel %vm3179_vm11, %v3629_v31, %v3630_v0  ;;  %v3635_v32 = vrot.slane %v3621_v47, 6 }
 0x2c9   : > { %v3638_v9 = vsel %vm3179_vm11, %v3633_v3, %v3637_v37 }
 0x2ca   : > { %v3009_v4 = vpop.permute.xlu1 %3008  ;;  %v3007_v41 = vpop.permute.xlu0 %3006 }
 0x2cb   : > { %v3014_v33 = vsel %vm619_vm5, %v3007_v41, %v3009_v4  ;;  %v3190_v4 = vmul.f32 %v3189_v19, %v6531_v44 }
 0x2cc   : > { %v3018_v34 = vadd.f32 %v3014_v33, %v2981_v6  ;;  %3571 = vrot.lane.b32.xlu1 %v3564_v13, %s4075_s28  ;;  %3569 = vrot.lane.b32.xlu0 %v3562_v52, %s4075_s28  ;;  %s329_s28 = sadd.s32 42, %s4195_s11  ;;  %v3636_v6 = vsel %vm3179_vm11, %v3630_v0, %v3635_v32 }
 0x2cd   : > { %s330_s6 = sld [smem:[#allocation2 + %s329_s28]]  ;;  %v3196_v53 = vrot.slane %v3190_v4, 6  ;;  %s4077_s28 = smov [#allocation5]  }
 0x2ce   : > { %v3013_v29 = vpop.permute.xlu1 %3012  ;;  %v3011_v7 = vpop.permute.xlu0 %3010 }
 0x2cf   : > { %v3015_v20 = vsel %vm619_vm5, %v3011_v7, %v3013_v29 }
 0x2d0   : > { %v3019_v36 = vadd.f32 %v3015_v20, %v2982_v51  ;;  %3604 = vrot.lane.b32.xlu1 %v3597_v25, %s4076_s9  ;;  %3602 = vrot.lane.b32.xlu0 %v3594_v62, %s4076_s9  ;;  %v3197_v62 = vrot.slane %v3191_v17, 6 }
 0x2d2   : > { %v3046_v45 = vpop.permute.xlu1 %3045  ;;  %v3044_v57 = vpop.permute.xlu0 %3043  ;;  %v3198_v20 = vsel %vm3179_vm11, %v3196_v53, %v3197_v62 }
 0x2d3   : > { %v3051_v22 = vsel %vm666_vm6, %v3044_v57, %v3046_v45  ;;  %v3172_v26 = vstv %s330_s6  ;;  %s3974_s6 = sshll.u32 %s4077_s28, 4  ;;  %s3975_s6 = int_to_ptr.vmem [resolvable:$false] %s3974_s6 }
 0x2d4   : > { %v3055_v55 = vadd.f32 %v3051_v22, %v3018_v34  ;;  %3608 = vrot.lane.b32.xlu1 %v3601_v16, %s4076_s9  ;;  %3606 = vrot.lane.b32.xlu0 %v3599_v27, %s4076_s9  ;;  %v3173_v48 = vmul.f32 %v3172_v26, %v6479_v35  ;;  %v3174_v51 = vmul.f32 %v6658_v5, %v3172_v26  ;;  %v3199_v16 = vrot.slane %v3192_v28, 6  ;;  %s3976_s0 = scalar_lea.vmem %s3975_s6, 512 }
 0x2d5   : > { %v3175_v33 = vmul.f32 %v3172_v26, %v6491_v23 }
 0x2d6   : > { %v3050_v43 = vpop.permute.xlu1 %3049  ;;  %v3048_v56 = vpop.permute.xlu0 %3047  ;;  %v3180_v59 = vrot.slane %v3173_v48, 6  ;;  %v3181_v42 = vrot.slane %v3174_v51, 6  ;;  %v3200_v10 = vsel %vm3179_vm11, %v3197_v62, %v3199_v16 }
 0x2d7   : > { %v3052_v18 = vsel %vm666_vm6, %v3048_v56, %v3050_v43  ;;  %v3183_v25 = vrot.slane %v3175_v33, 6 }
 0x2d8   : > { %v3056_v8 = vadd.f32 %v3052_v18, %v3019_v36  ;;  %3641 = vrot.lane.b32.xlu1 %v3634_v46, %s4076_s9  ;;  %3639 = vrot.lane.b32.xlu0 %v3631_v14, %s4076_s9  ;;  %v3182_v5 = vsel %vm3179_vm11, %v3180_v59, %v3181_v42 }
 0x2d9   : > { %v3184_v23 = vsel %vm3179_vm11, %v3181_v42, %v3183_v25 }
 0x2da   : > { %v3083_v38 = vpop.permute.xlu1 %3082  ;;  %v3081_v58 = vpop.permute.xlu0 %3080 }
 0x2db   : > { %v3088_v63 = vsel %vm666_vm6, %v3081_v58, %v3083_v38 }
 0x2dc   : > { %v3092_v54 = vadd.f32 %v3088_v63, %v3055_v55  ;;  %3645 = vrot.lane.b32.xlu1 %v3638_v9, %s4076_s9  ;;  %3643 = vrot.lane.b32.xlu0 %v3636_v6, %s4076_s9  ;;  %s441_s9 = sadd.s32 98, %s4195_s11  ;;  %s224_s11 = sand.u32 1, %s4044_s13  }
 0x2dd   : > { %s6919_s10 = sld [smem:[#allocation2 + %s441_s9]]  ;;  %s3811_s20 = sshll.u32 %s224_s11, 4 }
 0x2de   : > { %v3087_v12 = vpop.permute.xlu1 %3086  ;;  %v3085_v21 = vpop.permute.xlu0 %3084  ;;  %s226_s4 = scalar_lea.vmem [#allocation5], %s3811_s20  ;;  %s6940_s15 = scalar_lea.sflag [#allocation3], %s224_s11 }
 0x2df   : > { %v3089_v60 = vsel %vm666_vm6, %v3085_v21, %v3087_v12  ;;  %s3686_s25 = sshll.u32 %s226_s4, 4  ;;  %s6938_s25 = int_to_ptr.vmem [resolvable:$true] %s3686_s25 }
 0x2e0   : > { %v3093_v30 = vadd.f32 %v3089_v60, %v3056_v8  ;;  %s3970_s16 = scalar_lea.vmem %s6938_s25, 256  ;;  %p3977_p0 = scmp.lt.s32.totalorder %s6938_s25, %s3975_s6 }
 0x2e1   : > { %p3971_p8 = scmp.ne.s32.totalorder %s6938_s25, %s3970_s16  ;;  %p3978_p1 = scmp.lt.s32.totalorder %s3976_s0, %s3970_s16 }
 0x2e2   : > { %v3120_v1 = vpop.permute.xlu1 %3119  ;;  %v3118_v13 = vpop.permute.xlu0 %3117 }
 0x2e3   : > { %v3125_v52 = vsel %vm713_vm7, %v3118_v13, %v3120_v1  ;;  %p3972_p10 = pnand %p3971_p8, %p4152_p3  ;;  %p3979_p2 = por %p3978_p1, %p3977_p0 }
 0x2e4   : > { %v3129_v24 = vadd.f32 %v3125_v52, %v3092_v54 }
 0x2e5   : > { %p3973_p12 = pneg %p3972_p10 }
 0x2e6   : > { %v3124_v2 = vpop.permute.xlu1 %3123  ;;  %v3122_v15 = vpop.permute.xlu0 %3121 }
 0x2e7   : > { %v3126_v41 = vsel %vm713_vm7, %v3122_v15, %v3124_v2  ;;  %p3980_p4 = pnand %p3979_p2, %p3973_p12 }
 0x2e8   : > { %v3130_v34 = vadd.f32 %v3126_v41, %v3093_v30 }
 0x2ea   : > { %v3157_v35 = vpop.permute.xlu1 %3156  ;;  %v3155_v40 = vpop.permute.xlu0 %3154 }
 0x2eb   : > { %v3162_v61 = vsel %vm713_vm7, %v3155_v40, %v3157_v35 }
 0x2ec   : > { %v3166_v49 = vadd.f32 %v3162_v61, %v3129_v24 }
 0x2ee   : > { %v3187_v44 = vadd.f32 %v3182_v5, %v3166_v49  ;;  %v3161_v29 = vpop.permute.xlu1 %3160  ;;  %v3159_v7 = vpop.permute.xlu0 %3158 }
 0x2ef   : > { %v3163_v39 = vsel %vm713_vm7, %v3159_v7, %v3161_v29 }
 0x2f0   : > { %v3167_v36 = vadd.f32 %v3163_v39, %v3130_v34  ;;  %v3203_v31 = vadd.f32 %v3198_v20, %v3187_v44 }
 0x2f2   : > { %v3188_v27 = vadd.f32 %v3184_v23, %v3167_v36  ;;  %v3235_v50 = vpop.permute.xlu1 %3234  ;;  %v3233_v3 = vpop.permute.xlu0 %3232 }
 0x2f3   : > { %v3240_v0 = vsel %vm478_vm1, %v3233_v3, %v3235_v50 }
 0x2f4   : > { %v3244_v11 = vadd.f32 %v3240_v0, %v3203_v31  ;;  %v3204_v45 = vadd.f32 %v3200_v10, %v3188_v27 }
 0x2f6   : > { %v3239_v47 = vpop.permute.xlu1 %3238  ;;  %v3237_v57 = vpop.permute.xlu0 %3236 }
 0x2f7   : > { %v3241_v22 = vsel %vm478_vm1, %v3237_v57, %v3239_v47 }
 0x2f8   : > { %v3245_v55 = vadd.f32 %v3241_v22, %v3204_v45 }
 0x2fa   : > { %v3272_v46 = vpop.permute.xlu1 %3271  ;;  %v3270_v14 = vpop.permute.xlu0 %3269 }
 0x2fb   : > { %v3277_v4 = vsel %vm478_vm1, %v3270_v14, %v3272_v46 }
 0x2fc   : > { %v3281_v34 = vadd.f32 %v3277_v4, %v3244_v11 }
 0x2fe   : > { %v3276_v37 = vpop.permute.xlu1 %3275  ;;  %v3274_v32 = vpop.permute.xlu0 %3273 }
 0x2ff   : > { %v3278_v35 = vsel %vm478_vm1, %v3274_v32, %v3276_v37 }
 0x300   : > { %v3282_v28 = vadd.f32 %v3278_v35, %v3245_v55 }
 0x302   : > { %v3309_v43 = vpop.permute.xlu1 %3308  ;;  %v3307_v56 = vpop.permute.xlu0 %3306 }
 0x303   : > { %v3314_v17 = vsel %vm525_vm2, %v3307_v56, %v3309_v43 }
 0x304   : > { %v3318_v40 = vadd.f32 %v3314_v17, %v3281_v34 }
 0x306   : > { %v3313_v18 = vpop.permute.xlu1 %3312  ;;  %v3311_v8 = vpop.permute.xlu0 %3310 }
 0x307   : > { %v3315_v25 = vsel %vm525_vm2, %v3311_v8, %v3313_v18 }
 0x308   : > { %v3319_v7 = vadd.f32 %v3315_v25, %v3282_v28 }
 0x30a   : > { %v3346_v9 = vpop.permute.xlu1 %3345  ;;  %v3344_v6 = vpop.permute.xlu0 %3343 }
 0x30b   : > { %v3351_v5 = vsel %vm525_vm2, %v3344_v6, %v3346_v9 }
 0x30c   : > { %v3355_v49 = vadd.f32 %v3351_v5, %v3318_v40 }
 0x30e   : > { %v3350_v38 = vpop.permute.xlu1 %3349  ;;  %v3348_v58 = vpop.permute.xlu0 %3347 }
 0x30f   : > { %v3352_v44 = vsel %vm525_vm2, %v3348_v58, %v3350_v38 }
 0x310   : > { %v3356_v27 = vadd.f32 %v3352_v44, %v3319_v7 }
 0x312   : > { %v3383_v63 = vpop.permute.xlu1 %3382  ;;  %v3381_v54 = vpop.permute.xlu0 %3380 }
 0x313   : > { %v3388_v62 = vsel %vm572_vm4, %v3381_v54, %v3383_v63 }
 0x314   : > { %v3392_v23 = vadd.f32 %v3388_v62, %v3355_v49 }
 0x316   : > { %v3387_v12 = vpop.permute.xlu1 %3386  ;;  %v3385_v21 = vpop.permute.xlu0 %3384 }
 0x317   : > { %v3389_v16 = vsel %vm572_vm4, %v3385_v21, %v3387_v12 }
 0x318   : > { %v3393_v0 = vadd.f32 %v3389_v16, %v3356_v27 }
 0x31a   : > { %v3420_v60 = vpop.permute.xlu1 %3419  ;;  %v3418_v26 = vpop.permute.xlu0 %3417 }
 0x31b   : > { %v3425_v29 = vsel %vm572_vm4, %v3418_v26, %v3420_v60  ;;  %v3653_v60 = vstv %s6919_s10 }
 0x31c   : > { %v3429_v50 = vadd.f32 %v3425_v29, %v3392_v23 }
 0x31e   : > { %v3424_v30 = vpop.permute.xlu1 %3423  ;;  %v3422_v1 = vpop.permute.xlu0 %3421 }
 0x31f   : > { %v3426_v3 = vsel %vm572_vm4, %v3422_v1, %v3424_v30 }
 0x320   : > { %v3430_v22 = vadd.f32 %v3426_v3, %v3393_v0 }
 0x322   : > { %v3457_v13 = vpop.permute.xlu1 %3456  ;;  %v3455_v48 = vpop.permute.xlu0 %3454 }
 0x323   : > { %v3462_v36 = vsel %vm619_vm5, %v3455_v48, %v3457_v13 }
 0x324   : > { %v3466_v10 = vadd.f32 %v3462_v36, %v3429_v50 }
 0x326   : > { %v3461_v51 = vpop.permute.xlu1 %3460  ;;  %v3459_v52 = vpop.permute.xlu0 %3458 }
 0x327   : > { %v3463_v45 = vsel %vm619_vm5, %v3459_v52, %v3461_v51 }
 0x328   : > { %v3467_v37 = vadd.f32 %v3463_v45, %v3430_v22 }
 0x32a   : > { %v3494_v19 = vpop.permute.xlu1 %3493  ;;  %v3492_v24 = vpop.permute.xlu0 %3491 }
 0x32b   : > { %v3499_v31 = vsel %vm619_vm5, %v3492_v24, %v3494_v19 }
 0x32c   : > { %v3503_v55 = vadd.f32 %v3499_v31, %v3466_v10 }
 0x32e   : > { %v3498_v2 = vpop.permute.xlu1 %3497  ;;  %v3496_v15 = vpop.permute.xlu0 %3495 }
 0x32f   : > { %v3500_v46 = vsel %vm619_vm5, %v3496_v15, %v3498_v2 }
 0x330   : > { %v3504_v9 = vadd.f32 %v3500_v46, %v3467_v37 }
 0x332   : > { %v3531_v59 = vpop.permute.xlu1 %3530  ;;  %v3529_v42 = vpop.permute.xlu0 %3528 }
 0x333   : > { %v3536_v57 = vsel %vm666_vm6, %v3529_v42, %v3531_v59 }
 0x334   : > { %v3540_v32 = vadd.f32 %v3536_v57, %v3503_v55 }
 0x336   : > { %v3535_v41 = vpop.permute.xlu1 %3534  ;;  %v3533_v33 = vpop.permute.xlu0 %3532 }
 0x337   : > { %v3537_v18 = vsel %vm666_vm6, %v3533_v33, %v3535_v41 }
 0x338   : > { %v3541_v58 = vadd.f32 %v3537_v18, %v3504_v9 }
 0x33a   : > { %v3568_v53 = vpop.permute.xlu1 %3567  ;;  %v3566_v61 = vpop.permute.xlu0 %3565 }
 0x33b   : > { %v3573_v14 = vsel %vm666_vm6, %v3566_v61, %v3568_v53 }
 0x33c   : > { %v3577_v6 = vadd.f32 %v3573_v14, %v3540_v32 }
 0x33e   : > { %v3572_v39 = vpop.permute.xlu1 %3571  ;;  %v3570_v20 = vpop.permute.xlu0 %3569 }
 0x33f   : > { %v3574_v38 = vsel %vm666_vm6, %v3570_v20, %v3572_v39 }
 0x340   : > { %v3578_v30 = vadd.f32 %v3574_v38, %v3541_v58 }
 0x342   : > { %v3605_v11 = vpop.permute.xlu1 %3604  ;;  %v3603_v47 = vpop.permute.xlu0 %3602 }
 0x343   : > { %v3610_v8 = vsel %vm713_vm7, %v3603_v47, %v3605_v11 }
 0x344   : > { %v3614_v63 = vadd.f32 %v3610_v8, %v3577_v6 }
 0x346   : > { %v3609_v43 = vpop.permute.xlu1 %3608  ;;  %v3607_v56 = vpop.permute.xlu0 %3606 }
 0x347   : > { %v3611_v21 = vsel %vm713_vm7, %v3607_v56, %v3609_v43 }
 0x348   : > { %v3615_v13 = vadd.f32 %v3611_v21, %v3578_v30 }
 0x34a   : > { %v3642_v54 = vpop.permute.xlu1 %3641  ;;  %v3640_v12 = vpop.permute.xlu0 %3639 }
 0x34b   : > { %v3647_v26 = vsel %vm713_vm7, %v3640_v12, %v3642_v54 }
 0x34c   : > { %v3651_v1 = vadd.f32 %v3647_v26, %v3614_v63 }
 0x34e   : > { %v3654_v48 = vadd.f32 %v3653_v60, %v3651_v1  ;;  %v3646_v51 = vpop.permute.xlu1 %3645  ;;  %v3644_v52 = vpop.permute.xlu0 %3643 }
 0x34f   : > { %v3648_v19 = vsel %vm713_vm7, %v3644_v52, %v3646_v51 }
 0x350   : > { %v3815_v24 = vmul.f32 -1.442695, %v3654_v48  ;;  %v3652_v2 = vadd.f32 %v3648_v19, %v3615_v13 }
 0x352   : > { %3915 = vpow2.f32 %v3815_v24  ;;  %v3655_v15 = vadd.f32 %v3653_v60, %v3652_v2 }
 0x354   : > { %v3816_v59 = vmul.f32 -1.442695, %v3655_v15 }
 0x356   : > { %3917 = vpow2.f32 %v3816_v59 }
 0x35c   : > { %v3916_v42 = vpop.eup %3915 }
 0x35d   : > { %v3662_v4 = vadd.f32 1.0, %v3916_v42 }
 0x35f   : > { %3919 = vrcp.f32 %v3662_v4 }
 0x360   : > { %v3918_v41 = vpop.eup %3917 }
 0x361   : > { %v3663_v33 = vadd.f32 1.0, %v3918_v41 }
 0x363   : > { %3921 = vrcp.f32 %v3663_v33 }
 0x369   : > { %v3920_v17 = vpop.eup %3919 }
 0x36a   : > { %3668 = vst [vmem:[%s226_s4] sm:$0xff] %v3920_v17 }
 0x36d   : > { %v3922_v34 = vpop.eup %3921 }
 0x36e   : > { %3669 = vst [vmem:[%s226_s4 + $0x8] sm:$0xff] %v3922_v34 }
 0x36f   : > { %3983 = shalt.err (!%p3980_p4)
}
 0x370   : > { %s3984_s1 = scalar_lea.hbm %s6936_s5, 256  ;;  %s3988_s11 = scalar_lea.hbm %s6995_s3, 2048 }
 0x371   : > { %p3985_p5 = scmp.ne.s32.totalorder %s6936_s5, %s3984_s1  ;;  %p3989_p9 = scmp.lt.u32.totalorder %s6936_s5, %s6995_s3 }
 0x372   : > { %p3990_p11 = scmp.lt.u32.totalorder %s3988_s11, %s3984_s1  ;;  %p3992_p8 = scmp.lt.u32.totalorder %s3984_s1, %s6936_s5 }
 0x373   : > { %p3986_p6 = pnand %p3985_p5, %p4152_p3 }
 0x374   : > { %p3991_p13 = por %p3990_p11, %p3989_p9 }
 0x375   : > { %p3987_p7 = pneg %p3986_p6 }
 0x376   : > { %p3993_p10 = por %p3992_p8, %p3991_p13 }
 0x378   : > { %p3994_p12 = pnand %p3993_p10, %p3987_p7 }
 0x37a   : > { %3997 = shalt.err (!%p3994_p12)
}
 0x37b   : > { %s4078_s20 = smov 128   ;;  %s4079_s21 = smov 8  }
 0x37c   : > { %3829 = dma.vmem_to_hbm [thread:$0]  (%p4152_p3), %s6938_s25, 256, %s6936_s5, %s6940_s15, %s4078_s20, %s4078_s20, %s4079_s21  }
 0x37d PF: > { %p3841_p0 = scmp.ge.s32.totalorder %s4068_s19, 2  ;;  %s3701_s2 = sand.u32 1, %s4040_s12  }
 0x37e   : > { %p7260_p1 = scmp.ne.s32.totalorder %s7006_s27, 0  ;;  %s3702_s4 = scalar_lea.sflag [#allocation3], %s3701_s2 }
 0x380   : > { %p3836_p2 = pnand %p3841_p0, %p7260_p1 }
 0x382   : > { %4035 = dma.done.wait (!%p3836_p2), %s3702_s4, 256  }
 0x383   : > { %4037 = vsyncadd (!%p3836_p2), %s3702_s4, 4294967040  ;;  %s17_s19 = sadd.s32 1, %s4068_s19   ;;  %s7261_s12 = smov %s4044_s13 }
 0x384   : > { %p14_p4 = scmp.ge.s32.totalorder %s17_s19, 10   ;;  %s7262_s13 = smov %s4048_s14 }
 0x385   : > { %s7263_s14 = smov %s4182_s8  ;;  %s7264_s15 = smov %s4060_s17 }
 0x386   : > { %s7265_s16 = smov %s4064_s18  ;;  %s7266_s17 = smov %s7269_s22 }
 0x387   : > { %s7267_s18 = smov %s7273_s23  ;;  %16 = sbr.rel (!%p14_p4) target bundleno = 10 (0xa), region = 75 }
 0x38e   :  { %3707 = vsyncpa [#allocation3], 1 }
 0x38f   :  { %3709 = vsyncpa [#allocation3 + $0x1], 1 }
 0x390   :  { %3710 = vsyncpa [#allocation4], 1 }
 0x391   :  { %3712 = vsyncpa [#allocation4 + $0x1], 1 }

</bundles_post_ra>
